<compile_context>
chip_gen: v5e
topology: v5e:2x2
jax: 0.10.0
libtpu: 0.0.40
codegen_flags: <defaults>
</compile_context>

<pallas_src>
import functools

import jax
import jax.numpy as jnp
import numpy as np
from jax import lax
from jax.experimental import pallas as pl
from jax.experimental.pallas import tpu as pltpu

LANE = 128  # packed (W, C) lane width, padded to a full vreg row


# ----------------------------- Pallas kernel --------------------------------

def _bottom_block_kernel(x_ref, band1_ref, bias1_ref, band2_ref, bias2_ref,
                         o_ref, stage_ref, pad_ref, *, d, h, td):
    """Fused conv1 + ReLU6 + conv2 + ReLU6 for one (batch, D-tile) step.

    x_ref     : (d+4, h+2, 128)   zero-padded bf16 input slab for this batch
                                  (D halo of 2, H halo of 1, (W,C) on lanes)
    band1_ref : (9*128, 128)      conv1 banded weights, padded-W output columns
    bias1_ref : (1, 128)          conv1 bias tiled over W (0 at borders / pad)
    band2_ref : (9*128, 128)      conv2 banded weights, dense-W output columns
    bias2_ref : (1, 128)          conv2 bias tiled over W (0 in pad lanes)
    o_ref     : (td*h, 128)       output tile (lanes 0..w*c-1 are real)
    stage_ref : ((td+2)*h, 9*128) bf16 concatenated-K staging scratch
    pad_ref   : (td+2, h+2, 128)  bf16 H-padded conv1->conv2 intermediate
    """
    j = pl.program_id(1)
    m1 = (td + 2) * h          # conv1 rows (includes 1-row D halo each side)
    m2 = td * h                # conv2 / output rows

    # ---- conv1: build concatenated-K staging (9 shifted slabs), one MXU dot --
    for kd in range(3):
        xk = x_ref[pl.ds(j * td + kd, td + 2), :, :]          # (td+2, h+2, 128)
        for kh in range(3):
            t = kd * 3 + kh
            stage_ref[:, t * LANE:(t + 1) * LANE] = (
                xk[:, kh:kh + h, :].reshape(m1, LANE))
    y1 = jnp.dot(stage_ref[...], band1_ref[...],
                 preferred_element_type=jnp.float32)
    # Bias + ReLU6 fused in f32; W-border / pad columns stay exactly 0 because
    # the band columns and the tiled bias are 0 there and ReLU6(0) == 0.
    y1 = jnp.clip(y1 + bias1_ref[...], 0.0, 6.0).reshape(td + 2, h, LANE)

    # Zero the D-halo rows that fall outside the real volume (conv2's zero pad).
    g = j * td - 1 + lax.broadcasted_iota(jnp.int32, (td + 2, 1, 1), 0)
    y1 = jnp.where((g >= 0) & (g < d), y1, 0.0)

    # Intermediate stays in VMEM (bf16); zero only the two H-border strips.
    pad_ref[:, 0:1, :] = jnp.zeros((td + 2, 1, LANE), pad_ref.dtype)
    pad_ref[:, h + 1:h + 2, :] = jnp.zeros((td + 2, 1, LANE), pad_ref.dtype)
    pad_ref[:, 1:h + 1, :] = y1.astype(pad_ref.dtype)

    # ---- conv2: same concatenated-K trick, dense-W output, one MXU dot -------
    for kd in range(3):
        for kh in range(3):
            t = kd * 3 + kh
            stage_ref[0:m2, t * LANE:(t + 1) * LANE] = (
                pad_ref[kd:kd + td, kh:kh + h, :].reshape(m2, LANE))
    y2 = jnp.dot(stage_ref[0:m2, :], band2_ref[...],
                 preferred_element_type=jnp.float32)
    o_ref[...] = jnp.clip(y2 + bias2_ref[...], 0.0, 6.0)


# ----------------------------- weight repacking ------------------------------

def _banded_conv_weights(w_oikkk, width, pad_out, lane=LANE):
    """Pack a PyTorch Conv3d weight (Cout, Cin, 3, 3, 3) into a (9*lane, lane)
    block-banded matrix: rows [t*lane + (wo+kw)*Cin + ci] -> cols [col(wo)*Cout + co]
    for tap t = kd*3 + kh; kw and the Cin->Cout mixing are folded in.  If
    pad_out, output columns use the padded-W layout with zero border columns
    (so conv1's result can feed conv2 directly)."""
    w_np = np.asarray(w_oikkk, dtype=np.float32)
    cout, cin = int(w_np.shape[0]), int(w_np.shape[1])
    assert (width + 2) * cin <= lane
    assert ((width + 2) if pad_out else width) * cout <= lane
    band = np.zeros((9, lane, lane), np.float32)
    off = 1 if pad_out else 0
    for kd in range(3):
        for kh in range(3):
            t = kd * 3 + kh
            for kw in range(3):
                blk = w_np[:, :, kd, kh, kw].T          # (cin, cout)
                for wo in range(width):
                    r = (wo + kw) * cin                 # padded-W input lane
                    col = (wo + off) * cout             # output lane
                    band[t, r:r + cin, col:col + cout] = blk
    return band.reshape(9 * lane, lane)


def _tiled_bias(bias, width, pad_out, lane=LANE):
    b_np = np.asarray(bias, dtype=np.float32)
    c = b_np.shape[0]
    off = 1 if pad_out else 0
    out = np.zeros((1, lane), np.float32)
    for wo in range(width):
        out[0, (wo + off) * c:(wo + off + 1) * c] = b_np
    return out


def prepare_params(conv1_w, conv1_b, conv2_w, conv2_b, width,
                   matmul_dtype=jnp.bfloat16):
    """Repack PyTorch-layout Conv3d weights/biases for the fused kernel.
    bf16 weights are the default on all of v5e/v6e/v7x (f32 accumulation)."""
    return {
        "band1": jnp.asarray(_banded_conv_weights(conv1_w, width, True),
                             matmul_dtype),
        "bias1": jnp.asarray(_tiled_bias(conv1_b, width, True), jnp.float32),
        "band2": jnp.asarray(_banded_conv_weights(conv2_w, width, False),
                             matmul_dtype),
        "bias2": jnp.asarray(_tiled_bias(conv2_b, width, False), jnp.float32),
    }


# ----------------------------- forward wrapper -------------------------------

@functools.partial(jax.jit, static_argnames=("td",))
def bottom_block(x_ncdhw, params, *, td=4):
    """BottomBlock forward.  Input/output are NCDHW float32."""
    n, c, d, h, w = x_ncdhw.shape
    assert (w + 2) * c <= LANE and w * c <= LANE
    assert d % td == 0
    nd = d // td

    # NCDHW -> channels-last, D halo of 2 (two stacked convs), H/W halo of 1,
    # (W, C) flattened onto lanes, zero-padded to 128 lanes, bf16 activations.
    x = jnp.transpose(x_ncdhw, (0, 2, 3, 4, 1))
    xp = jnp.pad(x, ((0, 0), (2, 2), (1, 1), (1, 1), (0, 0)))
    xp = xp.reshape(n, d + 4, h + 2, (w + 2) * c)
    xp = jnp.pad(xp, ((0, 0), (0, 0), (0, 0), (0, LANE - (w + 2) * c)))
    xp = xp.astype(jnp.bfloat16)

    kernel = functools.partial(_bottom_block_kernel, d=d, h=h, td=td)

    out = pl.pallas_call(
        kernel,
        out_shape=jax.ShapeDtypeStruct((n, d * h, LANE), jnp.float32),
        grid=(n, nd),
        in_specs=[
            # Whole padded batch slab; constant over the D-tile axis so it is
            # DMA'd once per batch and sliced with a halo inside the kernel.
            pl.BlockSpec((None, d + 4, h + 2, LANE), lambda i, j: (i, 0, 0, 0)),
            pl.BlockSpec((9 * LANE, LANE), lambda i, j: (0, 0)),
            pl.BlockSpec((1, LANE), lambda i, j: (0, 0)),
            pl.BlockSpec((9 * LANE, LANE), lambda i, j: (0, 0)),
            pl.BlockSpec((1, LANE), lambda i, j: (0, 0)),
        ],
        out_specs=pl.BlockSpec((None, td * h, LANE), lambda i, j: (i, j, 0)),
        scratch_shapes=[
            pltpu.VMEM(((td + 2) * h, 9 * LANE), jnp.bfloat16),   # staging
            pltpu.VMEM((td + 2, h + 2, LANE), jnp.bfloat16),      # intermediate
        ],
        compiler_params=pltpu.CompilerParams(
            dimension_semantics=("parallel", "arbitrary")),
    )(xp, params["band1"], params["bias1"], params["band2"], params["bias2"])

    out = out.reshape(n, d, h, LANE)[..., :w * c].reshape(n, d, h, w, c)
    return jnp.transpose(out, (0, 4, 1, 2, 3))


# ----------------------------- reference (pure JAX) --------------------------

def _reference(x, w1, b1, w2, b2):
    def conv(v, wt, bt):
        out = lax.conv_general_dilated(
            v, wt, window_strides=(1, 1, 1), padding=[(1, 1)] * 3,
            dimension_numbers=("NCDHW", "OIDHW", "NCDHW"),
            precision=lax.Precision.HIGHEST)
        return out + bt.reshape(1, -1, 1, 1, 1)

    y = jnp.clip(conv(x, w1, b1), 0.0, 6.0)
    return jnp.clip(conv(y, w2, b2), 0.0, 6.0)


# ----------------------------- main ------------------------------------------

if __name__ == "__main__":
    key = jax.random.PRNGKey(0)
    n, c, d, h, w = 2, 4, 16, 16, 16

    ks = jax.random.split(key, 5)
    x = jax.random.normal(ks[0], (n, c, d, h, w), jnp.float32)
    conv1_w = 0.1 * jax.random.normal(ks[1], (c, c, 3, 3, 3), jnp.float32)
    conv1_b = 0.1 * jax.random.normal(ks[2], (c,), jnp.float32)
    conv2_w = 0.1 * jax.random.normal(ks[3], (c, c, 3, 3, 3), jnp.float32)
    conv2_b = 0.1 * jax.random.normal(ks[4], (c,), jnp.float32)

    params = prepare_params(conv1_w, conv1_b, conv2_w, conv2_b, w)
    out = jax.block_until_ready(bottom_block(x, params, td=4))
    assert out.shape == (n, c, d, h, w), out.shape

    ref = jax.block_until_ready(_reference(x, conv1_w, conv1_b, conv2_w, conv2_b))
    # bf16 operands (activations + weights), f32 accumulation + f32 epilogue.
    np.testing.assert_allclose(np.asarray(out), np.asarray(ref),
                               rtol=2e-2, atol=2e-2)

    print("KERNEL_OK")
</pallas_src>

<mosaic_0001>
module attributes {stable_mosaic.version = 11 : i64} {
  func.func @_bottom_block_kernel(%arg0: i32, %arg1: i32, %arg2: memref<1x20x18x128xbf16, #tpu.memory_space<vmem>>, %arg3: memref<1152x128xbf16, #tpu.memory_space<vmem>>, %arg4: memref<1x128xf32, #tpu.memory_space<vmem>>, %arg5: memref<1152x128xbf16, #tpu.memory_space<vmem>>, %arg6: memref<1x128xf32, #tpu.memory_space<vmem>>, %arg7: memref<1x64x128xf32, #tpu.memory_space<vmem>>, %arg8: memref<96x1152xbf16, #tpu.memory_space<vmem>>, %arg9: memref<6x18x128xbf16, #tpu.memory_space<vmem>>) attributes {dimension_semantics = [#tpu.dimension_semantics<parallel>, #tpu.dimension_semantics<arbitrary>], iteration_bounds = array<i64: 2, 4>, scalar_prefetch = 0 : i64, scratch_operands = 2 : i64, tpu.core_type = #tpu.core_type<tc>, window_params = [{transform_indices = @transform_0, window_bounds = array<i64: 1, 20, 18, 128>}, {pipeline_mode = #tpu.pipeline_mode<synchronous>, transform_indices = @transform_1, window_bounds = array<i64: 1152, 128>}, {pipeline_mode = #tpu.pipeline_mode<synchronous>, transform_indices = @transform_2, window_bounds = array<i64: 1, 128>}, {pipeline_mode = #tpu.pipeline_mode<synchronous>, transform_indices = @transform_3, window_bounds = array<i64: 1152, 128>}, {pipeline_mode = #tpu.pipeline_mode<synchronous>, transform_indices = @transform_4, window_bounds = array<i64: 1, 128>}, {transform_indices = @transform_5, window_bounds = array<i64: 1, 64, 128>}]} {
    %c4_i32 = arith.constant 4 : i32
    %0 = arith.muli %arg1, %c4_i32 : i32
    %c0_i32 = arith.constant 0 : i32
    %1 = arith.addi %0, %c0_i32 : i32
    %c0 = arith.constant 0 : index
    %2 = arith.index_cast %1 : i32 to index
    %c0_0 = arith.constant 0 : index
    %c0_1 = arith.constant 0 : index
    %3 = vector.load %arg2[%c0, %2, %c0_0, %c0_1] : memref<1x20x18x128xbf16, #tpu.memory_space<vmem>>, vector<1x6x18x128xbf16>
    %4 = vector.shape_cast %3 : vector<1x6x18x128xbf16> to vector<6x18x128xbf16>
    %5 = vector.extract_strided_slice %4 {offsets = [0, 0, 0], sizes = [6, 16, 128], strides = [1, 1, 1]} : vector<6x18x128xbf16> to vector<6x16x128xbf16>
    %6 = vector.shape_cast %5 : vector<6x16x128xbf16> to vector<96x128xbf16>
    %c0_2 = arith.constant 0 : index
    %c0_3 = arith.constant 0 : index
    %7 = vector.load %arg8[%c0_2, %c0_3] : memref<96x1152xbf16, #tpu.memory_space<vmem>>, vector<96x128xbf16>
    tpu.vector_store %arg8[%c0_2, %c0_3], %6 {strides = array<i32>} : memref<96x1152xbf16, #tpu.memory_space<vmem>>, vector<96x128xbf16>,
    %8 = vector.extract_strided_slice %4 {offsets = [0, 1, 0], sizes = [6, 16, 128], strides = [1, 1, 1]} : vector<6x18x128xbf16> to vector<6x16x128xbf16>
    %9 = vector.shape_cast %8 : vector<6x16x128xbf16> to vector<96x128xbf16>
    %c0_4 = arith.constant 0 : index
    %c128 = arith.constant 128 : index
    %10 = vector.load %arg8[%c0_4, %c128] : memref<96x1152xbf16, #tpu.memory_space<vmem>>, vector<96x128xbf16>
    tpu.vector_store %arg8[%c0_4, %c128], %9 {strides = array<i32>} : memref<96x1152xbf16, #tpu.memory_space<vmem>>, vector<96x128xbf16>,
    %11 = vector.extract_strided_slice %4 {offsets = [0, 2, 0], sizes = [6, 16, 128], strides = [1, 1, 1]} : vector<6x18x128xbf16> to vector<6x16x128xbf16>
    %12 = vector.shape_cast %11 : vector<6x16x128xbf16> to vector<96x128xbf16>
    %c0_5 = arith.constant 0 : index
    %c256 = arith.constant 256 : index
    %13 = vector.load %arg8[%c0_5, %c256] : memref<96x1152xbf16, #tpu.memory_space<vmem>>, vector<96x128xbf16>
    tpu.vector_store %arg8[%c0_5, %c256], %12 {strides = array<i32>} : memref<96x1152xbf16, #tpu.memory_space<vmem>>, vector<96x128xbf16>,
    %c4_i32_6 = arith.constant 4 : i32
    %14 = arith.muli %arg1, %c4_i32_6 : i32
    %c1_i32 = arith.constant 1 : i32
    %15 = arith.addi %14, %c1_i32 : i32
    %c0_7 = arith.constant 0 : index
    %16 = arith.index_cast %15 : i32 to index
    %c0_8 = arith.constant 0 : index
    %c0_9 = arith.constant 0 : index
    %17 = vector.load %arg2[%c0_7, %16, %c0_8, %c0_9] : memref<1x20x18x128xbf16, #tpu.memory_space<vmem>>, vector<1x6x18x128xbf16>
    %18 = vector.shape_cast %17 : vector<1x6x18x128xbf16> to vector<6x18x128xbf16>
    %19 = vector.extract_strided_slice %18 {offsets = [0, 0, 0], sizes = [6, 16, 128], strides = [1, 1, 1]} : vector<6x18x128xbf16> to vector<6x16x128xbf16>
    %20 = vector.shape_cast %19 : vector<6x16x128xbf16> to vector<96x128xbf16>
    %c0_10 = arith.constant 0 : index
    %c384 = arith.constant 384 : index
    %21 = vector.load %arg8[%c0_10, %c384] : memref<96x1152xbf16, #tpu.memory_space<vmem>>, vector<96x128xbf16>
    tpu.vector_store %arg8[%c0_10, %c384], %20 {strides = array<i32>} : memref<96x1152xbf16, #tpu.memory_space<vmem>>, vector<96x128xbf16>,
    %22 = vector.extract_strided_slice %18 {offsets = [0, 1, 0], sizes = [6, 16, 128], strides = [1, 1, 1]} : vector<6x18x128xbf16> to vector<6x16x128xbf16>
    %23 = vector.shape_cast %22 : vector<6x16x128xbf16> to vector<96x128xbf16>
    %c0_11 = arith.constant 0 : index
    %c512 = arith.constant 512 : index
    %24 = vector.load %arg8[%c0_11, %c512] : memref<96x1152xbf16, #tpu.memory_space<vmem>>, vector<96x128xbf16>
    tpu.vector_store %arg8[%c0_11, %c512], %23 {strides = array<i32>} : memref<96x1152xbf16, #tpu.memory_space<vmem>>, vector<96x128xbf16>,
    %25 = vector.extract_strided_slice %18 {offsets = [0, 2, 0], sizes = [6, 16, 128], strides = [1, 1, 1]} : vector<6x18x128xbf16> to vector<6x16x128xbf16>
    %26 = vector.shape_cast %25 : vector<6x16x128xbf16> to vector<96x128xbf16>
    %c0_12 = arith.constant 0 : index
    %c640 = arith.constant 640 : index
    %27 = vector.load %arg8[%c0_12, %c640] : memref<96x1152xbf16, #tpu.memory_space<vmem>>, vector<96x128xbf16>
    tpu.vector_store %arg8[%c0_12, %c640], %26 {strides = array<i32>} : memref<96x1152xbf16, #tpu.memory_space<vmem>>, vector<96x128xbf16>,
    %c4_i32_13 = arith.constant 4 : i32
    %28 = arith.muli %arg1, %c4_i32_13 : i32
    %c2_i32 = arith.constant 2 : i32
    %29 = arith.addi %28, %c2_i32 : i32
    %c0_14 = arith.constant 0 : index
    %30 = arith.index_cast %29 : i32 to index
    %c0_15 = arith.constant 0 : index
    %c0_16 = arith.constant 0 : index
    %31 = vector.load %arg2[%c0_14, %30, %c0_15, %c0_16] : memref<1x20x18x128xbf16, #tpu.memory_space<vmem>>, vector<1x6x18x128xbf16>
    %32 = vector.shape_cast %31 : vector<1x6x18x128xbf16> to vector<6x18x128xbf16>
    %33 = vector.extract_strided_slice %32 {offsets = [0, 0, 0], sizes = [6, 16, 128], strides = [1, 1, 1]} : vector<6x18x128xbf16> to vector<6x16x128xbf16>
    %34 = vector.shape_cast %33 : vector<6x16x128xbf16> to vector<96x128xbf16>
    %c0_17 = arith.constant 0 : index
    %c768 = arith.constant 768 : index
    %35 = vector.load %arg8[%c0_17, %c768] : memref<96x1152xbf16, #tpu.memory_space<vmem>>, vector<96x128xbf16>
    tpu.vector_store %arg8[%c0_17, %c768], %34 {strides = array<i32>} : memref<96x1152xbf16, #tpu.memory_space<vmem>>, vector<96x128xbf16>,
    %36 = vector.extract_strided_slice %32 {offsets = [0, 1, 0], sizes = [6, 16, 128], strides = [1, 1, 1]} : vector<6x18x128xbf16> to vector<6x16x128xbf16>
    %37 = vector.shape_cast %36 : vector<6x16x128xbf16> to vector<96x128xbf16>
    %c0_18 = arith.constant 0 : index
    %c896 = arith.constant 896 : index
    %38 = vector.load %arg8[%c0_18, %c896] : memref<96x1152xbf16, #tpu.memory_space<vmem>>, vector<96x128xbf16>
    tpu.vector_store %arg8[%c0_18, %c896], %37 {strides = array<i32>} : memref<96x1152xbf16, #tpu.memory_space<vmem>>, vector<96x128xbf16>,
    %39 = vector.extract_strided_slice %32 {offsets = [0, 2, 0], sizes = [6, 16, 128], strides = [1, 1, 1]} : vector<6x18x128xbf16> to vector<6x16x128xbf16>
    %40 = vector.shape_cast %39 : vector<6x16x128xbf16> to vector<96x128xbf16>
    %c0_19 = arith.constant 0 : index
    %c1024 = arith.constant 1024 : index
    %41 = vector.load %arg8[%c0_19, %c1024] : memref<96x1152xbf16, #tpu.memory_space<vmem>>, vector<96x128xbf16>
    tpu.vector_store %arg8[%c0_19, %c1024], %40 {strides = array<i32>} : memref<96x1152xbf16, #tpu.memory_space<vmem>>, vector<96x128xbf16>,
    %c0_20 = arith.constant 0 : index
    %c0_21 = arith.constant 0 : index
    %42 = vector.load %arg8[%c0_20, %c0_21] : memref<96x1152xbf16, #tpu.memory_space<vmem>>, vector<96x1152xbf16>
    %c0_22 = arith.constant 0 : index
    %c0_23 = arith.constant 0 : index
    %43 = vector.load %arg3[%c0_22, %c0_23] : memref<1152x128xbf16, #tpu.memory_space<vmem>>, vector<1152x128xbf16>
    %cst = arith.constant dense<0.000000e+00> : vector<96x128xf32>
    %44 = tpu.matmul %42, %43, %cst {dimension_numbers = #tpu.dot_dimension_numbers<[1], [0], [0], [1], [0, 0, 1, 1], [], []>} : vector<96x1152xbf16>, vector<1152x128xbf16>, vector<96x128xf32> -> vector<96x128xf32>
    %c0_24 = arith.constant 0 : index
    %c0_25 = arith.constant 0 : index
    %45 = vector.load %arg4[%c0_24, %c0_25] : memref<1x128xf32, #tpu.memory_space<vmem>>, vector<1x128xf32>
    %46 = vector.broadcast %45 : vector<1x128xf32> to vector<96x128xf32>
    %47 = arith.addf %44, %46 : vector<96x128xf32>
    %cst_26 = arith.constant 0.000000e+00 : f32
    %cst_27 = arith.constant 6.000000e+00 : f32
    %48 = vector.broadcast %cst_26 : f32 to vector<96x128xf32>
    %49 = arith.maximumf %48, %47 : vector<96x128xf32>
    %50 = vector.broadcast %cst_27 : f32 to vector<96x128xf32>
    %51 = arith.minimumf %50, %49 : vector<96x128xf32>
    %52 = vector.shape_cast %51 : vector<96x128xf32> to vector<6x16x128xf32>
    %c4_i32_28 = arith.constant 4 : i32
    %53 = arith.muli %arg1, %c4_i32_28 : i32
    %c1_i32_29 = arith.constant 1 : i32
    %54 = arith.subi %53, %c1_i32_29 : i32
    %55 = tpu.iota {dimensions = array<i32: 0>} : vector<6x1x1xi32>
    %56 = vector.broadcast %54 : i32 to vector<6x1x1xi32>
    %57 = arith.addi %56, %55 : vector<6x1x1xi32>
    %c0_i32_30 = arith.constant 0 : i32
    %58 = vector.broadcast %c0_i32_30 : i32 to vector<6x1x1xi32>
    %59 = arith.cmpi sge, %57, %58 : vector<6x1x1xi32>
    %c16_i32 = arith.constant 16 : i32
    %60 = vector.broadcast %c16_i32 : i32 to vector<6x1x1xi32>
    %61 = arith.cmpi slt, %57, %60 : vector<6x1x1xi32>
    %62 = arith.andi %59, %61 : vector<6x1x1xi1>
    %cst_31 = arith.constant 0.000000e+00 : f32
    %63 = vector.shape_cast %62 : vector<6x1x1xi1> to vector<6x1x1xi1>
    %64 = vector.broadcast %63 : vector<6x1x1xi1> to vector<6x16x128xi1>
    %65 = vector.broadcast %cst_31 : f32 to vector<6x16x128xf32>
    %66 = arith.select %64, %52, %65 : vector<6x16x128xi1>, vector<6x16x128xf32>
    %cst_32 = arith.constant 0.000000e+00 : bf16
    %67 = vector.broadcast %cst_32 : bf16 to vector<6x1x128xbf16>
    %c0_33 = arith.constant 0 : index
    %c0_34 = arith.constant 0 : index
    %c0_35 = arith.constant 0 : index
    %68 = vector.load %arg9[%c0_33, %c0_34, %c0_35] : memref<6x18x128xbf16, #tpu.memory_space<vmem>>, vector<6x1x128xbf16>
    tpu.vector_store %arg9[%c0_33, %c0_34, %c0_35], %67 {strides = array<i32>} : memref<6x18x128xbf16, #tpu.memory_space<vmem>>, vector<6x1x128xbf16>,
    %cst_36 = arith.constant 0.000000e+00 : bf16
    %69 = vector.broadcast %cst_36 : bf16 to vector<6x1x128xbf16>
    %c0_37 = arith.constant 0 : index
    %c17 = arith.constant 17 : index
    %c0_38 = arith.constant 0 : index
    %70 = vector.load %arg9[%c0_37, %c17, %c0_38] : memref<6x18x128xbf16, #tpu.memory_space<vmem>>, vector<6x1x128xbf16>
    tpu.vector_store %arg9[%c0_37, %c17, %c0_38], %69 {strides = array<i32>} : memref<6x18x128xbf16, #tpu.memory_space<vmem>>, vector<6x1x128xbf16>,
    %71 = arith.truncf %66 : vector<6x16x128xf32> to vector<6x16x128xbf16>
    %c0_39 = arith.constant 0 : index
    %c1 = arith.constant 1 : index
    %c0_40 = arith.constant 0 : index
    %72 = vector.load %arg9[%c0_39, %c1, %c0_40] : memref<6x18x128xbf16, #tpu.memory_space<vmem>>, vector<6x16x128xbf16>
    tpu.vector_store %arg9[%c0_39, %c1, %c0_40], %71 {strides = array<i32>} : memref<6x18x128xbf16, #tpu.memory_space<vmem>>, vector<6x16x128xbf16>,
    %c0_41 = arith.constant 0 : index
    %c0_42 = arith.constant 0 : index
    %c0_43 = arith.constant 0 : index
    %73 = vector.load %arg9[%c0_41, %c0_42, %c0_43] : memref<6x18x128xbf16, #tpu.memory_space<vmem>>, vector<4x16x128xbf16>
    %74 = vector.shape_cast %73 : vector<4x16x128xbf16> to vector<64x128xbf16>
    %c0_44 = arith.constant 0 : index
    %c0_45 = arith.constant 0 : index
    %75 = vector.load %arg8[%c0_44, %c0_45] : memref<96x1152xbf16, #tpu.memory_space<vmem>>, vector<64x128xbf16>
    tpu.vector_store %arg8[%c0_44, %c0_45], %74 {strides = array<i32>} : memref<96x1152xbf16, #tpu.memory_space<vmem>>, vector<64x128xbf16>,
    %c0_46 = arith.constant 0 : index
    %c1_47 = arith.constant 1 : index
    %c0_48 = arith.constant 0 : index
    %76 = vector.load %arg9[%c0_46, %c1_47, %c0_48] : memref<6x18x128xbf16, #tpu.memory_space<vmem>>, vector<4x16x128xbf16>
    %77 = vector.shape_cast %76 : vector<4x16x128xbf16> to vector<64x128xbf16>
    %c0_49 = arith.constant 0 : index
    %c128_50 = arith.constant 128 : index
    %78 = vector.load %arg8[%c0_49, %c128_50] : memref<96x1152xbf16, #tpu.memory_space<vmem>>, vector<64x128xbf16>
    tpu.vector_store %arg8[%c0_49, %c128_50], %77 {strides = array<i32>} : memref<96x1152xbf16, #tpu.memory_space<vmem>>, vector<64x128xbf16>,
    %c0_51 = arith.constant 0 : index
    %c2 = arith.constant 2 : index
    %c0_52 = arith.constant 0 : index
    %79 = vector.load %arg9[%c0_51, %c2, %c0_52] : memref<6x18x128xbf16, #tpu.memory_space<vmem>>, vector<4x16x128xbf16>
    %80 = vector.shape_cast %79 : vector<4x16x128xbf16> to vector<64x128xbf16>
    %c0_53 = arith.constant 0 : index
    %c256_54 = arith.constant 256 : index
    %81 = vector.load %arg8[%c0_53, %c256_54] : memref<96x1152xbf16, #tpu.memory_space<vmem>>, vector<64x128xbf16>
    tpu.vector_store %arg8[%c0_53, %c256_54], %80 {strides = array<i32>} : memref<96x1152xbf16, #tpu.memory_space<vmem>>, vector<64x128xbf16>,
    %c1_55 = arith.constant 1 : index
    %c0_56 = arith.constant 0 : index
    %c0_57 = arith.constant 0 : index
    %82 = vector.load %arg9[%c1_55, %c0_56, %c0_57] : memref<6x18x128xbf16, #tpu.memory_space<vmem>>, vector<4x16x128xbf16>
    %83 = vector.shape_cast %82 : vector<4x16x128xbf16> to vector<64x128xbf16>
    %c0_58 = arith.constant 0 : index
    %c384_59 = arith.constant 384 : index
    %84 = vector.load %arg8[%c0_58, %c384_59] : memref<96x1152xbf16, #tpu.memory_space<vmem>>, vector<64x128xbf16>
    tpu.vector_store %arg8[%c0_58, %c384_59], %83 {strides = array<i32>} : memref<96x1152xbf16, #tpu.memory_space<vmem>>, vector<64x128xbf16>,
    %c1_60 = arith.constant 1 : index
    %c1_61 = arith.constant 1 : index
    %c0_62 = arith.constant 0 : index
    %85 = vector.load %arg9[%c1_60, %c1_61, %c0_62] : memref<6x18x128xbf16, #tpu.memory_space<vmem>>, vector<4x16x128xbf16>
    %86 = vector.shape_cast %85 : vector<4x16x128xbf16> to vector<64x128xbf16>
    %c0_63 = arith.constant 0 : index
    %c512_64 = arith.constant 512 : index
    %87 = vector.load %arg8[%c0_63, %c512_64] : memref<96x1152xbf16, #tpu.memory_space<vmem>>, vector<64x128xbf16>
    tpu.vector_store %arg8[%c0_63, %c512_64], %86 {strides = array<i32>} : memref<96x1152xbf16, #tpu.memory_space<vmem>>, vector<64x128xbf16>,
    %c1_65 = arith.constant 1 : index
    %c2_66 = arith.constant 2 : index
    %c0_67 = arith.constant 0 : index
    %88 = vector.load %arg9[%c1_65, %c2_66, %c0_67] : memref<6x18x128xbf16, #tpu.memory_space<vmem>>, vector<4x16x128xbf16>
    %89 = vector.shape_cast %88 : vector<4x16x128xbf16> to vector<64x128xbf16>
    %c0_68 = arith.constant 0 : index
    %c640_69 = arith.constant 640 : index
    %90 = vector.load %arg8[%c0_68, %c640_69] : memref<96x1152xbf16, #tpu.memory_space<vmem>>, vector<64x128xbf16>
    tpu.vector_store %arg8[%c0_68, %c640_69], %89 {strides = array<i32>} : memref<96x1152xbf16, #tpu.memory_space<vmem>>, vector<64x128xbf16>,
    %c2_70 = arith.constant 2 : index
    %c0_71 = arith.constant 0 : index
    %c0_72 = arith.constant 0 : index
    %91 = vector.load %arg9[%c2_70, %c0_71, %c0_72] : memref<6x18x128xbf16, #tpu.memory_space<vmem>>, vector<4x16x128xbf16>
    %92 = vector.shape_cast %91 : vector<4x16x128xbf16> to vector<64x128xbf16>
    %c0_73 = arith.constant 0 : index
    %c768_74 = arith.constant 768 : index
    %93 = vector.load %arg8[%c0_73, %c768_74] : memref<96x1152xbf16, #tpu.memory_space<vmem>>, vector<64x128xbf16>
    tpu.vector_store %arg8[%c0_73, %c768_74], %92 {strides = array<i32>} : memref<96x1152xbf16, #tpu.memory_space<vmem>>, vector<64x128xbf16>,
    %c2_75 = arith.constant 2 : index
    %c1_76 = arith.constant 1 : index
    %c0_77 = arith.constant 0 : index
    %94 = vector.load %arg9[%c2_75, %c1_76, %c0_77] : memref<6x18x128xbf16, #tpu.memory_space<vmem>>, vector<4x16x128xbf16>
    %95 = vector.shape_cast %94 : vector<4x16x128xbf16> to vector<64x128xbf16>
    %c0_78 = arith.constant 0 : index
    %c896_79 = arith.constant 896 : index
    %96 = vector.load %arg8[%c0_78, %c896_79] : memref<96x1152xbf16, #tpu.memory_space<vmem>>, vector<64x128xbf16>
    tpu.vector_store %arg8[%c0_78, %c896_79], %95 {strides = array<i32>} : memref<96x1152xbf16, #tpu.memory_space<vmem>>, vector<64x128xbf16>,
    %c2_80 = arith.constant 2 : index
    %c2_81 = arith.constant 2 : index
    %c0_82 = arith.constant 0 : index
    %97 = vector.load %arg9[%c2_80, %c2_81, %c0_82] : memref<6x18x128xbf16, #tpu.memory_space<vmem>>, vector<4x16x128xbf16>
    %98 = vector.shape_cast %97 : vector<4x16x128xbf16> to vector<64x128xbf16>
    %c0_83 = arith.constant 0 : index
    %c1024_84 = arith.constant 1024 : index
    %99 = vector.load %arg8[%c0_83, %c1024_84] : memref<96x1152xbf16, #tpu.memory_space<vmem>>, vector<64x128xbf16>
    tpu.vector_store %arg8[%c0_83, %c1024_84], %98 {strides = array<i32>} : memref<96x1152xbf16, #tpu.memory_space<vmem>>, vector<64x128xbf16>,
    %c0_85 = arith.constant 0 : index
    %c0_86 = arith.constant 0 : index
    %100 = vector.load %arg8[%c0_85, %c0_86] : memref<96x1152xbf16, #tpu.memory_space<vmem>>, vector<64x1152xbf16>
    %c0_87 = arith.constant 0 : index
    %c0_88 = arith.constant 0 : index
    %101 = vector.load %arg5[%c0_87, %c0_88] : memref<1152x128xbf16, #tpu.memory_space<vmem>>, vector<1152x128xbf16>
    %cst_89 = arith.constant dense<0.000000e+00> : vector<64x128xf32>
    %102 = tpu.matmul %100, %101, %cst_89 {dimension_numbers = #tpu.dot_dimension_numbers<[1], [0], [0], [1], [0, 0, 1, 1], [], []>} : vector<64x1152xbf16>, vector<1152x128xbf16>, vector<64x128xf32> -> vector<64x128xf32>
    %c0_90 = arith.constant 0 : index
    %c0_91 = arith.constant 0 : index
    %103 = vector.load %arg6[%c0_90, %c0_91] : memref<1x128xf32, #tpu.memory_space<vmem>>, vector<1x128xf32>
    %104 = vector.broadcast %103 : vector<1x128xf32> to vector<64x128xf32>
    %105 = arith.addf %102, %104 : vector<64x128xf32>
    %cst_92 = arith.constant 0.000000e+00 : f32
    %cst_93 = arith.constant 6.000000e+00 : f32
    %106 = vector.broadcast %cst_92 : f32 to vector<64x128xf32>
    %107 = arith.maximumf %106, %105 : vector<64x128xf32>
    %108 = vector.broadcast %cst_93 : f32 to vector<64x128xf32>
    %109 = arith.minimumf %108, %107 : vector<64x128xf32>
    %c0_94 = arith.constant 0 : index
    %c0_95 = arith.constant 0 : index
    %c0_96 = arith.constant 0 : index
    %110 = vector.load %arg7[%c0_94, %c0_95, %c0_96] : memref<1x64x128xf32, #tpu.memory_space<vmem>>, vector<1x64x128xf32>
    %111 = vector.shape_cast %110 : vector<1x64x128xf32> to vector<64x128xf32>
    %112 = vector.shape_cast %109 : vector<64x128xf32> to vector<1x64x128xf32>
    tpu.vector_store %arg7[%c0_94, %c0_95, %c0_96], %112 {strides = array<i32>} : memref<1x64x128xf32, #tpu.memory_space<vmem>>, vector<1x64x128xf32>,
    return
  }
  func.func @transform_0(%arg0: i32, %arg1: i32) -> (i32, i32, i32, i32) {
    %c0_i32 = arith.constant 0 : i32
    %c0_i32_0 = arith.constant 0 : i32
    %c0_i32_1 = arith.constant 0 : i32
    %c0_i32_2 = arith.constant 0 : i32
    return %arg0, %c0_i32, %c0_i32_0, %c0_i32_1 : i32, i32, i32, i32
  }
  func.func @transform_1(%arg0: i32, %arg1: i32) -> (i32, i32) {
    %c0_i32 = arith.constant 0 : i32
    %c0_i32_0 = arith.constant 0 : i32
    %c0_i32_1 = arith.constant 0 : i32
    return %c0_i32, %c0_i32_0 : i32, i32
  }
  func.func @transform_2(%arg0: i32, %arg1: i32) -> (i32, i32) {
    %c0_i32 = arith.constant 0 : i32
    %c0_i32_0 = arith.constant 0 : i32
    %c0_i32_1 = arith.constant 0 : i32
    return %c0_i32, %c0_i32_0 : i32, i32
  }
  func.func @transform_3(%arg0: i32, %arg1: i32) -> (i32, i32) {
    %c0_i32 = arith.constant 0 : i32
    %c0_i32_0 = arith.constant 0 : i32
    %c0_i32_1 = arith.constant 0 : i32
    return %c0_i32, %c0_i32_0 : i32, i32
  }
  func.func @transform_4(%arg0: i32, %arg1: i32) -> (i32, i32) {
    %c0_i32 = arith.constant 0 : i32
    %c0_i32_0 = arith.constant 0 : i32
    %c0_i32_1 = arith.constant 0 : i32
    return %c0_i32, %c0_i32_0 : i32, i32
  }
  func.func @transform_5(%arg0: i32, %arg1: i32) -> (i32, i32, i32) {
    %c0_i32 = arith.constant 0 : i32
    %c0_i32_0 = arith.constant 0 : i32
    return %arg0, %arg1, %c0_i32 : i32, i32, i32
  }
}

</mosaic_0001>

<bundles_post_ra>
// kernel: bottom_block.1
= control target key start
LH: loop header
LB: loop body
LE: loop exit
PB: predicated region body
PF: predicated region fallthrough
CT: control target
= control target key end

     0   :  { %s5867_s18 = smov 0   ;;  %s5869_s19 = smov 0   ;;  %s7488_s0 = inlined_call_operand.vmem [shape: bf16[2,20,18,128], index: 0, kind: input, shape index: {}]   ;;  %s7489_s1 = inlined_call_operand.vmem [shape: bf16[1152,128], index: 1, kind: input, shape index: {}]   ;;  %s7490_s2 = inlined_call_operand.vmem [shape: f32[1,128], index: 2, kind: input, shape index: {}]   ;;  %s7491_s3 = inlined_call_operand.vmem [shape: bf16[1152,128], index: 3, kind: input, shape index: {}]   ;;  %s7492_s4 = inlined_call_operand.vmem [shape: f32[1,128], index: 4, kind: input, shape index: {}]   ;;  %s7493_s5 = inlined_call_operand.vmem [shape: f32[2,256,128], index: 5, kind: output, shape index: {}]  }
   0x1   :  { %s5871_s20 = smov 0   ;;  %s5873_s21 = smov 0  }
   0x2   :  { %s5875_s22 = smov 0  }
   0x3 LB: > { %s24_s23 = sadd.s32 1, %s5827_s20  ;;  %s27_s24 = sadd.s32 1, %s5831_s21  ;;  %s5835_s22 = sphi %s5875_s22, %s15_s22   ;;  %s5831_s21 = sphi %s5873_s21, %s7521_s21   ;;  %s5827_s20 = sphi %s5871_s20, %s7520_s20   ;;  %s5823_s19 = sphi %s5869_s19, %s7519_s19   ;;  %s5819_s18 = sphi %s5867_s18, %s7518_s18  }
   0x4   : > { %p25_p0 = scmp.ge.s32.totalorder %s24_s23, 4  ;;  %p4485_p1 = scmp.ge.s32.totalorder %s5835_s22, 1 }
   0x5   : > { %p201_p2 = scmp.lt.s32.totalorder %s5835_s22, 9 }
   0x6   : > { %s7523_s23 = smov (%p25_p0, %s24_s23), 0  ;;  %s7525_s24 = smov (!%p25_p0, %s27_s24), %s5831_s21 }
   0x7   : > { %p202_p3 = pnand %p4485_p1, %p201_p2  ;;  %p29_p4 = scmp.ge.s32.totalorder %s7525_s24, 2 }
   0x8   : > { %p233_p5 = scmp.lt.s32.totalorder (!%p202_p3), %s5823_s19, 1  ;;  %s5502_s16 = smul.u32 (!%p202_p3), 48, %s5819_s18 }
   0x9   : > { %s7527_s24 = smov (%p29_p4, %s7525_s24), 0  ;;  %205 = sbr.rel (%p202_p3) target bundleno = 743 (0x2e7), region = 40 }
   0xa   : > { %s4490_s10 = sshll.u32 (!%p202_p3), %s5819_s18, 2  ;;  %s4487_s27 = sshll.u32 (!%p202_p3), %s5819_s18, 3 }
   0xb   : > { %s5055_s12 = sadd.s32 (!%p202_p3), 4294967295, %s4490_s10  ;;  %p241_p6 = scmp.lt.s32.totalorder (!%p202_p3), %s4487_s27, 31 }
   0xe   : > { %v5564_v0 = vld [vmem:[%s7489_s1 + $0x38] sm:$0xff]  ;;  %v5563_v4 = vld [vmem:[%s7489_s1 + $0x30] sm:$0xff]  ;;  %s7529_s19 = smov (!%p233_p5, %s5823_s19), 1  ;;  %v5562_v8 = vld [vmem:[%s7489_s1 + $0x28] sm:$0xff]  ;;  %vm472_vm0 = vcmask 1042432   ;;  %vm473_vm1 = vcmask 1046532  }
   0xf   : > { %v5580_v1 = vld [vmem:[%s7489_s1 + $0xb8] sm:$0xff]  ;;  %2029 = vmatpush.bf16.msra.mxu0 %v5564_v0  ;;  %v5579_v5 = vld [vmem:[%s7489_s1 + $0xb0] sm:$0xff]  ;;  %s5753_s17 = smul.u32 240, %s7529_s19  ;;  %v5578_v9 = vld [vmem:[%s7489_s1 + $0xa8] sm:$0xff]  ;;  %vm283_vm2 = vsmask.f32 3328 }
  0x10   : > { %v5572_v2 = vld [vmem:[%s7489_s1 + $0x78] sm:$0xff]  ;;  %2107 = vmatpush.bf16.msra.mxu2 %v5580_v1  ;;  %v5571_v6 = vld [vmem:[%s7489_s1 + $0x70] sm:$0xff]  ;;  %v5570_v10 = vld [vmem:[%s7489_s1 + $0x68] sm:$0xff]  ;;  %vm284_vm3 = vsmask.f32 7440  ;;  %vm2453_vm6 = vcmask 1040384  }
  0x11   : > { %v5588_v3 = vld [vmem:[%s7489_s1 + $0xf8] sm:$0xff]  ;;  %2068 = vmatpush.bf16.msra.mxu1 %v5572_v2  ;;  %v5587_v7 = vld [vmem:[%s7489_s1 + $0xf0] sm:$0xff]  ;;  %s237_s6 = scalar_lea.vmem %s7488_s0, %s5753_s17  ;;  %v5586_v11 = vld [vmem:[%s7489_s1 + $0xe8] sm:$0xff]  ;;  %vm2454_vm7 = vsmask.f32 256  ;;  %vm2628_vm14 = vcmask 1043456  }
  0x12   : > { %2146 = vmatpush.bf16.msra.mxu3 %v5588_v3  ;;  %s5942_s11 = scalar_lea.vmem %s237_s6, %s5502_s16  ;;  %v5561_v12 = vld [vmem:[%s7489_s1 + $0x20] sm:$0xff]  ;;  %vm5961_vm4 = vmor %vm472_vm0, %vm473_vm1  ;;  %v5560_v20 = vld [vmem:[%s7489_s1 + $0x18] sm:$0xff]  ;;  %vm2474_vm9 = vsmask.f32 7938  ;;  %s7531_s27 = smov (!%p241_p6, %s4487_s27), 31 }
  0x13   : > { %2030 = vmatpush.bf16.msra.mxu0 %v5563_v4  ;;  %v5577_v13 = vld [vmem:[%s7489_s1 + $0xa0] sm:$0xff]  ;;  %v255_v18 = vld [vmem:[%s5942_s11 + $0x8] sm:$0x1]  ;;  %v5576_v21 = vld [vmem:[%s7489_s1 + $0x98] sm:$0xff]  ;;  %s4488_s28 = sshll.u32 %s7529_s19, 5 }
  0x14   : > { %2108 = vmatpush.bf16.msra.mxu2 %v5579_v5  ;;  %v5569_v14 = vld [vmem:[%s7489_s1 + $0x60] sm:$0xff]  ;;  %v480_v24 = vrot.slane %v255_v18, 5  ;;  %v5568_v25 = vld [vmem:[%s7489_s1 + $0x58] sm:$0xff]  ;;  %v5978_v31 = vld [vmem:[%s5942_s11 + $0xc] sm:$0xf]  ;;  %v306_v34 = vshll.u32 %v255_v18, 16  ;;  %s244_s29 = sadd.s32 %s4488_s28, %s7531_s27 }
  0x15   : > { %2069 = vmatpush.bf16.msra.mxu1 %v5571_v6  ;;  %v5585_v15 = vld [vmem:[%s7489_s1 + $0xe0] sm:$0xff]  ;;  %v5584_v26 = vld [vmem:[%s7489_s1 + $0xd8] sm:$0xff]  ;;  %v5983_v35 = vld [vmem:[%s5942_s11 + $0x10] sm:$0xf]  ;;  %563 = vst [vmem:[#allocation2 + $0xc] sm:$0xf] %v5978_v31 }
  0x16   : > { %2147 = vmatpush.bf16.msra.mxu3 %v5587_v7  ;;  %v253_v16 = vld [vmem:[%s5942_s11] sm:$0xf]  ;;  %v254_v17 = vld [vmem:[%s5942_s11 + $0x4] sm:$0xf]  ;;  %564 = vst [vmem:[#allocation2 + $0x30] sm:$0xf] %v5983_v35  ;;  %vm6001_vm5 = vmor %vm283_vm2, %vm284_vm3 }
  0x17   : > { %2031 = vmatpush.bf16.msra.mxu0 %v5562_v8  ;;  %271 = vst [vmem:[#allocation2] sm:$0xf] %v253_v16  ;;  %v4493_v22 = vrot.slane %v253_v16, 9  ;;  %v477_v23 = vrot.slane %v254_v17, 5  ;;  %v287_v27 = vshrl.u32 %v253_v16, 16  ;;  %v290_v28 = vshll.u32 %v253_v16, 16  ;;  %vm6606_vm8 = vmand %vm2453_vm6, %vm2454_vm7 }
  0x18   : > { %2109 = vmatpush.bf16.msra.mxu2 %v5578_v9  ;;  %272 = vst [vmem:[#allocation2 + $0x24] sm:$0xf] %v254_v17  ;;  %v296_v29 = vshll.u32 %v254_v17, 16  ;;  %v300_v30 = vshrl.u32 %v254_v17, 16  ;;  %v5559_v41 = vld [vmem:[%s7489_s1 + $0x10] sm:$0xff]  ;;  %v308_v44 = vrot.slane %v306_v34, 5  ;;  %vm6615_vm10 = vmand %vm2453_vm6, %vm2474_vm9 }
  0x19   : > { %2070 = vmatpush.bf16.msra.mxu1 %v5570_v10  ;;  %v478_v32 = vsel %vm5961_vm4, %v4493_v22, %v477_v23  ;;  %v479_v33 = vrot.slane %v477_v23, 4  ;;  %v289_v36 = vrot.slane %v287_v27, 4  ;;  %v292_v37 = vrot.slane %v290_v28, 5  ;;  %v256_v45 = vld [vmem:[%s5942_s11 + $0xc] sm:$0xf]  ;;  %v5575_v46 = vld [vmem:[%s7489_s1 + $0x90] sm:$0xff]  ;;  %vm6702_vm15 = vmand %vm2628_vm14, %vm2474_vm9 }
  0x1a   : > { %2148 = vmatpush.bf16.msra.mxu3 %v5586_v11  ;;  %529 = vst [vmem:[#allocation2 + $0x8] sm:$0xf] %v478_v32  ;;  %v298_v38 = vrot.slane %v296_v29, 5  ;;  %v302_v39 = vrot.slane %v300_v30, 4  ;;  %v5567_v47 = vld [vmem:[%s7489_s1 + $0x50] sm:$0xff]  ;;  %v4494_v53 = vrot.slane %v256_v45, 9 }
  0x1b   : > { %2032 = vmatpush.bf16.msra.mxu0 %v5561_v12  ;;  %v481_v40 = vsel %vm5961_vm4, %v479_v33, %v480_v24  ;;  %v293_v42 = vor.u32 %v292_v37, %v289_v36  ;;  %v5583_v49 = vld [vmem:[%s7489_s1 + $0xd0] sm:$0xff]  ;;  %273 = vst [vmem:[#allocation2 + $0x48] sm:$0xf] %v256_v45  ;;  %v311_v56 = vshrl.u32 %v256_v45, 16  ;;  %v314_v60 = vshll.u32 %v256_v45, 16  ;;  %v5558_v61 = vld [vmem:[%s7489_s1 + $0x8] sm:$0xff] }
  0x1c   : > { %2110 = vmatpush.bf16.msra.mxu2 %v5577_v13  ;;  %530 = vst [vmem:[#allocation2 + $0x2c] sm:$0xf] %v481_v40  ;;  %v303_v43 = vor.u32 %v302_v39, %v298_v38  ;;  %v257_v52 = vld [vmem:[%s5942_s11 + $0x10] sm:$0xf]  ;;  %v258_v54 = vld [vmem:[%s5942_s11 + $0x14] sm:$0x1] }
  0x1d   : > { %2071 = vmatpush.bf16.msra.mxu1 %v5569_v14  ;;  %v294_v50 = vrot.slane %v293_v42, 4  ;;  %v484_v55 = vrot.slane %v257_v52, 5  ;;  %274 = vst [vmem:[#allocation2 + $0x6c] sm:$0xf] %v257_v52  ;;  %v487_v59 = vrot.slane %v258_v54, 5  ;;  %v5574_v62 = vld [vmem:[%s7489_s1 + $0x88] sm:$0xff] }
  0x1e   : > { %2149 = vmatpush.bf16.msra.mxu3 %v5585_v15  ;;  %v304_v51 = vrot.slane %v303_v43, 4  ;;  %v313_v1 = vrot.slane %v311_v56, 4  ;;  %v5566_v2 = vld [vmem:[%s7489_s1 + $0x48] sm:$0xff]  ;;  %v316_v4 = vrot.slane %v314_v60, 5  ;;  %v320_v5 = vshll.u32 %v257_v52, 16  ;;  %v5557_v6 = vld [vmem:[%s7489_s1] sm:$0xff] }
  0x1f   : > { %2033 = vmatpush.bf16.msra.mxu0 %v5560_v20  ;;  %v299_v57 = vsel %vm6001_vm5, %v294_v50, %v298_v38  ;;  %v485_v63 = vsel %vm5961_vm4, %v4494_v53, %v484_v55  ;;  %v486_v0 = vrot.slane %v484_v55, 4  ;;  %v5582_v3 = vld [vmem:[%s7489_s1 + $0xc8] sm:$0xff]  ;;  %v4553_v7 = vld [vmem:[#allocation2] sm:$0xf]  ;;  %v5507_v8 = vld [vmem:[#allocation2 + $0x20] sm:$0xf0] }
  0x20   : > { %2111 = vmatpush.bf16.msra.mxu2 %v5576_v21  ;;  %v309_v58 = vsel %vm6001_vm5, %v304_v51, %v308_v44  ;;  %442 = vst [vmem:[#allocation2 + $0x4] sm:$0xf] %v299_v57  ;;  %v324_v12 = vshrl.u32 %v257_v52, 16  ;;  %v330_v13 = vshll.u32 %v258_v54, 16  ;;  %v5573_v14 = vld [vmem:[%s7489_s1 + $0x80] sm:$0xff]  ;;  %v317_v16 = vor.u32 %v316_v4, %v313_v1  ;;  %v5595_v45 = vld [vmem:[%s7489_s1 + $0x130] sm:$0xff] }
  0x21   : > { %2072 = vmatpush.bf16.msra.mxu1 %v5568_v25  ;;  %443 = vst [vmem:[#allocation2 + $0x28] sm:$0xf] %v309_v58  ;;  %v4561_v9 = vld [vmem:[#allocation2 + $0x8] sm:$0xf]  ;;  %v488_v11 = vsel %vm5961_vm4, %v486_v0, %v487_v59  ;;  %v5504_v15 = vld [vmem:[#allocation2 + $0xc] sm:$0xf]  ;;  %v4554_v32 = vor.u32 %v5507_v8, %v4553_v7 }
  0x22   : > { %2150 = vmatpush.bf16.msra.mxu3 %v5584_v26  ;;  %531 = vst [vmem:[#allocation2 + $0x50] sm:$0xf] %v485_v63  ;;  %v322_v17 = vrot.slane %v320_v5, 5  ;;  %v6037_v18 = vld [vmem:[%s5942_s11 + $0x18] sm:$0xf]  ;;  %v5565_v20 = vld [vmem:[%s7489_s1 + $0x40] sm:$0xff] }
  0x23   : > { %2034 = vmatpush.bf16.msra.mxu0 %v5559_v41  ;;  %v5508_v10 = vld [vmem:[#allocation2 + $0x28] sm:$0xf0]  ;;  %532 = vst [vmem:[#allocation2 + $0x74] sm:$0xf] %v488_v11  ;;  %v326_v21 = vrot.slane %v324_v12, 4  ;;  %v5581_v23 = vld [vmem:[%s7489_s1 + $0xc0] sm:$0xff] }
  0x24   : > { %2112 = vmatpush.bf16.msra.mxu2 %v5575_v46  ;;  %v6043_v22 = vld [vmem:[%s5942_s11 + $0x1c] sm:$0xf]  ;;  %565 = vst [vmem:[#allocation2 + $0x54] sm:$0xf] %v6037_v18  ;;  %v4563_v24 = vld [vmem:[#allocation2 + $0x2c] sm:$0xf0]  ;;  %v4562_v33 = vor.u32 %v5508_v10, %v4561_v9 }
  0x25   : > { %2073 = vmatpush.bf16.msra.mxu1 %v5567_v47  ;;  %v318_v25 = vrot.slane %v317_v16, 4  ;;  %566 = vst [vmem:[#allocation2 + $0x78] sm:$0xf] %v6043_v22  ;;  %v5596_v26 = vld [vmem:[%s7489_s1 + $0x138] sm:$0xff]  ;;  %v327_v27 = vor.u32 %v326_v21, %v322_v17  ;;  %v332_v28 = vrot.slane %v330_v13, 5  ;;  %v4566_v39 = vor.u32 %v5504_v15, %v4563_v24  ;;  %v5593_v12 = vld [vmem:[%s7489_s1 + $0x120] sm:$0xff] }
  0x26   : > { %2151 = vmatpush.bf16.msra.mxu3 %v5583_v49  ;;  %v259_v29 = vld [vmem:[%s5942_s11 + $0x18] sm:$0xf]  ;;  %v260_v30 = vld [vmem:[%s5942_s11 + $0x1c] sm:$0xf]  ;;  %v261_v37 = vld [vmem:[%s5942_s11 + $0x20] sm:$0x1] }
  0x27   : > { %2035 = vmatpush.bf16.msra.mxu0 %v5558_v61  ;;  %v5503_v34 = vld [vmem:[#allocation2 + $0x4] sm:$0xf]  ;;  %v323_v36 = vsel %vm6001_vm5, %v318_v25, %v322_v17  ;;  %275 = vst [vmem:[#allocation2 + $0x90] sm:$0xf] %v259_v29  ;;  %v328_v40 = vrot.slane %v327_v27, 4  ;;  %v4495_v41 = vrot.slane %v259_v29, 9 }
  0x28   : > { %2113 = vmatpush.bf16.msra.mxu2 %v5574_v62  ;;  %v4555_v38 = vld [vmem:[#allocation2 + $0x24] sm:$0xf0]  ;;  %444 = vst [vmem:[#allocation2 + $0x4c] sm:$0xf] %v323_v36  ;;  %v491_v43 = vrot.slane %v260_v30, 5  ;;  %v494_v44 = vrot.slane %v261_v37, 5 }
  0x29   : > { %2074 = vmatpush.bf16.msra.mxu1 %v5566_v2  ;;  %v4558_v42 = vor.u32 %v5503_v34, %v4555_v38  ;;  %276 = vst [vmem:[#allocation2 + $0xb4] sm:$0xf] %v260_v30  ;;  %v333_v46 = vsel %vm6001_vm5, %v328_v40, %v332_v28  ;;  %v335_v47 = vshrl.u32 %v259_v29, 16  ;;  %v338_v49 = vshll.u32 %v259_v29, 16  ;;  %v6068_v59 = vld [vmem:[%s5942_s11 + $0x24] sm:$0xf] }
  0x2a   : > { %2152 = vmatpush.bf16.msra.mxu3 %v5582_v3  ;;  %v344_v50 = vshll.u32 %v260_v30, 16  ;;  %445 = vst [vmem:[#allocation2 + $0x70] sm:$0xf] %v333_v46  ;;  %v492_v51 = vsel %vm5961_vm4, %v4495_v41, %v491_v43  ;;  %v493_v52 = vrot.slane %v491_v43, 4  ;;  %v348_v53 = vshrl.u32 %v260_v30, 16  ;;  %v5594_v61 = vld [vmem:[%s7489_s1 + $0x128] sm:$0xff] }
  0x2b   : > { %2036 = vmatpush.bf16.msra.mxu0 %v5557_v6  ;;  %533 = vst [vmem:[#allocation2 + $0x98] sm:$0xf] %v492_v51  ;;  %v337_v54 = vrot.slane %v335_v47, 4  ;;  %v340_v55 = vrot.slane %v338_v49, 5  ;;  %v6071_v60 = vld [vmem:[%s5942_s11 + $0x28] sm:$0xf] }
  0x2c   : > { %2114 = vmatpush.bf16.msra.mxu2 %v5573_v14  ;;  %v495_v56 = vsel %vm5961_vm4, %v493_v52, %v494_v44  ;;  %v346_v57 = vrot.slane %v344_v50, 5  ;;  %v350_v58 = vrot.slane %v348_v53, 4  ;;  %v354_v63 = vshll.u32 %v261_v37, 16  ;;  %567 = vst [vmem:[#allocation2 + $0x9c] sm:$0xf] %v6068_v59  ;;  %v5592_v51 = vld [vmem:[%s7489_s1 + $0x118] sm:$0xff] }
  0x2d   : > { %2075 = vmatpush.bf16.msra.mxu1 %v5565_v20  ;;  %534 = vst [vmem:[#allocation2 + $0xbc] sm:$0xf] %v495_v56  ;;  %v341_v62 = vor.u32 %v340_v55, %v337_v54  ;;  %v262_v3 = vld [vmem:[%s5942_s11 + $0x24] sm:$0xf]  ;;  %v4589_v4 = vld [vmem:[#allocation2 + $0x48] sm:$0xf] }
  0x2e   : > { %2153 = vmatpush.bf16.msra.mxu3 %v5581_v23  ;;  %2037 = vmatmul.bf16.vlgmr.msra.gmra.mxu0 %v4554_v32  ;;  %v351_v0 = vor.u32 %v350_v58, %v346_v57  ;;  %v356_v2 = vrot.slane %v354_v63, 5  ;;  %568 = vst [vmem:[#allocation2 + $0xc0] sm:$0xf] %v6071_v60  ;;  %v5516_v5 = vld [vmem:[#allocation2 + $0x68] sm:$0xf0]  ;;  %v4496_v8 = vrot.slane %v262_v3, 9 }
  0x2f   : > { %2185 = vmatpush.bf16.msrb.mxu0 %v5596_v26  ;;  %2115 = vmatmul.bf16.vlgmr.msra.gmra.mxu2 %v4562_v33  ;;  %v342_v1 = vrot.slane %v341_v62, 4  ;;  %v263_v7 = vld [vmem:[%s5942_s11 + $0x28] sm:$0xf]  ;;  %277 = vst [vmem:[#allocation2 + $0xd8] sm:$0xf] %v262_v3  ;;  %v359_v21 = vshrl.u32 %v262_v3, 16  ;;  %v4590_v32 = vor.u32 %v5516_v5, %v4589_v4 }
  0x30   : > { %2076 = vmatmul.bf16.vlgmr.msra.gmra.mxu1 %v4558_v42  ;;  %v352_v6 = vrot.slane %v351_v0, 4  ;;  %v4597_v9 = vld [vmem:[#allocation2 + $0x50] sm:$0xf]  ;;  %v5517_v10 = vld [vmem:[#allocation2 + $0x70] sm:$0xf0]  ;;  %v498_v17 = vrot.slane %v263_v7, 5 }
  0x31   : > { %2154 = vmatmul.bf16.vlgmr.msra.gmra.mxu3 %v4566_v39  ;;  %v347_v11 = vsel %vm6001_vm5, %v342_v1, %v346_v57  ;;  %278 = vst [vmem:[#allocation2 + $0xfc] sm:$0xf] %v263_v7  ;;  %v264_v13 = vld [vmem:[%s5942_s11 + $0x2c] sm:$0x1]  ;;  %v5513_v14 = vld [vmem:[#allocation2 + $0x54] sm:$0xf]  ;;  %v4598_v37 = vor.u32 %v5517_v10, %v4597_v9 }
  0x32   : > { %v4599_v15 = vld [vmem:[#allocation2 + $0x74] sm:$0xf0]  ;;  %v357_v16 = vsel %vm6001_vm5, %v352_v6, %v356_v2  ;;  %446 = vst [vmem:[#allocation2 + $0x94] sm:$0xf] %v347_v11  ;;  %v501_v20 = vrot.slane %v264_v13, 5  ;;  %v362_v23 = vshll.u32 %v262_v3, 16  ;;  %v499_v28 = vsel %vm5961_vm4, %v4496_v8, %v498_v17 }
  0x33   : > { %2186 = vmatpush.bf16.msrb.mxu0 %v5595_v45  ;;  %447 = vst [vmem:[#allocation2 + $0xb8] sm:$0xf] %v357_v16  ;;  %v368_v24 = vshll.u32 %v263_v7, 16  ;;  %v372_v25 = vshrl.u32 %v263_v7, 16  ;;  %v5512_v26 = vld [vmem:[#allocation2 + $0x4c] sm:$0xf]  ;;  %v4602_v42 = vor.u32 %v5513_v14, %v4599_v15 }
  0x34   : > { %v4591_v27 = vld [vmem:[#allocation2 + $0x6c] sm:$0xf0]  ;;  %v500_v29 = vrot.slane %v498_v17, 4  ;;  %v378_v30 = vshll.u32 %v264_v13, 16  ;;  %535 = vst [vmem:[#allocation2 + $0xe0] sm:$0xf] %v499_v28 }
  0x35   : > { %v361_v33 = vrot.slane %v359_v21, 4  ;;  %v364_v34 = vrot.slane %v362_v23, 5  ;;  %v6091_v36 = vld [vmem:[%s5942_s11 + $0x30] sm:$0xf]  ;;  %v370_v39 = vrot.slane %v368_v24, 5  ;;  %v374_v40 = vrot.slane %v372_v25, 4 }
  0x36   : > { %v502_v38 = vsel %vm5961_vm4, %v500_v29, %v501_v20  ;;  %v4594_v41 = vor.u32 %v5512_v26, %v4591_v27  ;;  %v6096_v44 = vld [vmem:[%s5942_s11 + $0x34] sm:$0xf]  ;;  %v380_v46 = vrot.slane %v378_v30, 5  ;;  %569 = vst [vmem:[#allocation2 + $0xe4] sm:$0xf] %v6091_v36  ;;  %s4489_s18 = sshll.u32 %s244_s29, 3 }
  0x37   : > { %2187 = vmatpush.bf16.msrb.mxu0 %v5594_v61  ;;  %536 = vst [vmem:[#allocation2 + $0x104] sm:$0xf] %v502_v38  ;;  %v365_v43 = vor.u32 %v364_v34, %v361_v33  ;;  %v375_v45 = vor.u32 %v374_v40, %v370_v39  ;;  %v265_v47 = vld [vmem:[%s5942_s11 + $0x30] sm:$0xf]  ;;  %v266_v53 = vld [vmem:[%s5942_s11 + $0x34] sm:$0xf]  ;;  %s7436_s19 = scalar_lea.vmem %s7493_s5, %s4489_s18 }
  0x38   : > { %570 = vst [vmem:[#allocation2 + $0x108] sm:$0xf] %v6096_v44  ;;  %v383_v50 = vshrl.u32 %v265_v47, 16  ;;  %v505_v55 = vrot.slane %v266_v53, 5  ;;  %v5591_v57 = vld [vmem:[%s7489_s1 + $0x110] sm:$0xff]  ;;  %v4497_v62 = vrot.slane %v265_v47, 9 }
  0x39   : > { %v366_v49 = vrot.slane %v365_v43, 4  ;;  %v376_v52 = vrot.slane %v375_v45, 4  ;;  %279 = vst [vmem:[#allocation2 + $0x120] sm:$0xf] %v265_v47  ;;  %v267_v58 = vld [vmem:[%s5942_s11 + $0x38] sm:$0x1] }
  0x3a   : > { %v385_v61 = vrot.slane %v383_v50, 4  ;;  %v507_v63 = vrot.slane %v505_v55, 4  ;;  %v508_v0 = vrot.slane %v267_v58, 5  ;;  %v386_v1 = vshll.u32 %v265_v47, 16  ;;  %280 = vst [vmem:[#allocation2 + $0x144] sm:$0xf] %v266_v53 }
  0x3b   : > { %2188 = vmatpush.bf16.msrb.mxu0 %v5593_v12  ;;  %v371_v54 = vsel %vm6001_vm5, %v366_v49, %v370_v39  ;;  %v381_v56 = vsel %vm6001_vm5, %v376_v52, %v380_v46  ;;  %v392_v2 = vshll.u32 %v266_v53, 16  ;;  %v396_v3 = vshrl.u32 %v266_v53, 16  ;;  %v4625_v9 = vld [vmem:[#allocation2 + $0x90] sm:$0xf]  ;;  %v5525_v10 = vld [vmem:[#allocation2 + $0xb0] sm:$0xf0] }
  0x3c   : > { %448 = vst [vmem:[#allocation2 + $0xdc] sm:$0xf] %v371_v54  ;;  %v506_v4 = vsel %vm5961_vm4, %v4497_v62, %v505_v55  ;;  %v509_v5 = vsel %vm5961_vm4, %v507_v63, %v508_v0  ;;  %v388_v6 = vrot.slane %v386_v1, 5  ;;  %v4633_v11 = vld [vmem:[#allocation2 + $0x98] sm:$0xf]  ;;  %v402_v14 = vshll.u32 %v267_v58, 16 }
  0x3d   : > { %449 = vst [vmem:[#allocation2 + $0x100] sm:$0xf] %v381_v56  ;;  %v394_v7 = vrot.slane %v392_v2, 5  ;;  %v398_v8 = vrot.slane %v396_v3, 4  ;;  %v5526_v12 = vld [vmem:[#allocation2 + $0xb8] sm:$0xf0]  ;;  %v4626_v29 = vor.u32 %v5525_v10, %v4625_v9 }
  0x3e   : > { %2042 = vmatmul.bf16.gmra.mxu0 %v4590_v32  ;;  %537 = vst [vmem:[#allocation2 + $0x128] sm:$0xf] %v506_v4  ;;  %v389_v13 = vor.u32 %v388_v6, %v385_v61  ;;  %v6118_v15 = vld [vmem:[%s5942_s11 + $0x3c] sm:$0xf]  ;;  %v4635_v17 = vld [vmem:[#allocation2 + $0xbc] sm:$0xf0]  ;;  %v4634_v30 = vor.u32 %v5526_v12, %v4633_v11 }
  0x3f   : > { %2120 = vmatmul.bf16.gmra.mxu2 %v4598_v37  ;;  %2189 = vmatpush.bf16.msrb.mxu0 %v5592_v51  ;;  %538 = vst [vmem:[#allocation2 + $0x14c] sm:$0xf] %v509_v5  ;;  %v5522_v16 = vld [vmem:[#allocation2 + $0x9c] sm:$0xf]  ;;  %v399_v20 = vor.u32 %v398_v8, %v394_v7  ;;  %v6121_v21 = vld [vmem:[%s5942_s11 + $0x40] sm:$0xf] }
  0x40   : > { %2081 = vmatmul.bf16.gmra.mxu1 %v4594_v41  ;;  %571 = vst [vmem:[#allocation2 + $0x12c] sm:$0xf] %v6118_v15  ;;  %v5521_v23 = vld [vmem:[#allocation2 + $0x94] sm:$0xf]  ;;  %v390_v24 = vrot.slane %v389_v13, 4  ;;  %v404_v25 = vrot.slane %v402_v14, 5  ;;  %v4638_v34 = vor.u32 %v5522_v16, %v4635_v17 }
  0x41   : > { %2159 = vmatmul.bf16.gmra.mxu3 %v4602_v42  ;;  %572 = vst [vmem:[#allocation2 + $0x150] sm:$0xf] %v6121_v21  ;;  %v4627_v26 = vld [vmem:[#allocation2 + $0xb4] sm:$0xf0]  ;;  %v400_v27 = vrot.slane %v399_v20, 4  ;;  %v5611_v50 = vld [vmem:[%s7489_s1 + $0x1b0] sm:$0xff] }
  0x42   : > { %v395_v28 = vsel %vm6001_vm5, %v390_v24, %v394_v7  ;;  %v4630_v33 = vor.u32 %v5521_v23, %v4627_v26  ;;  %v268_v37 = vld [vmem:[%s5942_s11 + $0x3c] sm:$0xf]  ;;  %v269_v38 = vld [vmem:[%s5942_s11 + $0x40] sm:$0xf]  ;;  %v5590_v51 = vld [vmem:[%s7489_s1 + $0x108] sm:$0xff]  ;;  %v576_v4 = vshrl.u32 %v5978_v31, 16 }
  0x43   : > { %2190 = vmatpush.bf16.msrb.mxu0 %v5591_v57  ;;  %v405_v32 = vsel %vm6001_vm5, %v400_v27, %v404_v25  ;;  %450 = vst [vmem:[#allocation2 + $0x124] sm:$0xf] %v395_v28  ;;  %v5612_v39 = vld [vmem:[%s7489_s1 + $0x1b8] sm:$0xff]  ;;  %v407_v40 = vshrl.u32 %v268_v37, 16  ;;  %v410_v41 = vshll.u32 %v268_v37, 16  ;;  %v416_v42 = vshll.u32 %v269_v38, 16 }
  0x44   : > { %451 = vst [vmem:[#allocation2 + $0x148] sm:$0xf] %v405_v32  ;;  %v5604_v43 = vld [vmem:[%s7489_s1 + $0x178] sm:$0xff]  ;;  %v512_v46 = vrot.slane %v269_v38, 5  ;;  %v420_v49 = vshrl.u32 %v269_v38, 16  ;;  %2263 = vmatpush.bf16.msrb.mxu2 %v5612_v39  ;;  %v5603_v54 = vld [vmem:[%s7489_s1 + $0x170] sm:$0xff] }
  0x45   : > { %281 = vst [vmem:[#allocation2 + $0x168] sm:$0xf] %v268_v37  ;;  %v5620_v45 = vld [vmem:[%s7489_s1 + $0x1f8] sm:$0xff]  ;;  %v409_v47 = vrot.slane %v407_v40, 4  ;;  %v412_v52 = vrot.slane %v410_v41, 5  ;;  %v418_v53 = vrot.slane %v416_v42, 5  ;;  %2224 = vmatpush.bf16.msrb.mxu1 %v5604_v43 }
  0x46   : > { %282 = vst [vmem:[#allocation2 + $0x18c] sm:$0xf] %v269_v38  ;;  %2302 = vmatpush.bf16.msrb.mxu3 %v5620_v45  ;;  %v5619_v55 = vld [vmem:[%s7489_s1 + $0x1f0] sm:$0xff]  ;;  %v4498_v56 = vrot.slane %v268_v37, 9  ;;  %v514_v57 = vrot.slane %v512_v46, 4  ;;  %v422_v61 = vrot.slane %v420_v49, 4 }
  0x47   : > { %2191 = vmatpush.bf16.msrb.mxu0 %v5590_v51  ;;  %v413_v58 = vor.u32 %v412_v52, %v409_v47  ;;  %v270_v62 = vld [vmem:[%s5942_s11 + $0x44] sm:$0x1]  ;;  %v5610_v0 = vld [vmem:[%s7489_s1 + $0x1a8] sm:$0xff]  ;;  %v4661_v5 = vld [vmem:[#allocation2 + $0xd8] sm:$0xf]  ;;  %v579_v13 = vshll.u32 %v5978_v31, 16 }
  0x48   : > { %v513_v63 = vsel %vm5961_vm4, %v4498_v56, %v512_v46  ;;  %2264 = vmatpush.bf16.msrb.mxu2 %v5611_v50  ;;  %v515_v1 = vrot.slane %v270_v62, 5  ;;  %v423_v3 = vor.u32 %v422_v61, %v418_v53  ;;  %v5534_v6 = vld [vmem:[#allocation2 + $0xf8] sm:$0xf0]  ;;  %v4669_v7 = vld [vmem:[#allocation2 + $0xe0] sm:$0xf]  ;;  %v5602_v9 = vld [vmem:[%s7489_s1 + $0x168] sm:$0xff] }
  0x49   : > { %539 = vst [vmem:[#allocation2 + $0x170] sm:$0xf] %v513_v63  ;;  %v414_v2 = vrot.slane %v413_v58, 4  ;;  %v5535_v8 = vld [vmem:[#allocation2 + $0x100] sm:$0xf0]  ;;  %2225 = vmatpush.bf16.msrb.mxu1 %v5603_v54  ;;  %v5618_v10 = vld [vmem:[%s7489_s1 + $0x1e8] sm:$0xff]  ;;  %v4662_v38 = vor.u32 %v5534_v6, %v4661_v5 }
  0x4a   : > { %2303 = vmatpush.bf16.msrb.mxu3 %v5619_v55  ;;  %v426_v11 = vshll.u32 %v270_v62, 16  ;;  %v6166_v12 = vld [vmem:[%s5942_s11 + $0x48] sm:$0xf]  ;;  %v5531_v14 = vld [vmem:[#allocation2 + $0xe4] sm:$0xf]  ;;  %v516_v17 = vsel %vm5961_vm4, %v514_v57, %v515_v1  ;;  %v424_v23 = vrot.slane %v423_v3, 4  ;;  %v4670_v39 = vor.u32 %v5535_v8, %v4669_v7 }
  0x4b   : > { %v4671_v16 = vld [vmem:[#allocation2 + $0x104] sm:$0xf0]  ;;  %v419_v20 = vsel %vm6001_vm5, %v414_v2, %v418_v53  ;;  %v6174_v24 = vld [vmem:[%s5942_s11 + $0x4c] sm:$0xf]  ;;  %573 = vst [vmem:[#allocation2 + $0x174] sm:$0xf] %v6166_v12 }
  0x4c   : > { %v589_v25 = vshrl.u32 %v5983_v35, 16  ;;  %v5530_v26 = vld [vmem:[#allocation2 + $0xdc] sm:$0xf]  ;;  %540 = vst [vmem:[#allocation2 + $0x194] sm:$0xf] %v516_v17  ;;  %v428_v27 = vrot.slane %v426_v11, 5  ;;  %2265 = vmatpush.bf16.msrb.mxu2 %v5610_v0  ;;  %v4674_v42 = vor.u32 %v5531_v14, %v4671_v16 }
  0x4d   : > { %v4663_v28 = vld [vmem:[#allocation2 + $0xfc] sm:$0xf0]  ;;  %452 = vst [vmem:[#allocation2 + $0x16c] sm:$0xf] %v419_v20  ;;  %2226 = vmatpush.bf16.msrb.mxu1 %v5602_v9  ;;  %v581_v37 = vrot.slane %v579_v13, 5  ;;  %v585_v43 = vshll.u32 %v5983_v35, 16 }
  0x4e   : > { %2047 = vmatmul.bf16.gmra.mxu0 %v4626_v29  ;;  %v5609_v29 = vld [vmem:[%s7489_s1 + $0x1a0] sm:$0xff]  ;;  %2304 = vmatpush.bf16.msrb.mxu3 %v5618_v10  ;;  %574 = vst [vmem:[#allocation2 + $0x198] sm:$0xf] %v6174_v24  ;;  %v591_v40 = vrot.slane %v589_v25, 4  ;;  %v4666_v41 = vor.u32 %v5530_v26, %v4663_v28  ;;  %v6192_v45 = vld [vmem:[%s5942_s11 + $0x18] sm:$0xf] }
  0x4f   : > { %2125 = vmatmul.bf16.gmra.mxu2 %v4634_v30  ;;  %v5601_v30 = vld [vmem:[%s7489_s1 + $0x160] sm:$0xff]  ;;  %v5608_v46 = vld [vmem:[%s7489_s1 + $0x198] sm:$0xff]  ;;  %v587_v47 = vrot.slane %v585_v43, 5  ;;  %849 = vst [vmem:[#allocation2 + $0x18] sm:$0xf] %v6192_v45  ;;  %v5607_v57 = vld [vmem:[%s7489_s1 + $0x190] sm:$0xff] }
  0x50   : > { %2086 = vmatmul.bf16.gmra.mxu1 %v4630_v33  ;;  %v5617_v32 = vld [vmem:[%s7489_s1 + $0x1e0] sm:$0xff]  ;;  %v429_v33 = vsel %vm6001_vm5, %v424_v23, %v428_v27  ;;  %2266 = vmatpush.bf16.msrb.mxu2 %v5609_v29  ;;  %v6198_v49 = vld [vmem:[%s5942_s11 + $0x1c] sm:$0xf]  ;;  %v4503_v50 = vld [vmem:[%s5942_s11 + $0x14] sm:$0x1]  ;;  %v862_v58 = vshrl.u32 %v6192_v45, 16 }
  0x51   : > { %2164 = vmatmul.bf16.gmra.mxu3 %v4638_v34  ;;  %v578_v34 = vrot.slane %v576_v4, 4  ;;  %453 = vst [vmem:[#allocation2 + $0x190] sm:$0xf] %v429_v33  ;;  %2227 = vmatpush.bf16.msrb.mxu1 %v5601_v30  ;;  %v5600_v51 = vld [vmem:[%s7489_s1 + $0x158] sm:$0xff]  ;;  %v592_v54 = vor.u32 %v591_v40, %v587_v47  ;;  %v595_v55 = vshll.u32 %v4503_v50, 16  ;;  %v5589_v56 = vld [vmem:[%s7489_s1 + $0x100] sm:$0xff] }
  0x52   : > { %2305 = vmatpush.bf16.msrb.mxu3 %v5617_v32  ;;  %850 = vst [vmem:[#allocation2 + $0x3c] sm:$0xf] %v6198_v49  ;;  %v5616_v52 = vld [vmem:[%s7489_s1 + $0x1d8] sm:$0xff]  ;;  %v865_v61 = vshll.u32 %v6192_v45, 16  ;;  %v5599_v62 = vld [vmem:[%s7489_s1 + $0x150] sm:$0xff]  ;;  %2192 = vmatpush.bf16.msrb.mxu0 %v5589_v56  ;;  %v763_v3 = vrot.slane %v5983_v35, 5 }
  0x53   : > { %v582_v53 = vor.u32 %v581_v37, %v578_v34  ;;  %v5615_v63 = vld [vmem:[%s7489_s1 + $0x1d0] sm:$0xff]  ;;  %v593_v1 = vrot.slane %v592_v54, 4  ;;  %v597_v2 = vrot.slane %v595_v55, 5  ;;  %v864_v4 = vrot.slane %v862_v58, 4  ;;  %v5606_v5 = vld [vmem:[%s7489_s1 + $0x188] sm:$0xff]  ;;  %v5605_v40 = vld [vmem:[%s7489_s1 + $0x180] sm:$0xff] }
  0x54   : > { %2267 = vmatpush.bf16.msrb.mxu2 %v5608_v46  ;;  %v4519_v7 = vrot.slane %v5978_v31, 9  ;;  %v766_v8 = vrot.slane %v4503_v50, 5  ;;  %v867_v9 = vrot.slane %v865_v61, 5  ;;  %v765_v11 = vrot.slane %v763_v3, 4  ;;  %v6233_v13 = vld [vmem:[%s5942_s11 + $0x20] sm:$0x1] }
  0x55   : > { %2228 = vmatpush.bf16.msrb.mxu1 %v5600_v51  ;;  %v583_v0 = vrot.slane %v582_v53, 4  ;;  %v598_v10 = vsel %vm6001_vm5, %v593_v1, %v597_v2  ;;  %v871_v35 = vshll.u32 %v6198_v49, 16  ;;  %v4697_v14 = vld [vmem:[#allocation2 + $0x120] sm:$0xf]  ;;  %v5543_v16 = vld [vmem:[#allocation2 + $0x140] sm:$0xf0] }
  0x56   : > { %2306 = vmatpush.bf16.msrb.mxu3 %v5616_v52  ;;  %v4705_v17 = vld [vmem:[#allocation2 + $0x128] sm:$0xf]  ;;  %v5544_v20 = vld [vmem:[#allocation2 + $0x148] sm:$0xf0]  ;;  %732 = vst [vmem:[#allocation2 + $0x34] sm:$0xf] %v598_v10  ;;  %v764_v25 = vsel %vm5961_vm4, %v4519_v7, %v763_v3  ;;  %v868_v26 = vor.u32 %v867_v9, %v864_v4  ;;  %v767_v29 = vsel %vm5961_vm4, %v765_v11, %v766_v8 }
  0x57   : > { %v588_v6 = vsel %vm6001_vm5, %v583_v0, %v587_v47  ;;  %v5598_v31 = vld [vmem:[%s7489_s1 + $0x148] sm:$0xff]  ;;  %v875_v27 = vshrl.u32 %v6198_v49, 16  ;;  %815 = vst [vmem:[#allocation2 + $0x14] sm:$0xf] %v764_v25  ;;  %v873_v30 = vrot.slane %v871_v35, 5  ;;  %v881_v32 = vshll.u32 %v6233_v13, 16 }
  0x58   : > { %2268 = vmatpush.bf16.msrb.mxu2 %v5607_v57  ;;  %731 = vst [vmem:[#allocation2 + $0x10] sm:$0xf] %v588_v6  ;;  %v5614_v23 = vld [vmem:[%s7489_s1 + $0x1c8] sm:$0xff]  ;;  %v4707_v33 = vld [vmem:[#allocation2 + $0x14c] sm:$0xf0]  ;;  %v869_v34 = vrot.slane %v868_v26, 4  ;;  %v4698_v47 = vor.u32 %v5543_v16, %v4697_v14  ;;  %v4706_v50 = vor.u32 %v5544_v20, %v4705_v17 }
  0x59   : > { %2229 = vmatpush.bf16.msrb.mxu1 %v5599_v62  ;;  %v5540_v28 = vld [vmem:[#allocation2 + $0x12c] sm:$0xf]  ;;  %816 = vst [vmem:[#allocation2 + $0x38] sm:$0xf] %v767_v29  ;;  %v877_v37 = vrot.slane %v875_v27, 4  ;;  %v883_v51 = vrot.slane %v881_v32, 5 }
  0x5a   : > { %2307 = vmatpush.bf16.msrb.mxu3 %v5615_v63  ;;  %v874_v43 = vsel %vm6001_vm5, %v869_v34, %v873_v30  ;;  %v4710_v53 = vor.u32 %v5540_v28, %v4707_v33  ;;  %v600_v55 = vshrl.u32 %v6037_v18, 16  ;;  %v603_v56 = vshll.u32 %v6037_v18, 16  ;;  %v5628_v61 = vld [vmem:[%s7489_s1 + $0x238] sm:$0xff]  ;;  %v4506_v0 = vld [vmem:[%s5942_s11 + $0x20] sm:$0x1]  ;;  %v5627_v2 = vld [vmem:[%s7489_s1 + $0x230] sm:$0xff] }
  0x5b   : > { %v878_v46 = vor.u32 %v877_v37, %v873_v30  ;;  %1017 = vst [vmem:[#allocation2 + $0x1c] sm:$0xf] %v874_v43  ;;  %v609_v57 = vshll.u32 %v6043_v22, 16  ;;  %v613_v58 = vshrl.u32 %v6043_v22, 16  ;;  %v6270_v1 = vld [vmem:[%s5942_s11 + $0x24] sm:$0xf]  ;;  %2341 = vmatpush.bf16.msra.mxu0 %v5628_v61 }
  0x5c   : > { %2269 = vmatpush.bf16.msrb.mxu2 %v5606_v5  ;;  %v602_v63 = vrot.slane %v600_v55, 4  ;;  %v605_v3 = vrot.slane %v603_v56, 5  ;;  %v619_v6 = vshll.u32 %v4506_v0, 16  ;;  %v6276_v7 = vld [vmem:[%s5942_s11 + $0x28] sm:$0xf]  ;;  %v770_v8 = vrot.slane %v6043_v22, 5 }
  0x5d   : > { %2230 = vmatpush.bf16.msrb.mxu1 %v5598_v31  ;;  %v879_v54 = vrot.slane %v878_v46, 4  ;;  %v611_v4 = vrot.slane %v609_v57, 5  ;;  %v615_v5 = vrot.slane %v613_v58, 4  ;;  %851 = vst [vmem:[#allocation2 + $0x60] sm:$0xf] %v6270_v1  ;;  %v886_v11 = vshrl.u32 %v6270_v1, 16 }
  0x5e   : > { %2052 = vmatmul.bf16.gmra.mxu0 %v4662_v38  ;;  %v5539_v38 = vld [vmem:[#allocation2 + $0x124] sm:$0xf]  ;;  %2308 = vmatpush.bf16.msrb.mxu3 %v5614_v23  ;;  %v606_v9 = vor.u32 %v605_v3, %v602_v63  ;;  %852 = vst [vmem:[#allocation2 + $0x84] sm:$0xf] %v6276_v7  ;;  %v889_v35 = vshll.u32 %v6270_v1, 16  ;;  %v621_v14 = vrot.slane %v619_v6, 5 }
  0x5f   : > { %2130 = vmatmul.bf16.gmra.mxu2 %v4670_v39  ;;  %v4699_v39 = vld [vmem:[#allocation2 + $0x144] sm:$0xf0]  ;;  %v884_v62 = vsel %vm6001_vm5, %v879_v54, %v883_v51  ;;  %v616_v10 = vor.u32 %v615_v5, %v611_v4  ;;  %v4520_v16 = vrot.slane %v6037_v18, 9  ;;  %v772_v17 = vrot.slane %v770_v8, 4  ;;  %v6285_v31 = vld [vmem:[%s5942_s11 + $0x2c] sm:$0x1]  ;;  %2342 = vmatpush.bf16.msra.mxu0 %v5627_v2 }
  0x60   : > { %2091 = vmatmul.bf16.gmra.mxu1 %v4666_v41  ;;  %v5597_v41 = vld [vmem:[%s7489_s1 + $0x140] sm:$0xff]  ;;  %v4702_v52 = vor.u32 %v5539_v38, %v4699_v39  ;;  %2270 = vmatpush.bf16.msrb.mxu2 %v5605_v40  ;;  %1018 = vst [vmem:[#allocation2 + $0x40] sm:$0xf] %v884_v62  ;;  %v773_v20 = vrot.slane %v4506_v0, 5  ;;  %v607_v23 = vrot.slane %v606_v9, 4  ;;  %v888_v26 = vrot.slane %v886_v11, 4 }
  0x61   : > { %2169 = vmatmul.bf16.gmra.mxu3 %v4674_v42  ;;  %v5613_v42 = vld [vmem:[%s7489_s1 + $0x1c0] sm:$0xff]  ;;  %2231 = vmatpush.bf16.msrb.mxu1 %v5597_v41  ;;  %v617_v25 = vrot.slane %v616_v10, 4  ;;  %v891_v22 = vrot.slane %v889_v35, 5  ;;  %v4733_v27 = vld [vmem:[#allocation2 + $0x168] sm:$0xf]  ;;  %v771_v32 = vsel %vm5961_vm4, %v4520_v16, %v770_v8  ;;  %v895_v18 = vshll.u32 %v6276_v7, 16 }
  0x62   : > { %2309 = vmatpush.bf16.msrb.mxu3 %v5613_v42  ;;  %v5552_v28 = vld [vmem:[#allocation2 + $0x188] sm:$0xf0]  ;;  %v4741_v29 = vld [vmem:[#allocation2 + $0x170] sm:$0xf]  ;;  %v5553_v30 = vld [vmem:[#allocation2 + $0x190] sm:$0xf0]  ;;  %v774_v33 = vsel %vm5961_vm4, %v772_v17, %v773_v20  ;;  %v612_v39 = vsel %vm6001_vm5, %v607_v23, %v611_v4 }
  0x63   : > { %v899_v34 = vshrl.u32 %v6276_v7, 16  ;;  %v5548_v37 = vld [vmem:[#allocation2 + $0x16c] sm:$0xf]  ;;  %v5549_v38 = vld [vmem:[#allocation2 + $0x174] sm:$0xf]  ;;  %v622_v40 = vsel %vm6001_vm5, %v617_v25, %v621_v14  ;;  %v892_v41 = vor.u32 %v891_v22, %v888_v26  ;;  %v905_v42 = vshll.u32 %v6285_v31, 16 }
  0x64   : > { %817 = vst [vmem:[#allocation2 + $0x5c] sm:$0xf] %v771_v32  ;;  %v4743_v43 = vld [vmem:[#allocation2 + $0x194] sm:$0xf0]  ;;  %v897_v46 = vrot.slane %v895_v18, 5  ;;  %v4734_v54 = vor.u32 %v5552_v28, %v4733_v27  ;;  %v4742_v55 = vor.u32 %v5553_v30, %v4741_v29  ;;  %v624_v62 = vshrl.u32 %v6068_v59, 16 }
  0x65   : > { %733 = vst [vmem:[#allocation2 + $0x58] sm:$0xf] %v612_v39  ;;  %v893_v51 = vrot.slane %v892_v41, 4  ;;  %v4746_v58 = vor.u32 %v5549_v38, %v4743_v43  ;;  %v627_v63 = vshll.u32 %v6068_v59, 16  ;;  %v633_v0 = vshll.u32 %v6071_v60, 16  ;;  %v5626_v8 = vld [vmem:[%s7489_s1 + $0x228] sm:$0xff] }
  0x66   : > { %734 = vst [vmem:[#allocation2 + $0x7c] sm:$0xf] %v622_v40  ;;  %v637_v2 = vshrl.u32 %v6071_v60, 16  ;;  %v626_v4 = vrot.slane %v624_v62, 4  ;;  %v4509_v5 = vld [vmem:[%s5942_s11 + $0x2c] sm:$0x1]  ;;  %2343 = vmatpush.bf16.msra.mxu0 %v5626_v8 }
  0x67   : > { %818 = vst [vmem:[#allocation2 + $0x80] sm:$0xf] %v774_v33  ;;  %v898_v56 = vsel %vm6001_vm5, %v893_v51, %v897_v46  ;;  %v6308_v6 = vld [vmem:[%s5942_s11 + $0x30] sm:$0xf]  ;;  %v629_v9 = vrot.slane %v627_v63, 5  ;;  %v635_v10 = vrot.slane %v633_v0, 5 }
  0x68   : > { %1019 = vst [vmem:[#allocation2 + $0x64] sm:$0xf] %v898_v56  ;;  %v639_v11 = vrot.slane %v637_v2, 4  ;;  %v643_v35 = vshll.u32 %v4509_v5, 16  ;;  %v6314_v16 = vld [vmem:[%s5942_s11 + $0x34] sm:$0xf] }
  0x69   : > { %v630_v14 = vor.u32 %v629_v9, %v626_v4  ;;  %853 = vst [vmem:[#allocation2 + $0xa8] sm:$0xf] %v6308_v6  ;;  %v777_v17 = vrot.slane %v6071_v60, 5  ;;  %v910_v20 = vshrl.u32 %v6308_v6, 16  ;;  %v913_v26 = vshll.u32 %v6308_v6, 16 }
  0x6a   : > { %v640_v23 = vor.u32 %v639_v11, %v635_v10  ;;  %v645_v25 = vrot.slane %v643_v35, 5  ;;  %854 = vst [vmem:[#allocation2 + $0xcc] sm:$0xf] %v6314_v16  ;;  %v4521_v27 = vrot.slane %v6068_v59, 9  ;;  %v780_v29 = vrot.slane %v4509_v5, 5 }
  0x6b   : > { %v631_v22 = vrot.slane %v630_v14, 4  ;;  %v779_v28 = vrot.slane %v777_v17, 4  ;;  %v6323_v32 = vld [vmem:[%s5942_s11 + $0x38] sm:$0x1]  ;;  %v912_v33 = vrot.slane %v910_v20, 4  ;;  %v915_v18 = vrot.slane %v913_v26, 5 }
  0x6c   : > { %v641_v30 = vrot.slane %v640_v23, 4  ;;  %v919_v60 = vshll.u32 %v6314_v16, 16  ;;  %v4577_v38 = vld [vmem:[#allocation2 + $0x18] sm:$0xf]  ;;  %v5510_v39 = vld [vmem:[#allocation2 + $0x38] sm:$0xf0]  ;;  %v778_v41 = vsel %vm5961_vm4, %v4521_v27, %v777_v17 }
  0x6d   : > { %v636_v40 = vsel %vm6001_vm5, %v631_v22, %v635_v10  ;;  %v923_v59 = vshrl.u32 %v6314_v16, 16  ;;  %v4571_v43 = vld [vmem:[#allocation2 + $0x34] sm:$0xf0]  ;;  %819 = vst [vmem:[#allocation2 + $0xa4] sm:$0xf] %v778_v41  ;;  %v4578_v62 = vor.u32 %v5510_v39, %v4577_v38  ;;  %v648_v4 = vshrl.u32 %v6091_v36, 16 }
  0x6e   : > { %2057 = vmatmul.bf16.gmra.mxu0 %v4698_v47  ;;  %v901_v47 = vrot.slane %v899_v34, 4  ;;  %v4569_v34 = vld [vmem:[#allocation2 + $0x10] sm:$0xf]  ;;  %735 = vst [vmem:[#allocation2 + $0xa0] sm:$0xf] %v636_v40  ;;  %v921_v51 = vrot.slane %v919_v60, 5 }
  0x6f   : > { %2135 = vmatmul.bf16.gmra.mxu2 %v4706_v50  ;;  %v4735_v50 = vld [vmem:[#allocation2 + $0x18c] sm:$0xf0]  ;;  %v651_v5 = vshll.u32 %v6091_v36, 16  ;;  %v657_v8 = vshll.u32 %v6096_v44, 16  ;;  %v661_v9 = vshrl.u32 %v6096_v44, 16  ;;  %v650_v11 = vrot.slane %v648_v4, 4 }
  0x70   : > { %2096 = vmatmul.bf16.gmra.mxu1 %v4702_v52  ;;  %v902_v52 = vor.u32 %v901_v47, %v897_v46  ;;  %v4738_v57 = vor.u32 %v5548_v37, %v4735_v50  ;;  %v5509_v37 = vld [vmem:[#allocation2 + $0x30] sm:$0xf0]  ;;  %v646_v46 = vsel %vm6001_vm5, %v641_v30, %v645_v25  ;;  %v781_v47 = vsel %vm5961_vm4, %v779_v28, %v780_v29  ;;  %v6345_v35 = vld [vmem:[%s5942_s11 + $0x3c] sm:$0xf]  ;;  %v4512_v14 = vld [vmem:[%s5942_s11 + $0x38] sm:$0x1] }
  0x71   : > { %2174 = vmatmul.bf16.gmra.mxu3 %v4710_v53  ;;  %v907_v53 = vrot.slane %v905_v42, 5  ;;  %v5505_v42 = vld [vmem:[#allocation2 + $0x14] sm:$0xf]  ;;  %v916_v50 = vor.u32 %v915_v18, %v912_v33  ;;  %736 = vst [vmem:[#allocation2 + $0xc4] sm:$0xf] %v646_v46  ;;  %v653_v17 = vrot.slane %v651_v5, 5 }
  0x72   : > { %v903_v61 = vrot.slane %v902_v52, 4  ;;  %v5506_v52 = vld [vmem:[#allocation2 + $0x1c] sm:$0xf]  ;;  %820 = vst [vmem:[#allocation2 + $0xc8] sm:$0xf] %v781_v47  ;;  %v4574_v0 = vor.u32 %v5505_v42, %v4571_v43  ;;  %v659_v20 = vrot.slane %v657_v8, 5 }
  0x73   : > { %v917_v56 = vrot.slane %v916_v50, 4  ;;  %v663_v23 = vrot.slane %v661_v9, 4  ;;  %v667_v25 = vshll.u32 %v4512_v14, 16  ;;  %v6349_v26 = vld [vmem:[%s5942_s11 + $0x40] sm:$0xf]  ;;  %v934_v22 = vshrl.u32 %v6345_v35, 16 }
  0x74   : > { %v908_v3 = vsel %vm6001_vm5, %v903_v61, %v907_v53  ;;  %v925_v53 = vrot.slane %v923_v59, 4  ;;  %v4570_v61 = vor.u32 %v5509_v37, %v4569_v34  ;;  %v654_v27 = vor.u32 %v653_v17, %v650_v11  ;;  %855 = vst [vmem:[#allocation2 + $0xf0] sm:$0xf] %v6345_v35  ;;  %v6355_v30 = vld [vmem:[%s5942_s11 + $0x44] sm:$0x1] }
  0x75   : > { %1020 = vst [vmem:[#allocation2 + $0x88] sm:$0xf] %v908_v3  ;;  %v922_v63 = vsel %vm6001_vm5, %v917_v56, %v921_v51  ;;  %v664_v28 = vor.u32 %v663_v23, %v659_v20  ;;  %v784_v29 = vrot.slane %v6096_v44, 5  ;;  %v5625_v33 = vld [vmem:[%s7489_s1 + $0x220] sm:$0xff]  ;;  %v669_v18 = vrot.slane %v667_v25, 5 }
  0x76   : > { %1021 = vst [vmem:[#allocation2 + $0xac] sm:$0xf] %v922_v63  ;;  %v936_v60 = vrot.slane %v934_v22, 4  ;;  %v937_v34 = vshll.u32 %v6345_v35, 16  ;;  %v655_v37 = vrot.slane %v654_v27, 4  ;;  %v4522_v39 = vrot.slane %v6091_v36, 9  ;;  %2344 = vmatpush.bf16.msra.mxu0 %v5625_v33 }
  0x77   : > { %856 = vst [vmem:[#allocation2 + $0x114] sm:$0xf] %v6349_v26  ;;  %v665_v38 = vrot.slane %v664_v28, 4  ;;  %v786_v40 = vrot.slane %v784_v29, 4  ;;  %v787_v41 = vrot.slane %v4512_v14, 5  ;;  %v943_v59 = vshll.u32 %v6349_v26, 16 }
  0x78   : > { %v939_v44 = vrot.slane %v937_v34, 5  ;;  %v947_v42 = vshrl.u32 %v6349_v26, 16  ;;  %v4605_v43 = vld [vmem:[#allocation2 + $0x58] sm:$0xf]  ;;  %v5518_v46 = vld [vmem:[#allocation2 + $0x78] sm:$0xf0]  ;;  %v785_v36 = vsel %vm5961_vm4, %v4522_v39, %v784_v29 }
  0x79   : > { %v4613_v47 = vld [vmem:[#allocation2 + $0x60] sm:$0xf]  ;;  %v5519_v50 = vld [vmem:[#allocation2 + $0x80] sm:$0xf0]  ;;  %v788_v56 = vsel %vm5961_vm4, %v786_v40, %v787_v41  ;;  %821 = vst [vmem:[#allocation2 + $0xec] sm:$0xf] %v785_v36  ;;  %v4606_v4 = vor.u32 %v5518_v46, %v4605_v43 }
  0x7a   : > { %822 = vst [vmem:[#allocation2 + $0x110] sm:$0xf] %v788_v56  ;;  %v4614_v5 = vor.u32 %v5519_v50, %v4613_v47  ;;  %v672_v14 = vshrl.u32 %v6118_v15, 16  ;;  %v675_v17 = vshll.u32 %v6118_v15, 16  ;;  %v685_v23 = vshrl.u32 %v6121_v21, 16  ;;  %v5624_v28 = vld [vmem:[%s7489_s1 + $0x218] sm:$0xff] }
  0x7b   : > { %v6383_v27 = vld [vmem:[%s5942_s11 + $0x48] sm:$0xf]  ;;  %v4515_v33 = vld [vmem:[%s5942_s11 + $0x44] sm:$0x1]  ;;  %2345 = vmatpush.bf16.msra.mxu0 %v5624_v28  ;;  %v791_v41 = vrot.slane %v6121_v21, 5 }
  0x7c   : > { %v4615_v63 = vld [vmem:[#allocation2 + $0x84] sm:$0xf0]  ;;  %v674_v22 = vrot.slane %v672_v14, 4  ;;  %v677_v29 = vrot.slane %v675_v17, 5  ;;  %v958_v39 = vshrl.u32 %v6383_v27, 16  ;;  %v794_v36 = vrot.slane %v4515_v33, 5 }
  0x7d   : > { %857 = vst [vmem:[#allocation2 + $0x138] sm:$0xf] %v6383_v27  ;;  %v4641_v56 = vld [vmem:[#allocation2 + $0xa0] sm:$0xf]  ;;  %vm2506_vm2 = vsmask.f32 4368 }
  0x7e   : > { %2062 = vmatmul.bf16.gmra.mxu0 %v4734_v54  ;;  %v929_v54 = vshll.u32 %v6323_v32, 16  ;;  %v678_v34 = vor.u32 %v677_v29, %v674_v22  ;;  %v960_v46 = vrot.slane %v958_v39, 4  ;;  %v696_v39 = vshrl.u32 %v6166_v12, 16  ;;  %vm6744_vm6 = vmor %vm2454_vm7, %vm2506_vm2 }
  0x7f   : > { %2140 = vmatmul.bf16.gmra.mxu2 %v4742_v55  ;;  %v4579_v55 = vld [vmem:[#allocation2 + $0x3c] sm:$0xf0] }
  0x80   : > { %2101 = vmatmul.bf16.gmra.mxu1 %v4738_v57  ;;  %v926_v57 = vor.u32 %v925_v53, %v921_v51  ;;  %v4582_v2 = vor.u32 %v5506_v52, %v4579_v55  ;;  %v660_v51 = vsel %vm6001_vm5, %v655_v37, %v659_v20  ;;  %v670_v52 = vsel %vm6001_vm5, %v665_v38, %v669_v18  ;;  %v4607_v55 = vld [vmem:[#allocation2 + $0x7c] sm:$0xf0]  ;;  %v6390_v38 = vld [vmem:[%s5942_s11 + $0x4c] sm:$0xf] }
  0x81   : > { %2179 = vmatmul.bf16.gmra.mxu3 %v4746_v58  ;;  %v931_v58 = vrot.slane %v929_v54, 5  ;;  %v953_v53 = vshll.u32 %v6355_v30, 16  ;;  %v5514_v54 = vld [vmem:[#allocation2 + $0x5c] sm:$0xf]  ;;  %737 = vst [vmem:[#allocation2 + $0xe8] sm:$0xf] %v660_v51 }
  0x82   : > { %v927_v3 = vrot.slane %v926_v57, 4  ;;  %v940_v57 = vor.u32 %v939_v44, %v936_v60  ;;  %738 = vst [vmem:[#allocation2 + $0x10c] sm:$0xf] %v670_v52  ;;  %v4610_v9 = vor.u32 %v5514_v54, %v4607_v55  ;;  %v681_v20 = vshll.u32 %v6121_v21, 16  ;;  %v6396_v44 = vld [vmem:[%s5942_s11 + $0x50] sm:$0x1] }
  0x83   : > { %v687_v60 = vrot.slane %v685_v23, 4  ;;  %v691_v37 = vshll.u32 %v4515_v33, 16  ;;  %858 = vst [vmem:[#allocation2 + $0x15c] sm:$0xf] %v6390_v38  ;;  %v967_v47 = vshll.u32 %v6390_v38, 16  ;;  %v4523_v51 = vrot.slane %v6118_v15, 9 }
  0x84   : > { %v932_v10 = vsel %vm6001_vm5, %v927_v3, %v931_v58  ;;  %v945_v58 = vrot.slane %v943_v59, 5  ;;  %v955_v3 = vrot.slane %v953_v53, 5  ;;  %v683_v18 = vrot.slane %v681_v20, 5 }
  0x85   : > { %1022 = vst [vmem:[#allocation2 + $0xd0] sm:$0xf] %v932_v10  ;;  %v961_v59 = vshll.u32 %v6383_v27, 16  ;;  %v693_v43 = vrot.slane %v691_v37, 5  ;;  %v793_v52 = vrot.slane %v791_v41, 4  ;;  %v969_v54 = vrot.slane %v967_v47, 5 }
  0x86   : > { %v688_v40 = vor.u32 %v687_v60, %v683_v18  ;;  %v971_v55 = vshrl.u32 %v6390_v38, 16  ;;  %v792_v15 = vsel %vm5961_vm4, %v4523_v51, %v791_v41  ;;  %v699_v41 = vshll.u32 %v6166_v12, 16 }
  0x87   : > { %v963_v21 = vrot.slane %v961_v59, 5  ;;  %823 = vst [vmem:[#allocation2 + $0x134] sm:$0xf] %v792_v15  ;;  %v705_v59 = vshll.u32 %v6174_v24, 16  ;;  %v709_v47 = vshrl.u32 %v6174_v24, 16 }
  0x88   : > { %v689_v50 = vrot.slane %v688_v40, 4  ;;  %v6427_v40 = vld [vmem:[%s5942_s11 + $0x54] sm:$0xf] }
  0x89   : > { %v707_v51 = vrot.slane %v705_v59, 5  ;;  %859 = vst [vmem:[#allocation2 + $0x180] sm:$0xf] %v6427_v40 }
  0x8e   : > { %2193 = vmatmul.bf16.vlgmr.msrb.gmra.mxu0 %v4570_v61  ;;  %v5515_v61 = vld [vmem:[#allocation2 + $0x64] sm:$0xf] }
  0x8f   : > { %2271 = vmatmul.bf16.vlgmr.msrb.gmra.mxu2 %v4578_v62  ;;  %v949_v62 = vrot.slane %v947_v42, 4  ;;  %v4618_v10 = vor.u32 %v5515_v61, %v4615_v63  ;;  %v679_v42 = vrot.slane %v678_v34, 4  ;;  %v5528_v61 = vld [vmem:[#allocation2 + $0xc8] sm:$0xf0]  ;;  %v795_v63 = vsel %vm5961_vm4, %v793_v52, %v794_v36 }
  0x90   : > { %2232 = vmatmul.bf16.vlgmr.msrb.gmra.mxu1 %v4574_v0  ;;  %v941_v0 = vrot.slane %v940_v57, 4  ;;  %v5527_v57 = vld [vmem:[#allocation2 + $0xc0] sm:$0xf0]  ;;  %824 = vst [vmem:[#allocation2 + $0x158] sm:$0xf] %v795_v63  ;;  %v982_v36 = vshrl.u32 %v6427_v40, 16 }
  0x91   : > { %2310 = vmatmul.bf16.vlgmr.msrb.gmra.mxu3 %v4582_v2  ;;  %v950_v2 = vor.u32 %v949_v62, %v945_v58  ;;  %v684_v53 = vsel %vm6001_vm5, %v679_v42, %v683_v18  ;;  %v694_v62 = vsel %vm6001_vm5, %v689_v50, %v693_v43  ;;  %v4642_v20 = vor.u32 %v5527_v57, %v4641_v56  ;;  %v4518_v43 = vld [vmem:[%s5942_s11 + $0x50] sm:$0x1] }
  0x92   : > { %v946_v8 = vsel %vm6001_vm5, %v941_v0, %v945_v58  ;;  %v4649_v58 = vld [vmem:[#allocation2 + $0xa8] sm:$0xf]  ;;  %739 = vst [vmem:[#allocation2 + $0x130] sm:$0xf] %v684_v53  ;;  %v977_v0 = vshll.u32 %v6396_v44, 16  ;;  %v701_v50 = vrot.slane %v699_v41, 5 }
  0x93   : > { %v951_v11 = vrot.slane %v950_v2, 4  ;;  %1023 = vst [vmem:[#allocation2 + $0xf4] sm:$0xf] %v946_v8  ;;  %v6415_v2 = vld [vmem:[%s7490_s2] ss:$0 sm:$0xff]  ;;  %v4650_v23 = vor.u32 %v5528_v61, %v4649_v58  ;;  %v715_v52 = vshll.u32 %v4518_v43, 16 }
  0x94   : > { %740 = vst [vmem:[#allocation2 + $0x154] sm:$0xf] %v694_v62  ;;  %v4643_v8 = vld [vmem:[#allocation2 + $0xc4] sm:$0xf0]  ;;  %v979_v17 = vrot.slane %v977_v0, 5  ;;  %v711_v53 = vrot.slane %v709_v47, 4 }
  0x95   : > { %v956_v25 = vsel %vm6001_vm5, %v951_v11, %v955_v3  ;;  %v5523_v3 = vld [vmem:[#allocation2 + $0xa4] sm:$0xf]  ;;  %v717_v57 = vrot.slane %v715_v52, 5  ;;  %v798_v58 = vrot.slane %v6174_v24, 5  ;;  %v984_v63 = vrot.slane %v982_v36, 4 }
  0x96   : > { %1024 = vst [vmem:[#allocation2 + $0x118] sm:$0xf] %v956_v25  ;;  %v5623_v25 = vld [vmem:[%s7489_s1 + $0x210] sm:$0xff]  ;;  %v4646_v33 = vor.u32 %v5523_v3, %v4643_v8  ;;  %v712_v15 = vor.u32 %v711_v53, %v707_v51 }
  0x97   : > { %2346 = vmatpush.bf16.msra.mxu0 %v5623_v25  ;;  %v800_v8 = vrot.slane %v798_v58, 4  ;;  %v4685_v25 = vld [vmem:[#allocation2 + $0xf0] sm:$0xf] }
  0x9a   : > { %v5533_v41 = vld [vmem:[#allocation2 + $0xf4] sm:$0xf] }
  0x9e   : > { %2198 = vmatmul.bf16.gmra.mxu0 %v4606_v4  ;;  %v964_v4 = vor.u32 %v963_v21, %v960_v46  ;;  %v698_v46 = vrot.slane %v696_v39, 4  ;;  %v6435_v21 = vld [vmem:[%s5942_s11 + $0x58] sm:$0xf] }
  0x9f   : > { %2276 = vmatmul.bf16.gmra.mxu2 %v4614_v5  ;;  %v973_v5 = vrot.slane %v971_v55, 4  ;;  %860 = vst [vmem:[#allocation2 + $0x1a4] sm:$0xf] %v6435_v21  ;;  %v991_v39 = vshll.u32 %v6435_v21, 16  ;;  %v995_v59 = vshrl.u32 %v6435_v21, 16 }
  0xa0   : > { %2237 = vmatmul.bf16.gmra.mxu1 %v4610_v9  ;;  %v5524_v9 = vld [vmem:[#allocation2 + $0xac] sm:$0xf]  ;;  %v965_v11 = vrot.slane %v964_v4, 4  ;;  %v702_v56 = vor.u32 %v701_v50, %v698_v46 }
  0xa1   : > { %2315 = vmatmul.bf16.gmra.mxu3 %v4618_v10  ;;  %v4651_v10 = vld [vmem:[#allocation2 + $0xcc] sm:$0xf0]  ;;  %v974_v14 = vor.u32 %v973_v5, %v969_v54  ;;  %v4524_v5 = vrot.slane %v6166_v12, 9  ;;  %v993_v46 = vrot.slane %v991_v39, 5  ;;  %v997_v50 = vrot.slane %v995_v59, 4 }
  0xa2   : > { %v970_v22 = vsel %vm6001_vm5, %v965_v11, %v969_v54  ;;  %v4654_v18 = vor.u32 %v5524_v9, %v4651_v10  ;;  %v985_v54 = vshll.u32 %v6427_v40, 16  ;;  %v703_v4 = vrot.slane %v702_v56, 4 }
  0xa3   : > { %v975_v28 = vrot.slane %v974_v14, 4  ;;  %1025 = vst [vmem:[#allocation2 + $0x13c] sm:$0xf] %v970_v22  ;;  %v801_v9 = vrot.slane %v4518_v43, 5  ;;  %v713_v14 = vrot.slane %v712_v15, 4  ;;  %v799_v12 = vsel %vm5961_vm4, %v4524_v5, %v798_v58 }
  0xa4   : > { %v987_v0 = vrot.slane %v985_v54, 5  ;;  %v5537_v22 = vld [vmem:[#allocation2 + $0x110] sm:$0xf0]  ;;  %v4687_v43 = vld [vmem:[#allocation2 + $0x114] sm:$0xf0]  ;;  %v998_v58 = vor.u32 %v997_v50, %v993_v46  ;;  %v1052_v5 = vrot.slane %v6233_v13, 5 }
  0xa5   : > { %v980_v37 = vsel %vm6001_vm5, %v975_v28, %v979_v17  ;;  %v6449_v17 = vld [vmem:[%s5942_s11 + $0x5c] sm:$0x1]  ;;  %v708_v28 = vsel %vm6001_vm5, %v703_v4, %v707_v51  ;;  %825 = vst [vmem:[#allocation2 + $0x17c] sm:$0xf] %v799_v12  ;;  %v1049_v51 = vrot.slane %v6198_v49, 5  ;;  %v4686_v53 = vor.u32 %v5537_v22, %v4685_v25 }
  0xa6   : > { %1026 = vst [vmem:[#allocation2 + $0x160] sm:$0xf] %v980_v37  ;;  %v988_v24 = vor.u32 %v987_v0, %v984_v63  ;;  %v999_v63 = vrot.slane %v998_v58, 4  ;;  %v4545_v49 = vrot.slane %v6192_v45, 9  ;;  %v5546_v12 = vld [vmem:[#allocation2 + $0x158] sm:$0xf0] }
  0xa7   : > { %741 = vst [vmem:[#allocation2 + $0x178] sm:$0xf] %v708_v28  ;;  %v1051_v4 = vrot.slane %v1049_v51, 4  ;;  %v4721_v28 = vld [vmem:[#allocation2 + $0x138] sm:$0xf]  ;;  %v1059_v58 = vrot.slane %v6285_v31, 5 }
  0xa8   : > { %v989_v37 = vrot.slane %v988_v24, 4  ;;  %v1050_v45 = vsel %vm5961_vm4, %v4545_v49, %v1049_v51 }
  0xa9   : > { %v1053_v13 = vsel %vm5961_vm4, %v1051_v4, %v1052_v5  ;;  %1101 = vst [vmem:[#allocation2 + $0x20] sm:$0xf] %v1050_v45 }
  0xaa   : > { %v994_v54 = vsel %vm6001_vm5, %v989_v37, %v993_v46  ;;  %1102 = vst [vmem:[#allocation2 + $0x44] sm:$0xf] %v1053_v13 }
  0xab   : > { %v2038_v29 = vpop.f32.mrf.mxu0  ;;  %1027 = vst [vmem:[#allocation2 + $0x184] sm:$0xf] %v994_v54  ;;  %v1056_v54 = vrot.slane %v6276_v7, 5  ;;  %v5555_v7 = vld [vmem:[#allocation2 + $0x1a0] sm:$0xf0] }
  0xac   : > { %v2039_v60 = vadd.f32 %v6415_v2, %v2038_v29  ;;  %v5532_v29 = vld [vmem:[#allocation2 + $0xec] sm:$0xf] }
  0xad   : > { %v2077_v34 = vpop.f32.mrf.mxu1  ;;  %v4723_v37 = vld [vmem:[#allocation2 + $0x15c] sm:$0xf0] }
  0xae   : > { %v2078_v42 = vadd.f32 %v2077_v34, %v2039_v60  ;;  %2203 = vmatmul.bf16.gmra.mxu0 %v4642_v20  ;;  %v4677_v20 = vld [vmem:[#allocation2 + $0xe8] sm:$0xf]  ;;  %v718_v60 = vsel %vm6001_vm5, %v713_v14, %v717_v57  ;;  %v802_v34 = vsel %vm5961_vm4, %v800_v8, %v801_v9  ;;  %v4690_v57 = vor.u32 %v5533_v41, %v4687_v43  ;;  %v4749_v5 = vld [vmem:[#allocation2 + $0x178] sm:$0xf] }
  0xaf   : > { %2281 = vmatmul.bf16.gmra.mxu2 %v4650_v23  ;;  %v5536_v23 = vld [vmem:[#allocation2 + $0x108] sm:$0xf0]  ;;  %742 = vst [vmem:[#allocation2 + $0x19c] sm:$0xf] %v718_v60  ;;  %v4715_v60 = vld [vmem:[#allocation2 + $0x154] sm:$0xf0] }
  0xb0   : > { %2242 = vmatmul.bf16.gmra.mxu1 %v4646_v33  ;;  %v4679_v33 = vld [vmem:[#allocation2 + $0x10c] sm:$0xf0]  ;;  %826 = vst [vmem:[#allocation2 + $0x1a0] sm:$0xf] %v802_v34  ;;  %v4678_v36 = vor.u32 %v5536_v23, %v4677_v20  ;;  %v5621_v20 = vld [vmem:[%s7489_s1 + $0x200] sm:$0xff] }
  0xb1   : > { %2320 = vmatmul.bf16.gmra.mxu3 %v4654_v18  ;;  %v5622_v18 = vld [vmem:[%s7489_s1 + $0x208] sm:$0xff]  ;;  %v4682_v56 = vor.u32 %v5532_v29, %v4679_v33  ;;  %v4713_v29 = vld [vmem:[#allocation2 + $0x130] sm:$0xf]  ;;  %v5545_v33 = vld [vmem:[#allocation2 + $0x150] sm:$0xf0] }
  0xb2   : > { %v2116_v55 = vpop.f32.mrf.mxu2  ;;  %2347 = vmatpush.bf16.msra.mxu0 %v5622_v18  ;;  %v5541_v18 = vld [vmem:[#allocation2 + $0x134] sm:$0xf]  ;;  %v5542_v34 = vld [vmem:[#allocation2 + $0x13c] sm:$0xf]  ;;  %v4714_v59 = vor.u32 %v5545_v33, %v4713_v29 }
  0xb3   : > { %v2117_v61 = vadd.f32 %v2116_v55, %v2078_v42  ;;  %v6441_v3 = vpop.f32.mrf.mxu0  ;;  %v1001_v42 = vshll.u32 %v6449_v17, 16  ;;  %v4718_v46 = vor.u32 %v5541_v18, %v4715_v60  ;;  %v4726_v50 = vor.u32 %v5542_v34, %v4723_v37 }
  0xb4   : > { %v2155_v62 = vpop.f32.mrf.mxu3  ;;  %v1063_v37 = vrot.slane %v6314_v16, 5  ;;  %v5511_v16 = vld [vmem:[#allocation2 + $0x40] sm:$0xf0] }
  0xb5   : > { %v6444_v10 = vadd.f32 %v2155_v62, %v2117_v61  ;;  %v6446_v11 = vpop.f32.mrf.mxu1  ;;  %v1003_v61 = vrot.slane %v1001_v42, 5  ;;  %v4722_v42 = vor.u32 %v5546_v12, %v4721_v28 }
  0xb6   : > { %2348 = vmatpush.bf16.msra.mxu0 %v5621_v20  ;;  %v5554_v31 = vld [vmem:[#allocation2 + $0x198] sm:$0xf0] }
  0xb7   : > { %v1004_v8 = vsel %vm6001_vm5, %v999_v63, %v1003_v61  ;;  %v4750_v13 = vor.u32 %v5554_v31, %v4749_v5  ;;  %v4548_v5 = vrot.slane %v6345_v35, 9 }
  0xb8   : > { %1028 = vst [vmem:[#allocation2 + $0x1a8] sm:$0xf] %v1004_v8  ;;  %v5550_v8 = vld [vmem:[#allocation2 + $0x17c] sm:$0xf] }
  0xba   : > { %v6465_v47 = vpop.f32.mrf.mxu2 }
  0xbb   : > { %v2043_v55 = vpop.f32.mrf.mxu0 }
  0xbc   : > { %v6468_v52 = vpop.f32.mrf.mxu3  ;;  %v2044_v62 = vadd.f32 %v6415_v2, %v2043_v55 }
  0xbd   : > { %v2082_v15 = vpop.f32.mrf.mxu1 }
  0xbe   : > { %v2083_v0 = vadd.f32 %v2082_v15, %v2044_v62  ;;  %2208 = vmatmul.bf16.gmra.mxu0 %v4678_v36 }
  0xbf   : > { %2286 = vmatmul.bf16.gmra.mxu2 %v4686_v53 }
  0xc0   : > { %2247 = vmatmul.bf16.gmra.mxu1 %v4682_v56  ;;  %v4546_v56 = vrot.slane %v6270_v1, 9  ;;  %v4757_v1 = vld [vmem:[#allocation2 + $0x180] sm:$0xf] }
  0xc1   : > { %2325 = vmatmul.bf16.gmra.mxu3 %v4690_v57  ;;  %v1058_v57 = vrot.slane %v1056_v54, 4  ;;  %v4758_v28 = vor.u32 %v5555_v7, %v4757_v1  ;;  %v1070_v1 = vrot.slane %v6349_v26, 5 }
  0xc2   : > { %v2121_v9 = vpop.f32.mrf.mxu2  ;;  %v1057_v63 = vsel %vm5961_vm4, %v4546_v56, %v1056_v54 }
  0xc3   : > { %v2122_v14 = vadd.f32 %v2121_v9, %v2083_v0  ;;  %v6480_v23 = vpop.f32.mrf.mxu0  ;;  %v1060_v0 = vsel %vm5961_vm4, %v1058_v57, %v1059_v58  ;;  %1103 = vst [vmem:[#allocation2 + $0x68] sm:$0xf] %v1057_v63  ;;  %v4751_v9 = vld [vmem:[#allocation2 + $0x19c] sm:$0xf0]  ;;  %v1072_v31 = vrot.slane %v1070_v1, 4 }
  0xc4   : > { %v2160_v24 = vpop.f32.mrf.mxu3  ;;  %1104 = vst [vmem:[#allocation2 + $0x8c] sm:$0xf] %v1060_v0  ;;  %v4754_v29 = vor.u32 %v5550_v8, %v4751_v9  ;;  %v1073_v8 = vrot.slane %v6355_v30, 5 }
  0xc5   : > { %v6486_v25 = vadd.f32 %v2160_v24, %v2122_v14  ;;  %v6488_v22 = vpop.f32.mrf.mxu1  ;;  %v5551_v14 = vld [vmem:[#allocation2 + $0x184] sm:$0xf]  ;;  %v4759_v24 = vld [vmem:[#allocation2 + $0x1a4] sm:$0xf0] }
  0xc6   : > { %v4762_v33 = vor.u32 %v5551_v14, %v4759_v24 }
  0xca   : > { %v6490_v39 = vpop.f32.mrf.mxu2  ;;  %v4621_v35 = vld [vmem:[#allocation2 + $0x68] sm:$0xf] }
  0xcb   : > { %v2048_v43 = vpop.f32.mrf.mxu0  ;;  %v5520_v26 = vld [vmem:[#allocation2 + $0x88] sm:$0xf0] }
  0xcc   : > { %v6492_v41 = vpop.f32.mrf.mxu3  ;;  %v2049_v51 = vadd.f32 %v6415_v2, %v2048_v43  ;;  %v1065_v43 = vrot.slane %v1063_v37, 4 }
  0xcd   : > { %v2087_v36 = vpop.f32.mrf.mxu1 }
  0xce   : > { %v2088_v53 = vadd.f32 %v2087_v36, %v2049_v51  ;;  %2213 = vmatmul.bf16.gmra.mxu0 %v4714_v59 }
  0xcf   : > { %2291 = vmatmul.bf16.gmra.mxu2 %v4722_v42  ;;  %v4547_v42 = vrot.slane %v6308_v6, 9  ;;  %v4585_v6 = vld [vmem:[#allocation2 + $0x20] sm:$0xf] }
  0xd0   : > { %2252 = vmatmul.bf16.gmra.mxu1 %v4718_v46  ;;  %v1066_v46 = vrot.slane %v6323_v32, 5  ;;  %v4586_v58 = vor.u32 %v5511_v16, %v4585_v6 }
  0xd1   : > { %2330 = vmatmul.bf16.gmra.mxu3 %v4726_v50 }
  0xd2   : > { %v2126_v55 = vpop.f32.mrf.mxu2  ;;  %v1067_v54 = vsel %vm5961_vm4, %v1065_v43, %v1066_v46  ;;  %v4549_v46 = vrot.slane %v6383_v27, 9 }
  0xd3   : > { %v2127_v61 = vadd.f32 %v2126_v55, %v2088_v53  ;;  %v6498_v15 = vpop.f32.mrf.mxu0  ;;  %v1064_v53 = vsel %vm5961_vm4, %v4547_v42, %v1063_v37  ;;  %1106 = vst [vmem:[#allocation2 + $0xd4] sm:$0xf] %v1067_v54  ;;  %v1077_v42 = vrot.slane %v6390_v38, 5 }
  0xd4   : > { %v2165_v62 = vpop.f32.mrf.mxu3  ;;  %1105 = vst [vmem:[#allocation2 + $0xb0] sm:$0xf] %v1064_v53 }
  0xd5   : > { %v6504_v49 = vadd.f32 %v2165_v62, %v2127_v61  ;;  %v6506_v4 = vpop.f32.mrf.mxu1  ;;  %v1078_v16 = vsel %vm5961_vm4, %v4549_v46, %v1077_v42 }
  0xd6   : > { %1109 = vst [vmem:[#allocation2 + $0x140] sm:$0xf] %v1078_v16 }
  0xda   : > { %v6508_v20 = vpop.f32.mrf.mxu2 }
  0xdb   : > { %v2053_v12 = vpop.f32.mrf.mxu0  ;;  %v4657_v38 = vld [vmem:[#allocation2 + $0xb0] sm:$0xf] }
  0xdc   : > { %v6510_v45 = vpop.f32.mrf.mxu3  ;;  %v2054_v18 = vadd.f32 %v6415_v2, %v2053_v12 }
  0xdd   : > { %v2092_v60 = vpop.f32.mrf.mxu1 }
  0xde   : > { %v2093_v34 = vadd.f32 %v2092_v60, %v2054_v18  ;;  %2218 = vmatmul.bf16.gmra.mxu0 %v4750_v13  ;;  %v1071_v13 = vsel %vm5961_vm4, %v4548_v5, %v1070_v1  ;;  %v4622_v18 = vor.u32 %v5520_v26, %v4621_v35  ;;  %v4550_v1 = vrot.slane %v6427_v40, 9 }
  0xdf   : > { %2296 = vmatmul.bf16.gmra.mxu2 %v4758_v28  ;;  %v1074_v28 = vsel %vm5961_vm4, %v1072_v31, %v1073_v8  ;;  %1107 = vst [vmem:[#allocation2 + $0xf8] sm:$0xf] %v1071_v13  ;;  %v1087_v5 = vrot.slane %v6449_v17, 5  ;;  %v4729_v17 = vld [vmem:[#allocation2 + $0x140] sm:$0xf] }
  0xe0   : > { %2257 = vmatmul.bf16.gmra.mxu1 %v4754_v29  ;;  %1108 = vst [vmem:[#allocation2 + $0x11c] sm:$0xf] %v1074_v28 }
  0xe1   : > { %2335 = vmatmul.bf16.gmra.mxu3 %v4762_v33 }
  0xe2   : > { %v2131_v59 = vpop.f32.mrf.mxu2 }
  0xe3   : > { %v2132_v50 = vadd.f32 %v2131_v59, %v2093_v34  ;;  %v6516_v36 = vpop.f32.mrf.mxu0 }
  0xe4   : > { %v2170_v51 = vpop.f32.mrf.mxu3 }
  0xe5   : > { %v6522_v55 = vadd.f32 %v2170_v51, %v2132_v50  ;;  %v6524_v56 = vpop.f32.mrf.mxu1  ;;  %v1079_v50 = vrot.slane %v1077_v42, 4  ;;  %v1080_v51 = vrot.slane %v6396_v44, 5 }
  0xea   : > { %v6526_v57 = vpop.f32.mrf.mxu2 }
  0xeb   : > { %v2058_v61 = vpop.f32.mrf.mxu0 }
  0xec   : > { %v6528_v32 = vpop.f32.mrf.mxu3  ;;  %v2059_v62 = vadd.f32 %v6415_v2, %v2058_v61 }
  0xed   : > { %v2097_v63 = vpop.f32.mrf.mxu1 }
  0xee   : > { %v2098_v0 = vadd.f32 %v2097_v63, %v2059_v62  ;;  %2349 = vmatmul.bf16.vlgmr.msra.gmra.mxu0 %v4586_v58  ;;  %v1081_v58 = vsel %vm5961_vm4, %v1079_v50, %v1080_v51  ;;  %v5529_v62 = vld [vmem:[#allocation2 + $0xd0] sm:$0xf0] }
  0xef   : > { %1110 = vst [vmem:[#allocation2 + $0x164] sm:$0xf] %v1081_v58  ;;  %v4658_v27 = vor.u32 %v5529_v62, %v4657_v38  ;;  %v5678_v58 = vld [vmem:[%s7491_s3 + $0x68] sm:$0xff] }
  0xf2   : > { %v2136_v7 = vpop.f32.mrf.mxu2 }
  0xf3   : > { %v2137_v9 = vadd.f32 %v2136_v7, %v2098_v0  ;;  %v6534_v24 = vpop.f32.mrf.mxu0  ;;  %v1084_v0 = vrot.slane %v6435_v21, 5 }
  0xf4   : > { %v2175_v14 = vpop.f32.mrf.mxu3 }
  0xf5   : > { %v6540_v12 = vadd.f32 %v2175_v14, %v2137_v9  ;;  %v6542_v29 = vpop.f32.mrf.mxu1  ;;  %v1086_v7 = vrot.slane %v1084_v0, 4  ;;  %v1085_v8 = vsel %vm5961_vm4, %v4550_v1, %v1084_v0  ;;  %v5538_v14 = vld [vmem:[#allocation2 + $0x118] sm:$0xf0]  ;;  %v2456_v1 = vld [vmem:[#allocation3] sm:$0x1] }
  0xf6   : > { %1111 = vst [vmem:[#allocation2 + $0x188] sm:$0xf] %v1085_v8  ;;  %v5547_v35 = vld [vmem:[#allocation2 + $0x160] sm:$0xf0] }
  0xf7   : > { %v1088_v9 = vsel %vm5961_vm4, %v1086_v7, %v1087_v5  ;;  %v4730_v26 = vor.u32 %v5547_v35, %v4729_v17  ;;  %v2041_v17 = vadd.f32 %v6415_v2, %v6441_v3 }
  0xf8   : > { %1112 = vst [vmem:[#allocation2 + $0x1ac] sm:$0xf] %v1088_v9  ;;  %v2457_v9 = vsel %vm6606_vm8, 0, %v2456_v1 }
  0xf9   : > { %2458 = vst [vmem:[#allocation3] sm:$0x1] %v2457_v9 }
  0xfa   : > { %v6544_v33 = vpop.f32.mrf.mxu2 }
  0xfb   : > { %v2063_v60 = vpop.f32.mrf.mxu0 }
  0xfc   : > { %v6546_v30 = vpop.f32.mrf.mxu3  ;;  %v2064_v34 = vadd.f32 %v6415_v2, %v2063_v60 }
  0xfd   : > { %v2102_v37 = vpop.f32.mrf.mxu1  ;;  %v4765_v42 = vld [vmem:[#allocation2 + $0x188] sm:$0xf] }
  0xfe   : > { %v2103_v59 = vadd.f32 %v2102_v37, %v2064_v34  ;;  %2354 = vmatmul.bf16.gmra.mxu0 %v4622_v18  ;;  %v5680_v34 = vld [vmem:[%s7491_s3 + $0x78] sm:$0xff] }
  0xff   : > { %4131 = vmatpush.bf16.msra.mxu2 %v5680_v34 }
 0x102   : > { %v2141_v43 = vpop.f32.mrf.mxu2 }
 0x103   : > { %v2142_v53 = vadd.f32 %v2141_v43, %v2103_v59  ;;  %v6552_v6 = vpop.f32.mrf.mxu0  ;;  %v5679_v59 = vld [vmem:[%s7491_s3 + $0x70] sm:$0xff]  ;;  %v5556_v43 = vld [vmem:[#allocation2 + $0x1a8] sm:$0xf0] }
 0x104   : > { %v2180_v54 = vpop.f32.mrf.mxu3  ;;  %4132 = vmatpush.bf16.msra.mxu2 %v5679_v59 }
 0x105   : > { %v6558_v61 = vadd.f32 %v2180_v54, %v2142_v53  ;;  %v2104_v51 = vpop.f32.mrf.mxu1  ;;  %v5671_v54 = vld [vmem:[%s7491_s3 + $0x30] sm:$0xff] }
 0x108   : > { %4133 = vmatpush.bf16.msra.mxu2 %v5678_v58 }
 0x10a   : > { %v2143_v53 = vpop.f32.mrf.mxu2 }
 0x10b   : > { %v2194_v63 = vpop.f32.mrf.mxu0 }
 0x10c   : > { %v6561_v44 = vadd.f32 %v2194_v63, %v6444_v10  ;;  %v4693_v10 = vld [vmem:[#allocation2 + $0xf8] sm:$0xf]  ;;  %v2182_v38 = vpop.f32.mrf.mxu3 }
 0x10d   : > { %v4694_v13 = vor.u32 %v5538_v14, %v4693_v10  ;;  %v2233_v62 = vpop.f32.mrf.mxu1  ;;  %v2066_v14 = vadd.f32 %v6415_v2, %v6552_v6  ;;  %v5670_v6 = vld [vmem:[%s7491_s3 + $0x28] sm:$0xff] }
 0x10e   : > { %2359 = vmatmul.bf16.gmra.mxu0 %v4658_v27 }
 0x113   : > { %v6566_v31 = vpop.f32.mrf.mxu0 }
 0x114   : > { %v2311_v0 = vpop.f32.mrf.mxu3 }
 0x115   : > { %v2235_v7 = vpop.f32.mrf.mxu1 }
 0x11b   : > { %v2199_v28 = vpop.f32.mrf.mxu0 }
 0x11c   : > { %v6573_v21 = vadd.f32 %v2199_v28, %v6486_v25  ;;  %v5672_v25 = vld [vmem:[%s7491_s3 + $0x38] sm:$0xff]  ;;  %v2313_v35 = vpop.f32.mrf.mxu3 }
 0x11d   : > { %5737 = vmatpush.bf16.msra.mxu3 %v5672_v25  ;;  %4102 = vmatpush.bf16.msra.mxu1 %v5672_v25  ;;  %v6625_v34 = vpop.f32.mrf.mxu1 }
 0x11e   : > { %2364 = vmatmul.bf16.gmra.mxu0 %v4694_v13  ;;  %v2476_v13 = vld [vmem:[#allocation3 + $0x8] sm:$0x1] }
 0x11f   : > { %v2477_v28 = vsel %vm6615_vm10, 0, %v2476_v13 }
 0x120   : > { %2478 = vst [vmem:[#allocation3 + $0x8] sm:$0x1] %v2477_v28  ;;  %v2479_v28 = vld [vmem:[#allocation3 + $0x14] sm:$0x1] }
 0x121   : > { %5738 = vmatpush.bf16.msra.mxu3 %v5671_v54  ;;  %4103 = vmatpush.bf16.msra.mxu1 %v5671_v54  ;;  %v2234_v54 = vadd.f32 %v2233_v62, %v6561_v44  ;;  %v5677_v44 = vld [vmem:[%s7491_s3 + $0x60] sm:$0xff]  ;;  %v5668_v62 = vld [vmem:[%s7491_s3 + $0x18] sm:$0xff] }
 0x122   : > { %4134 = vmatpush.bf16.msra.mxu2 %v5677_v44 }
 0x123   : > { %v6575_v40 = vpop.f32.mrf.mxu0 }
 0x125   : > { %5739 = vmatpush.bf16.msra.mxu3 %v5670_v6  ;;  %4104 = vmatpush.bf16.msra.mxu1 %v5670_v6 }
 0x12b   : > { %v2204_v18 = vpop.f32.mrf.mxu0 }
 0x12c   : > { %v6578_v60 = vadd.f32 %v2204_v18, %v6504_v49  ;;  %v4766_v49 = vor.u32 %v5556_v43, %v4765_v42  ;;  %v2105_v18 = vadd.f32 %v2104_v51, %v2066_v14  ;;  %v2080_v42 = vadd.f32 %v6446_v11, %v2041_v17  ;;  %v2459_v51 = vld [vmem:[#allocation3 + $0xc] sm:$0x1] }
 0x12d   : > { %v2460_v11 = vsel %vm6606_vm8, 0, %v2459_v51 }
 0x12e   : > { %2369 = vmatmul.bf16.gmra.mxu0 %v4730_v26  ;;  %v2144_v59 = vadd.f32 %v2143_v53, %v2105_v18  ;;  %v2119_v3 = vadd.f32 %v6465_v47, %v2080_v42  ;;  %v6647_v47 = vpop.f32.mrf.mxu3  ;;  %2461 = vst [vmem:[#allocation3 + $0xc] sm:$0x1] %v2460_v11 }
 0x130   : > { %v2158_v53 = vadd.f32 %v6468_v52, %v2119_v3  ;;  %v6660_v52 = vstv %s5055_s12 }
 0x131   : > { %vm2411_vm11 = vcmp.ge.s32.totalorder %v6660_v52, 0  ;;  %vm2417_vm12 = vcmp.lt.s32.totalorder %v6660_v52, 16 }
 0x132   : > { %v2197_v1 = vadd.f32 %v6566_v31, %v2158_v53  ;;  %vm6673_vm13 = vmand %vm2411_vm11, %vm2417_vm12  ;;  %v2239_v53 = vadd.f32 %v6625_v34, %v6573_v21  ;;  %v5681_v34 = vld [vmem:[%s7491_s3 + $0x80] sm:$0xff] }
 0x133   : > { %v6583_v37 = vpop.f32.mrf.mxu0 }
 0x134   : > { %v2236_v13 = vadd.f32 %v2235_v7, %v2197_v1  ;;  %v2462_v1 = vld [vmem:[#allocation3 + $0x18] sm:$0x1] }
 0x13b   : > { %v2209_v46 = vpop.f32.mrf.mxu0 }
 0x13c   : > { %v6592_v50 = vadd.f32 %v2209_v46, %v6522_v55  ;;  %v2272_v55 = vpop.f32.mrf.mxu2  ;;  %v5669_v46 = vld [vmem:[%s7491_s3 + $0x20] sm:$0xff] }
 0x13d   : > { %5740 = vmatpush.bf16.msra.mxu3 %v5669_v46  ;;  %4105 = vmatpush.bf16.msra.mxu1 %v5669_v46 }
 0x13e   : > { %2374 = vmatmul.bf16.gmra.mxu0 %v4766_v49  ;;  %v2183_v49 = vadd.f32 %v2182_v38, %v2144_v59  ;;  %v2273_v38 = vadd.f32 %v2272_v55, %v2234_v54  ;;  %v2046_v55 = vadd.f32 %v6415_v2, %v6480_v23  ;;  %v6671_v23 = vpop.f32.mrf.mxu3 }
 0x140   : > { %v2312_v14 = vadd.f32 %v2311_v0, %v2273_v38  ;;  %v5667_v0 = vld [vmem:[%s7491_s3 + $0x10] sm:$0xff]  ;;  %v2085_v59 = vadd.f32 %v6488_v22, %v2046_v55 }
 0x141   : > { %5741 = vmatpush.bf16.msra.mxu3 %v5668_v62  ;;  %4106 = vmatpush.bf16.msra.mxu1 %v5668_v62 }
 0x142   : > { %v2124_v46 = vadd.f32 %v6490_v39, %v2085_v59  ;;  %v5675_v39 = vld [vmem:[%s7491_s3 + $0x50] sm:$0xff]  ;;  %v2051_v59 = vadd.f32 %v6415_v2, %v6498_v15 }
 0x143   : > { %v6597_v16 = vpop.f32.mrf.mxu0 }
 0x144   : > { %v2274_v10 = vpop.f32.mrf.mxu2  ;;  %v2163_v62 = vadd.f32 %v6492_v41, %v2124_v46 }
 0x145   : > { %v2275_v18 = vadd.f32 %v2274_v10, %v2236_v13  ;;  %5742 = vmatpush.bf16.msra.mxu3 %v5667_v0  ;;  %4107 = vmatpush.bf16.msra.mxu1 %v5667_v0  ;;  %v5666_v10 = vld [vmem:[%s7491_s3 + $0x8] sm:$0xff] }
 0x146   : > { %v2202_v21 = vadd.f32 %v6575_v40, %v2163_v62  ;;  %v6707_v0 = vpop.f32.mrf.mxu3  ;;  %v2634_v62 = vld [vmem:[#allocation3 + $0x8] sm:$0x1] }
 0x149   : > { %5743 = vmatpush.bf16.msra.mxu3 %v5666_v10  ;;  %4108 = vmatpush.bf16.msra.mxu1 %v5666_v10 }
 0x14b   : > { %v2214_v27 = vpop.f32.mrf.mxu0 }
 0x14c   : > { %v6603_v63 = vadd.f32 %v2214_v27, %v6540_v12  ;;  %v6634_v43 = vpop.f32.mrf.mxu2  ;;  %v6649_v27 = vpop.f32.mrf.mxu1 }
 0x14d   : > { %v2241_v46 = vadd.f32 %v6649_v27, %v2202_v21  ;;  %v5674_v27 = vld [vmem:[%s7491_s3 + $0x48] sm:$0xff] }
 0x153   : > { %v6610_v8 = vpop.f32.mrf.mxu0 }
 0x154   : > { %v6658_v9 = vpop.f32.mrf.mxu2  ;;  %v6678_v42 = vpop.f32.mrf.mxu1 }
 0x15b   : > { %v2219_v26 = vpop.f32.mrf.mxu0 }
 0x15c   : > { %v6628_v25 = vadd.f32 %v2219_v26, %v6558_v61  ;;  %v2480_v26 = vsel %vm6615_vm10, 0, %v2479_v28  ;;  %v6689_v22 = vpop.f32.mrf.mxu2  ;;  %v2630_v28 = vld [vmem:[#allocation3] sm:$0xf] }
 0x15d   : > { %2481 = vst [vmem:[#allocation3 + $0x14] sm:$0x1] %v2480_v26  ;;  %v2406_v26 = vadd.s32 1, %v6660_v52 }
 0x15f   : > { %vm2412_vm0 = vcmp.ge.s32.totalorder %v2406_v26, 0  ;;  %vm2418_vm1 = vcmp.lt.s32.totalorder %v2406_v26, 16 }
 0x160   : > { %vm6739_vm3 = vmand %vm2412_vm0, %vm2418_vm1 }
 0x163   : > { %v2221_v61 = vpop.f32.mrf.mxu0 }
 0x164   : > { %v6642_v58 = vadd.f32 %v2221_v61, %v2183_v49  ;;  %v5676_v49 = vld [vmem:[%s7491_s3 + $0x58] sm:$0xff]  ;;  %v2314_v61 = vadd.f32 %v2313_v35, %v2275_v18  ;;  %v2463_v35 = vsel %vm6606_vm8, 0, %v2462_v1  ;;  %v2090_v1 = vadd.f32 %v6506_v4, %v2051_v59 }
 0x165   : > { %4135 = vmatpush.bf16.msra.mxu2 %v5676_v49  ;;  %2464 = vst [vmem:[#allocation3 + $0x18] sm:$0x1] %v2463_v35 }
 0x166   : > { %v2129_v4 = vadd.f32 %v6508_v20, %v2090_v1  ;;  %v5673_v20 = vld [vmem:[%s7491_s3 + $0x40] sm:$0xff] }
 0x169   : > { %4136 = vmatpush.bf16.msra.mxu2 %v5675_v39 }
 0x16b   : > { %v2350_v31 = vpop.f32.mrf.mxu0 }
 0x16c   : > { %v2351_v17 = vadd.f32 %v2350_v31, %v2312_v14  ;;  %v2278_v14 = vadd.f32 %v6634_v43, %v2239_v53  ;;  %v5665_v43 = vld [vmem:[%s7491_s3] sm:$0xff] }
 0x16d   : > { %4109 = vmatpush.bf16.msra.mxu1 %v5665_v43  ;;  %5744 = vmatpush.bf16.msra.mxu3 %v5665_v43 }
 0x16e   : > { %v2380_v6 = vmax.f32 %v2351_v17, 0.0  ;;  %v2317_v18 = vadd.f32 %v6647_v47, %v2278_v14  ;;  %v2482_v47 = vld [vmem:[#allocation3 + $0x20] sm:$0x1]  ;;  %4137 = vmatpush.bf16.msra.mxu2 %v5674_v27 }
 0x16f   : > { %v2483_v15 = vsel %vm6615_vm10, 0, %v2482_v47 }
 0x170   : > { %v2392_v3 = vmin.f32 %v2380_v6, 6.0  ;;  %v6713_v6 = vpop.f32.mrf.mxu1  ;;  %2484 = vst [vmem:[#allocation3 + $0x20] sm:$0x1] %v2483_v15  ;;  %v2056_v15 = vadd.f32 %v6415_v2, %v6516_v36 }
 0x172   : > { %v2441_v51 = vsel %vm6673_vm13, %v2392_v3, 0.0  ;;  %4138 = vmatpush.bf16.msra.mxu2 %v5673_v20 }
 0x173   : > { %v2494_v54 = vpack.c.bf16 %v2441_v51, %v2441_v51  ;;  %v2352_v11 = vpop.f32.mrf.mxu0  ;;  %v6722_v51 = vpop.f32.mrf.mxu2 }
 0x174   : > { %v2353_v38 = vadd.f32 %v2352_v11, %v2314_v61  ;;  %v2280_v11 = vadd.f32 %v6658_v9, %v2241_v46 }
 0x175   : > { %v2509_v44 = vshrl.u32 %v2494_v54, 16  ;;  %v2512_v31 = vshll.u32 %v2494_v54, 16  ;;  %v5696_v54 = vld [vmem:[%s7491_s3 + $0xf8] sm:$0xff] }
 0x176   : > { %v2381_v55 = vmax.f32 %v2353_v38, 0.0  ;;  %v5720_v38 = vld [vmem:[%s7491_s3 + $0x1b8] sm:$0xff]  ;;  %4189 = vmatpush.bf16.msrb.mxu1 %v5696_v54  ;;  %v2319_v26 = vadd.f32 %v6671_v23, %v2280_v11  ;;  %v2244_v23 = vadd.f32 %v6678_v42, %v6578_v60  ;;  %v5694_v60 = vld [vmem:[%s7491_s3 + $0xe8] sm:$0xff] }
 0x177   : > { %v2511_v13 = vrot.slane %v2509_v44, 7  ;;  %4276 = vmatpush.bf16.msrb.mxu0 %v5720_v38  ;;  %v5718_v42 = vld [vmem:[%s7491_s3 + $0x1a8] sm:$0xff] }
 0x178   : > { %v2393_v17 = vmin.f32 %v2381_v55, 6.0  ;;  %v2283_v11 = vadd.f32 %v6689_v22, %v2244_v23 }
 0x179   : > { %v2514_v41 = vor.u32 %v2512_v31, %v2511_v13  ;;  %v2515_v55 = vrot.slane %v2511_v13, 4  ;;  %v6761_v13 = vpop.f32.mrf.mxu3 }
 0x17a   : > { %v2442_v40 = vsel %vm6673_vm13, %v2393_v17, 0.0  ;;  %v5719_v17 = vld [vmem:[%s7491_s3 + $0x1b0] sm:$0xff] }
 0x17b   : > { %v2631_v3 = vsel %vm6702_vm15, %v2514_v41, %v2630_v28  ;;  %v2495_v49 = vpack.c.bf16 %v2442_v40, %v2442_v40  ;;  %v2355_v10 = vpop.f32.mrf.mxu0  ;;  %v5695_v28 = vld [vmem:[%s7491_s3 + $0xf0] sm:$0xff]  ;;  %4277 = vmatpush.bf16.msrb.mxu0 %v5719_v17  ;;  %v6782_v1 = vpop.f32.mrf.mxu2 }
 0x17c   : > { %2632 = vst [vmem:[#allocation3] sm:$0xf] %v2631_v3  ;;  %v2356_v61 = vadd.f32 %v2355_v10, %v2317_v18  ;;  %4190 = vmatpush.bf16.msrb.mxu1 %v5695_v28  ;;  %v5717_v28 = vld [vmem:[%s7491_s3 + $0x1a0] sm:$0xff] }
 0x17d   : > { %v2517_v7 = vshrl.u32 %v2495_v49, 16  ;;  %v2520_v39 = vshll.u32 %v2495_v49, 16  ;;  %v6769_v49 = vpop.f32.mrf.mxu1 }
 0x17e   : > { %v2382_v53 = vmax.f32 %v2356_v61, 0.0 }
 0x17f   : > { %v2519_v44 = vrot.slane %v2517_v7, 7  ;;  %v2168_v7 = vadd.f32 %v6510_v45, %v2129_v4  ;;  %4278 = vmatpush.bf16.msrb.mxu0 %v5718_v42  ;;  %v5693_v4 = vld [vmem:[%s7491_s3 + $0xe0] sm:$0xff] }
 0x180   : > { %v2394_v14 = vmin.f32 %v2382_v53, 6.0  ;;  %4191 = vmatpush.bf16.msrb.mxu1 %v5694_v60 }
 0x181   : > { %v2522_v31 = vor.u32 %v2520_v39, %v2519_v44  ;;  %v2524_v21 = vrot.slane %v2519_v44, 4  ;;  %v2207_v45 = vadd.f32 %v6583_v37, %v2168_v7  ;;  %v2407_v44 = vadd.s32 2, %v6660_v52  ;;  %v2637_v39 = vld [vmem:[#allocation3 + $0xc] sm:$0xf] }
 0x182   : > { %v2443_v41 = vsel %vm6739_vm3, %v2394_v14, 0.0  ;;  %v2095_v37 = vadd.f32 %v6524_v56, %v2056_v15 }
 0x183   : > { %v2688_v43 = vld [vmem:[#allocation3] sm:$0xf]  ;;  %v2523_v18 = vsel %vm6744_vm6, %v2515_v55, %v2522_v31  ;;  %v2635_v40 = vsel %vm6606_vm8, %v2524_v21, %v2634_v62  ;;  %v2496_v59 = vpack.c.bf16 %v2443_v41, %v2443_v41  ;;  %v2357_v3 = vpop.f32.mrf.mxu0  ;;  %v2322_v55 = vadd.f32 %v6707_v0, %v2283_v11  ;;  %v2465_v21 = vld [vmem:[#allocation3 + $0x24] sm:$0x1]  ;;  %4279 = vmatpush.bf16.msrb.mxu0 %v5717_v28 }
 0x184   : > { %v2701_v10 = vshrl.u32 %v2688_v43, 16  ;;  %v2704_v46 = vshll.u32 %v2688_v43, 16  ;;  %2633 = vst [vmem:[#allocation3 + $0x4] sm:$0xf] %v2523_v18  ;;  %v2358_v61 = vadd.f32 %v2357_v3, %v2319_v26  ;;  %v2672_v47 = vld [vmem:[#allocation3] sm:$0xf]  ;;  %v2246_v17 = vadd.f32 %v6713_v6, %v2207_v45  ;;  %4192 = vmatpush.bf16.msrb.mxu1 %v5693_v4  ;;  %v6802_v3 = vpop.f32.mrf.mxu3 }
 0x185   : > { %2636 = vst [vmem:[#allocation3 + $0x8] sm:$0x1] %v2635_v40  ;;  %v2526_v54 = vshrl.u32 %v2496_v59, 16  ;;  %v2529_v36 = vshll.u32 %v2496_v59, 16  ;;  %vm2413_vm7 = vcmp.ge.s32.totalorder %v2407_v44, 0  ;;  %vm2419_vm9 = vcmp.lt.s32.totalorder %v2407_v44, 16 }
 0x186   : > { %v2703_v53 = vrot.slane %v2701_v10, 4  ;;  %v2706_v27 = vrot.slane %v2704_v46, 5  ;;  %v2383_v38 = vmax.f32 %v2358_v61, 0.0  ;;  %2680 = vst [vmem:[#allocation2] sm:$0xf] %v2672_v47  ;;  %v2285_v59 = vadd.f32 %v6722_v51, %v2246_v17  ;;  %v6806_v46 = vpop.f32.mrf.mxu1  ;;  %vm6811_vm11 = vmand %vm2413_vm7, %vm2419_vm9 }
 0x187   : > { %v6784_v2 = vrot.slane %v2526_v54, 7  ;;  %v2466_v23 = vsel %vm6606_vm8, 0, %v2465_v21  ;;  %v2134_v54 = vadd.f32 %v6526_v57, %v2095_v37  ;;  %v2641_v51 = vld [vmem:[#allocation3 + $0x14] sm:$0x1] }
 0x188   : > { %v2395_v62 = vmin.f32 %v2383_v38, 6.0  ;;  %v2707_v14 = vor.u32 %v2706_v27, %v2703_v53  ;;  %v5692_v53 = vld [vmem:[%s7491_s3 + $0xd8] sm:$0xff]  ;;  %2467 = vst [vmem:[#allocation3 + $0x24] sm:$0x1] %v2466_v23  ;;  %v2324_v44 = vadd.f32 %v6761_v13, %v2285_v59  ;;  %v5715_v13 = vld [vmem:[%s7491_s3 + $0x190] sm:$0xff] }
 0x189   : > { %v2531_v22 = vor.u32 %v2529_v36, %v6784_v2  ;;  %v2532_v38 = vrot.slane %v6784_v2, 4  ;;  %v5716_v36 = vld [vmem:[%s7491_s3 + $0x198] sm:$0xff]  ;;  %4193 = vmatpush.bf16.msrb.mxu1 %v5692_v53  ;;  %v5691_v2 = vld [vmem:[%s7491_s3 + $0xd0] sm:$0xff] }
 0x18a   : > { %v2444_v31 = vsel %vm6739_vm3, %v2395_v62, 0.0  ;;  %v2708_v10 = vrot.slane %v2707_v14, 4  ;;  %4280 = vmatpush.bf16.msrb.mxu0 %v5716_v36 }
 0x18b   : > { %v2673_v26 = vld [vmem:[#allocation3 + $0x4] sm:$0xf]  ;;  %v2638_v20 = vsel %vm6702_vm15, %v2531_v22, %v2637_v39  ;;  %v2497_v43 = vpack.c.bf16 %v2444_v31, %v2444_v31  ;;  %v2360_v18 = vpop.f32.mrf.mxu0  ;;  %v2289_v39 = vpop.f32.mrf.mxu2  ;;  %v2485_v22 = vld [vmem:[#allocation3 + $0x2c] sm:$0x1] }
 0x18c   : > { %v2689_v41 = vld [vmem:[#allocation3 + $0x4] sm:$0xf]  ;;  %v2690_v56 = vld [vmem:[#allocation3 + $0x8] sm:$0x1]  ;;  %v2361_v40 = vadd.f32 %v2360_v18, %v2322_v55  ;;  %2681 = vst [vmem:[#allocation2 + $0x24] sm:$0xf] %v2673_v26 }
 0x18d   : > { %v2710_v0 = vshll.u32 %v2689_v41, 16  ;;  %v2714_v35 = vshrl.u32 %v2689_v41, 16  ;;  %v2534_v6 = vshrl.u32 %v2497_v43, 16  ;;  %v2720_v7 = vshll.u32 %v2690_v56, 16  ;;  %2639 = vst [vmem:[#allocation3 + $0xc] sm:$0xf] %v2638_v20  ;;  %4194 = vmatpush.bf16.msrb.mxu1 %v5691_v2 }
 0x18e   : > { %v2384_v15 = vmax.f32 %v2361_v40, 0.0  ;;  %v2537_v42 = vshll.u32 %v2497_v43, 16  ;;  %v2486_v31 = vsel %vm6615_vm10, 0, %v2485_v22  ;;  %v2173_v41 = vadd.f32 %v6528_v32, %v2134_v54  ;;  %v5070_v43 = vld [vmem:[#allocation2] sm:$0xf]  ;;  %4281 = vmatpush.bf16.msrb.mxu0 %v5715_v13 }
 0x18f   : > { %v2712_v61 = vrot.slane %v2710_v0, 5  ;;  %v2716_v47 = vrot.slane %v2714_v35, 4  ;;  %v2536_v60 = vrot.slane %v2534_v6, 7  ;;  %v2722_v37 = vrot.slane %v2720_v7, 5  ;;  %2487 = vst [vmem:[#allocation3 + $0x2c] sm:$0x1] %v2486_v31  ;;  %v2253_v7 = vpop.f32.mrf.mxu1 }
 0x190   : > { %v2396_v45 = vmin.f32 %v2384_v15, 6.0  ;;  %v5796_v0 = vld [vmem:[%s7490_s2] ss:$0 sm:$0xff]  ;;  %v2249_v40 = vadd.f32 %v6769_v49, %v6592_v50  ;;  %v2212_v32 = vadd.f32 %v6597_v16, %v2173_v41  ;;  %v2408_v50 = vadd.s32 3, %v6660_v52  ;;  %v2644_v54 = vld [vmem:[#allocation3 + $0x18] sm:$0xf] }
 0x191   : > { %v2717_v27 = vor.u32 %v2716_v47, %v2712_v61  ;;  %v2713_v57 = vsel %vm6001_vm5, %v2708_v10, %v2712_v61  ;;  %v2539_v62 = vor.u32 %v2537_v42, %v2536_v60  ;;  %v2541_v14 = vrot.slane %v2536_v60, 4  ;;  %v2328_v10 = vpop.f32.mrf.mxu3 }
 0x192   : > { %2804 = vst [vmem:[#allocation2 + $0x4] sm:$0xf] %v2713_v57  ;;  %v2445_v55 = vsel %vm6811_vm11, %v2396_v45, 0.0  ;;  %v2061_v35 = vadd.f32 %v5796_v0, %v6534_v24  ;;  %v2288_v23 = vadd.f32 %v6782_v1, %v2249_v40  ;;  %v2251_v16 = vadd.f32 %v6806_v46, %v2212_v32 }
 0x193   : > { %v2718_v4 = vrot.slane %v2717_v27, 4  ;;  %v2540_v21 = vsel %vm6744_vm6, %v2532_v38, %v2539_v62  ;;  %v2642_v28 = vsel %vm6606_vm8, %v2541_v14, %v2641_v51  ;;  %v2498_v17 = vpack.c.bf16 %v2445_v55, %v2445_v55  ;;  %v2362_v26 = vpop.f32.mrf.mxu0  ;;  %v5633_v18 = vld [vmem:[#allocation2 + $0x20] sm:$0xf0]  ;;  %v2292_v53 = vpop.f32.mrf.mxu2  ;;  %v5687_v14 = vld [vmem:[%s7491_s3 + $0xb0] sm:$0xff] }
 0x194   : > { %2640 = vst [vmem:[#allocation3 + $0x10] sm:$0xf] %v2540_v21  ;;  %v2363_v20 = vadd.f32 %v2362_v26, %v2324_v44  ;;  %v5071_v59 = vor.u32 %v5633_v18, %v5070_v43  ;;  %v2674_v47 = vld [vmem:[#allocation3 + $0xc] sm:$0xf]  ;;  %v2100_v49 = vadd.f32 %v6542_v29, %v2061_v35  ;;  %v2327_v51 = vadd.f32 %v6802_v3, %v2288_v23  ;;  %v2468_v44 = vld [vmem:[#allocation3 + $0x30] sm:$0x1] }
 0x195   : > { %v2723_v56 = vsel %vm6001_vm5, %v2718_v4, %v2722_v37  ;;  %2643 = vst [vmem:[#allocation3 + $0x14] sm:$0x1] %v2642_v28  ;;  %v2543_v6 = vshrl.u32 %v2498_v17, 16  ;;  %v2546_v24 = vshll.u32 %v2498_v17, 16  ;;  %v2290_v45 = vadd.f32 %v2289_v39, %v2251_v16  ;;  %v5690_v39 = vld [vmem:[%s7491_s3 + $0xc8] sm:$0xff]  ;;  %v5713_v23 = vld [vmem:[%s7491_s3 + $0x180] sm:$0xff] }
 0x196   : > { %2805 = vst [vmem:[#allocation2 + $0x28] sm:$0xf] %v2723_v56  ;;  %v2385_v61 = vmax.f32 %v2363_v20, 0.0  ;;  %4110 = vmatmul.bf16.vlgmr.msra.gmra.mxu1 %v5071_v59  ;;  %v2139_v1 = vadd.f32 %v6544_v33, %v2100_v49  ;;  %vm2414_vm12 = vcmp.ge.s32.totalorder %v2408_v50, 0  ;;  %vm2420_vm13 = vcmp.lt.s32.totalorder %v2408_v50, 16  ;;  %v5714_v17 = vld [vmem:[%s7491_s3 + $0x188] sm:$0xff] }
 0x197   : > { %v6850_v15 = vrot.slane %v2543_v6, 7  ;;  %2682 = vst [vmem:[#allocation2 + $0x48] sm:$0xf] %v2674_v47  ;;  %vm6864_vm14 = vmand %vm2414_vm12, %vm2420_vm13  ;;  %v2329_v22 = vadd.f32 %v2328_v10, %v2290_v45  ;;  %v2691_v37 = vld [vmem:[#allocation3 + $0xc] sm:$0xf]  ;;  %v2254_v55 = vadd.f32 %v2253_v7, %v6603_v63  ;;  %4195 = vmatpush.bf16.msrb.mxu1 %v5690_v39  ;;  %v2469_v63 = vsel %vm6606_vm8, 0, %v2468_v44  ;;  %4282 = vmatpush.bf16.msrb.mxu0 %v5714_v17 }
 0x198   : > { %v2397_v60 = vmin.f32 %v2385_v61, 6.0  ;;  %v2178_v11 = vadd.f32 %v6546_v30, %v2139_v1  ;;  %v2255_v30 = vpop.f32.mrf.mxu1  ;;  %2470 = vst [vmem:[#allocation3 + $0x30] sm:$0x1] %v2469_v63  ;;  %v2725_v0 = vshrl.u32 %v2691_v37, 16  ;;  %v2728_v35 = vshll.u32 %v2691_v37, 16  ;;  %v5689_v6 = vld [vmem:[%s7491_s3 + $0xc0] sm:$0xff] }
 0x199   : > { %v2548_v42 = vor.u32 %v2546_v24, %v6850_v15  ;;  %v5629_v46 = vld [vmem:[#allocation2 + $0x4] sm:$0xf]  ;;  %v6873_v31 = vpop.f32.mrf.mxu3  ;;  %v2549_v40 = vrot.slane %v6850_v15, 4  ;;  %v2648_v7 = vld [vmem:[#allocation3 + $0x20] sm:$0x1]  ;;  %v5704_v15 = vld [vmem:[%s7491_s3 + $0x138] sm:$0xff] }
 0x19a   : > { %v2446_v29 = vsel %vm6811_vm11, %v2397_v60, 0.0  ;;  %v2217_v26 = vadd.f32 %v6610_v8, %v2178_v11  ;;  %v2727_v24 = vrot.slane %v2725_v0, 4  ;;  %v2730_v50 = vrot.slane %v2728_v35, 5  ;;  %v6895_v49 = vld [vmem:[#allocation3 + $0x4] sm:$0xf]  ;;  %4218 = vmatpush.bf16.msrb.mxu2 %v5704_v15 }
 0x19b   : > { %v2882_v27 = vld [vmem:[#allocation3 + $0x10] sm:$0xf]  ;;  %v2365_v38 = vpop.f32.mrf.mxu0  ;;  %v2645_v57 = vsel %vm6702_vm15, %v2548_v42, %v2644_v54  ;;  %v2499_v33 = vpack.c.bf16 %v2446_v29, %v2446_v29  ;;  %v2294_v10 = vpop.f32.mrf.mxu2  ;;  %4196 = vmatpush.bf16.msrb.mxu1 %v5689_v6  ;;  %v2293_v42 = vadd.f32 %v2292_v53, %v2254_v55  ;;  %v2488_v45 = vld [vmem:[#allocation3 + $0x38] sm:$0x1]  ;;  %4283 = vmatpush.bf16.msrb.mxu0 %v5713_v23  ;;  %v5688_v29 = vld [vmem:[%s7491_s3 + $0xb8] sm:$0xff]  ;;  %v2838_v17 = vrot.slane %v6895_v49, 5 }
 0x19c   : > { %v2366_v36 = vadd.f32 %v2365_v38, %v2327_v51  ;;  %2890 = vst [vmem:[#allocation2 + $0x30] sm:$0xf] %v2882_v27  ;;  %v6862_v62 = vld [vmem:[#allocation3 + $0x10] sm:$0xf]  ;;  %v2256_v1 = vadd.f32 %v2255_v30, %v2217_v26  ;;  %v2651_v38 = vld [vmem:[#allocation3 + $0x24] sm:$0xf]  ;;  %4160 = vmatpush.bf16.msrb.mxu3 %v5688_v29 }
 0x19d   : > { %2646 = vst [vmem:[#allocation3 + $0x18] sm:$0xf] %v2645_v57  ;;  %v5072_v2 = vld [vmem:[#allocation2 + $0x24] sm:$0xf0]  ;;  %v2675_v4 = vld [vmem:[#allocation3 + $0x10] sm:$0xf] }
 0x19e   : > { %v2386_v3 = vmax.f32 %v2366_v36, 0.0  ;;  %v2551_v13 = vshrl.u32 %v2499_v33, 16  ;;  %v5075_v28 = vor.u32 %v5629_v46, %v5072_v2  ;;  %2683 = vst [vmem:[#allocation2 + $0x6c] sm:$0xf] %v2675_v4  ;;  %v2738_v41 = vshrl.u32 %v6862_v62, 16  ;;  %v5703_v23 = vld [vmem:[%s7491_s3 + $0x130] sm:$0xff] }
 0x19f   : > { %v2554_v20 = vshll.u32 %v2499_v33, 16  ;;  %v2734_v32 = vshll.u32 %v6862_v62, 16  ;;  %v5106_v16 = vld [vmem:[#allocation2 + $0x48] sm:$0xf]  ;;  %v2731_v62 = vor.u32 %v2730_v50, %v2727_v24  ;;  %v2295_v11 = vadd.f32 %v2294_v10, %v2256_v1  ;;  %v2897_v2 = vld [vmem:[#allocation3 + $0xc] sm:$0xf]  ;;  %4219 = vmatpush.bf16.msrb.mxu2 %v5703_v23 }
 0x1a0   : > { %v2398_v21 = vmin.f32 %v2386_v3, 6.0  ;;  %v2553_v43 = vrot.slane %v2551_v13, 7  ;;  %4139 = vmatmul.bf16.vlgmr.msra.gmra.mxu2 %v5075_v28  ;;  %v2740_v54 = vrot.slane %v2738_v41, 4  ;;  %v2693_v3 = vld [vmem:[#allocation3 + $0x14] sm:$0x1]  ;;  %v2332_v13 = vadd.f32 %v6873_v31, %v2293_v42  ;;  %v2258_v63 = vpop.f32.mrf.mxu1  ;;  %4161 = vmatpush.bf16.msrb.mxu3 %v5687_v14 }
 0x1a1   : > { %v2736_v39 = vrot.slane %v2734_v32, 5  ;;  %v2732_v55 = vrot.slane %v2731_v62, 4  ;;  %v6910_v28 = vld [vmem:[#allocation3 + $0x8] sm:$0x1]  ;;  %v6913_v26 = vld [vmem:[#allocation3 + $0xc] sm:$0xe]  ;;  %v2259_v10 = vadd.f32 %v2258_v63, %v6628_v25 }
 0x1a2   : > { %v2447_v18 = vsel %vm6864_vm14, %v2398_v21, 0.0  ;;  %v2556_v61 = vor.u32 %v2554_v20, %v2553_v43  ;;  %v2558_v47 = vrot.slane %v2553_v43, 4  ;;  %v2333_v21 = vpop.f32.mrf.mxu3  ;;  %v2489_v20 = vsel %vm6615_vm10, 0, %v2488_v45  ;;  %v2898_v43 = vld [vmem:[#allocation3 + $0x10] sm:$0xf] }
 0x1a3   : > { %v2367_v56 = vpop.f32.mrf.mxu0  ;;  %v2500_v8 = vpack.c.bf16 %v2447_v18, %v2447_v18  ;;  %v2741_v41 = vor.u32 %v2740_v54, %v2736_v39  ;;  %v2744_v0 = vshll.u32 %v2693_v3, 16  ;;  %2490 = vst [vmem:[#allocation3 + $0x38] sm:$0x1] %v2489_v20  ;;  %v2910_v35 = vshrl.u32 %v2897_v2, 16  ;;  %v2471_v23 = vld [vmem:[#allocation3 + $0x3c] sm:$0x1] }
 0x1a4   : > { %v2368_v59 = vadd.f32 %v2367_v56, %v2329_v22  ;;  %v2557_v51 = vsel %vm6744_vm6, %v2549_v40, %v2556_v61  ;;  %v2676_v57 = vld [vmem:[#allocation3 + $0x18] sm:$0xf]  ;;  %v2649_v36 = vsel %vm6606_vm8, %v2558_v47, %v2648_v7  ;;  %v6906_v22 = vld [vmem:[#allocation3] sm:$0xe]  ;;  %v2737_v56 = vsel %vm6001_vm5, %v2732_v55, %v2736_v39  ;;  %v2297_v61 = vpop.f32.mrf.mxu2  ;;  %v6932_v7 = vld [vmem:[#allocation3 + $0x14] sm:$0x1] }
 0x1a5   : > { %v2560_v60 = vshrl.u32 %v2500_v8, 16  ;;  %v2563_v27 = vshll.u32 %v2500_v8, 16  ;;  %2647 = vst [vmem:[#allocation3 + $0x1c] sm:$0xf] %v2557_v51  ;;  %v5642_v44 = vld [vmem:[#allocation2 + $0x68] sm:$0xf0]  ;;  %v2298_v62 = vadd.f32 %v2297_v61, %v2259_v10 }
 0x1a6   : > { %v2387_v53 = vmax.f32 %v2368_v59, 0.0  ;;  %2650 = vst [vmem:[#allocation3 + $0x20] sm:$0x1] %v2649_v36  ;;  %v5107_v33 = vor.u32 %v5642_v44, %v5106_v16  ;;  %v2913_v40 = vshll.u32 %v2897_v2, 16  ;;  %v2409_v8 = vadd.s32 4, %v6660_v52 }
 0x1a7   : > { %v6904_v46 = vrot.slane %v2560_v60, 7  ;;  %2684 = vst [vmem:[#allocation2 + $0x90] sm:$0xf] %v2676_v57  ;;  %v2334_v59 = vadd.f32 %v2333_v21, %v2295_v11  ;;  %v2742_v6 = vrot.slane %v2741_v41, 4  ;;  %v5056_v47 = vrot.slane %v6906_v22, 9 }
 0x1a8   : > { %v2399_v37 = vmin.f32 %v2387_v53, 6.0  ;;  %4115 = vmatmul.bf16.gmra.mxu1 %v5107_v33  ;;  %2806 = vst [vmem:[#allocation2 + $0x4c] sm:$0xf] %v2737_v56  ;;  %v2919_v15 = vshll.u32 %v2898_v43, 16  ;;  %v6936_v50 = vrot.slane %v2838_v17, 4  ;;  %v2841_v54 = vrot.slane %v6910_v28, 5 }
 0x1a9   : > { %v2565_v4 = vor.u32 %v2563_v27, %v6904_v46  ;;  %v5060_v60 = vrot.slane %v6913_v26, 9  ;;  %v2746_v42 = vrot.slane %v2744_v0, 5  ;;  %v6940_v25 = vrot.slane %v2910_v35, 4  ;;  %v6949_v36 = vld [vmem:[#allocation3 + $0x10] sm:$0xf] }
 0x1aa   : > { %v2448_v31 = vsel %vm6864_vm14, %v2399_v37, 0.0  ;;  %v6942_v1 = vrot.slane %v2913_v40, 5  ;;  %v2923_v51 = vshrl.u32 %v2898_v43, 16  ;;  %vm2415_vm0 = vcmp.ge.s32.totalorder %v2409_v8, 0  ;;  %v2655_v33 = vld [vmem:[#allocation3 + $0x2c] sm:$0x1]  ;;  %v2336_v22 = vpop.f32.mrf.mxu3 }
 0x1ab   : > { %v2370_v30 = vpop.f32.mrf.mxu0  ;;  %v2652_v18 = vsel %vm6702_vm15, %v2565_v4, %v2651_v38  ;;  %v2501_v24 = vpack.c.bf16 %v2448_v31, %v2448_v31  ;;  %v2929_v38 = vshll.u32 %v6932_v7, 16  ;;  %vm2421_vm1 = vcmp.lt.s32.totalorder %v2409_v8, 16  ;;  %v2881_v39 = vld [vmem:[#allocation3 + $0xc] sm:$0xf]  ;;  %v3090_v11 = vld [vmem:[#allocation3 + $0x18] sm:$0xf] }
 0x1ac   : > { %2653 = vst [vmem:[#allocation3 + $0x24] sm:$0xf] %v2652_v18  ;;  %v2371_v32 = vadd.f32 %v2370_v30, %v2332_v13  ;;  %v2677_v16 = vld [vmem:[#allocation3 + $0x1c] sm:$0xf]  ;;  %v2747_v57 = vsel %vm6001_vm5, %v2742_v6, %v2746_v42  ;;  %v6947_v29 = vrot.slane %v2919_v15, 5  ;;  %v6951_v2 = vrot.slane %v2923_v51, 4  ;;  %vm6955_vm2 = vmand %vm2415_vm0, %vm2421_vm1  ;;  %v2260_v18 = vpop.f32.mrf.mxu1  ;;  %v2299_v8 = vpop.f32.mrf.mxu2 }
 0x1ad   : > { %v3091_v27 = vld [vmem:[#allocation3 + $0x1c] sm:$0xf]  ;;  %2685 = vst [vmem:[#allocation2 + $0xb4] sm:$0xf] %v2677_v16  ;;  %v2568_v53 = vshrl.u32 %v2501_v24, 16  ;;  %v2571_v37 = vshll.u32 %v2501_v24, 16  ;;  %v2839_v21 = vsel %vm5961_vm4, %v5056_v47, %v2838_v17  ;;  %v2337_v14 = vadd.f32 %v2336_v22, %v2298_v62 }
 0x1ae   : > { %v2388_v45 = vmax.f32 %v2371_v32, 0.0  ;;  %3099 = vst [vmem:[#allocation2 + $0x3c] sm:$0xf] %v3091_v27  ;;  %v5702_v13 = vld [vmem:[%s7491_s3 + $0x128] sm:$0xff]  ;;  %v3047_v30 = vrot.slane %v6949_v36, 5  ;;  %v2566_v20 = vrot.slane %v6904_v46, 4  ;;  %v2261_v10 = vadd.f32 %v2260_v18, %v6642_v58 }
 0x1af   : > { %v2570_v4 = vrot.slane %v2568_v53, 7  ;;  %2807 = vst [vmem:[#allocation2 + $0x70] sm:$0xf] %v2747_v57  ;;  %v6967_v41 = vld [vmem:[#allocation3 + $0x1c] sm:$0xf]  ;;  %v2410_v0 = vadd.s32 5, %v6660_v52  ;;  %4220 = vmatpush.bf16.msrb.mxu2 %v5702_v13 }
 0x1b0   : > { %v2400_v63 = vmin.f32 %v2388_v45, 6.0  ;;  %2889 = vst [vmem:[#allocation2 + $0xc] sm:$0xf] %v2881_v39  ;;  %v2694_v35 = vld [vmem:[#allocation3 + $0x18] sm:$0xf]  ;;  %v2472_v24 = vsel %vm6606_vm8, 0, %v2471_v23  ;;  %v2300_v53 = vadd.f32 %v2299_v8, %v2261_v10  ;;  %v2926_v8 = vor.u32 %v6951_v2, %v6947_v29 }
 0x1b1   : > { %v2573_v31 = vor.u32 %v2571_v37, %v2570_v4  ;;  %v2575_v56 = vrot.slane %v2570_v4, 4  ;;  %v5142_v40 = vld [vmem:[#allocation2 + $0x90] sm:$0xf]  ;;  %3098 = vst [vmem:[#allocation2 + $0x18] sm:$0xf] %v3090_v11  ;;  %v5686_v52 = vld [vmem:[%s7491_s3 + $0xa8] sm:$0xff] }
 0x1b2   : > { %v2449_v49 = vsel %vm6955_vm2, %v2400_v63, 0.0  ;;  %2872 = vst [vmem:[#allocation2 + $0x8] sm:$0xf] %v2839_v21  ;;  %v5080_v15 = vld [vmem:[#allocation2 + $0x2c] sm:$0xf0]  ;;  %4162 = vmatpush.bf16.msrb.mxu3 %v5686_v52  ;;  %v2749_v57 = vshrl.u32 %v2694_v35, 16  ;;  %v2338_v63 = vpop.f32.mrf.mxu3 }
 0x1b3   : > { %v2372_v44 = vpop.f32.mrf.mxu0  ;;  %v2574_v46 = vsel %vm6744_vm6, %v2566_v20, %v2573_v31  ;;  %v2656_v32 = vsel %vm6606_vm8, %v2575_v56, %v2655_v33  ;;  %v2502_v6 = vpack.c.bf16 %v2449_v49, %v2449_v49  ;;  %v5638_v42 = vld [vmem:[#allocation2 + $0x4c] sm:$0xf]  ;;  %vm2416_vm3 = vcmp.ge.s32.totalorder %v2410_v0, 0  ;;  %2473 = vst [vmem:[#allocation3 + $0x3c] sm:$0x1] %v2472_v24  ;;  %v5685_v4 = vld [vmem:[%s7491_s3 + $0xa0] sm:$0xff] }
 0x1b4   : > { %v2373_v3 = vadd.f32 %v2372_v44, %v2334_v59  ;;  %v2762_v59 = vshrl.u32 %v6967_v41, 16  ;;  %2654 = vst [vmem:[#allocation3 + $0x28] sm:$0xf] %v2574_v46  ;;  %v5651_v47 = vld [vmem:[#allocation2 + $0xb0] sm:$0xf0]  ;;  %vm2422_vm7 = vcmp.lt.s32.totalorder %v2410_v0, 16 }
 0x1b5   : > { %2657 = vst [vmem:[#allocation3 + $0x2c] sm:$0x1] %v2656_v32  ;;  %v2577_v16 = vshrl.u32 %v2502_v6, 16  ;;  %v5143_v27 = vor.u32 %v5651_v47, %v5142_v40  ;;  %v2658_v44 = vld [vmem:[#allocation3 + $0x30] sm:$0xf]  ;;  %v2752_v21 = vshll.u32 %v2694_v35, 16  ;;  %vm6996_vm9 = vmand %vm2416_vm3, %vm2422_vm7 }
 0x1b6   : > { %v2389_v43 = vmax.f32 %v2373_v3, 0.0  ;;  %v5108_v58 = vld [vmem:[#allocation2 + $0x6c] sm:$0xf0]  ;;  %v2580_v3 = vshll.u32 %v2502_v6, 16  ;;  %v5636_v22 = vld [vmem:[#allocation2 + $0x38] sm:$0xf0]  ;;  %4163 = vmatpush.bf16.msrb.mxu3 %v5685_v4 }
 0x1b7   : > { %v2579_v33 = vrot.slane %v2577_v16, 7  ;;  %v5111_v39 = vor.u32 %v5638_v42, %v5108_v58  ;;  %4120 = vmatmul.bf16.vlgmr.msra.gmra.mxu3 %v5143_v27  ;;  %v5630_v55 = vld [vmem:[#allocation2 + $0xc] sm:$0xf]  ;;  %v2758_v20 = vshll.u32 %v6967_v41, 16  ;;  %v2678_v40 = vld [vmem:[#allocation3 + $0x24] sm:$0xf] }
 0x1b8   : > { %v2401_v17 = vmin.f32 %v2389_v43, 6.0  ;;  %v6990_v43 = vld [vmem:[#allocation3 + $0x14] sm:$0x1]  ;;  %v5083_v56 = vor.u32 %v5630_v55, %v5080_v15  ;;  %v5094_v49 = vld [vmem:[#allocation2 + $0x18] sm:$0xf]  ;;  %v2754_v35 = vrot.slane %v2752_v21, 5 }
 0x1b9   : > { %v2582_v18 = vor.u32 %v2580_v3, %v2579_v33  ;;  %4144 = vmatmul.bf16.gmra.mxu2 %v5111_v39  ;;  %v5095_v46 = vor.u32 %v5636_v22, %v5094_v49  ;;  %v5701_v6 = vld [vmem:[%s7491_s3 + $0x120] sm:$0xff]  ;;  %2686 = vst [vmem:[#allocation2 + $0xd8] sm:$0xf] %v2678_v40  ;;  %v7003_v23 = vld [vmem:[#allocation3 + $0x18] sm:$0xf]  ;;  %v2764_v52 = vrot.slane %v2762_v59, 4 }
 0x1ba   : > { %v2450_v61 = vsel %vm6955_vm2, %v2401_v17, 0.0  ;;  %v2751_v17 = vrot.slane %v2749_v57, 4  ;;  %v2583_v2 = vrot.slane %v2579_v33, 4  ;;  %4197 = vmatmul.bf16.vlgmr.msrb.gmra.mxu1 %v5083_v56  ;;  %v2662_v15 = vld [vmem:[#allocation3 + $0x38] sm:$0x1]  ;;  %v2760_v16 = vrot.slane %v2758_v20, 5  ;;  %4221 = vmatpush.bf16.msrb.mxu2 %v5701_v6 }
 0x1bb   : > { %v2503_v51 = vpack.c.bf16 %v2450_v61, %v2450_v61  ;;  %v2375_v45 = vpop.f32.mrf.mxu0  ;;  %v2659_v10 = vsel %vm6702_vm15, %v2582_v18, %v2658_v44  ;;  %v2339_v61 = vadd.f32 %v2338_v63, %v2300_v53  ;;  %4284 = vmatmul.bf16.vlgmr.msrb.gmra.mxu0 %v5095_v46  ;;  %v2696_v24 = vld [vmem:[#allocation3 + $0x20] sm:$0x1]  ;;  %v2491_v57 = vld [vmem:[#allocation3 + $0x44] sm:$0x1]  ;;  %v7014_v44 = vrot.slane %v2926_v8, 4  ;;  %v5684_v21 = vld [vmem:[%s7491_s3 + $0x98] sm:$0xff] }
 0x1bc   : > { %v2376_v62 = vadd.f32 %v2375_v45, %v2337_v14  ;;  %v7005_v14 = vld [vmem:[#allocation3 + $0x28] sm:$0xf]  ;;  %2660 = vst [vmem:[#allocation3 + $0x30] sm:$0xf] %v2659_v10  ;;  %v2755_v27 = vor.u32 %v2754_v35, %v2751_v17  ;;  %v7018_v53 = vrot.slane %v2929_v38, 5  ;;  %v7022_v58 = vrot.slane %v3047_v30, 4  ;;  %4164 = vmatpush.bf16.msrb.mxu3 %v5684_v21 }
 0x1bd   : > { %v2585_v11 = vshrl.u32 %v2503_v51, 16  ;;  %v2588_v37 = vshll.u32 %v2503_v51, 16  ;;  %v2786_v42 = vshrl.u32 %v7005_v14, 16  ;;  %v3119_v33 = vshrl.u32 %v7003_v23, 16  ;;  %v2679_v22 = vld [vmem:[#allocation3 + $0x28] sm:$0xf] }
 0x1be   : > { %v2390_v13 = vmax.f32 %v2376_v62, 0.0  ;;  %v3050_v62 = vrot.slane %v6990_v43, 5  ;;  %v7028_v4 = vld [vmem:[#allocation3 + $0x18] sm:$0xe]  ;;  %v7030_v7 = vld [vmem:[#allocation3 + $0x1c] sm:$0xf]  ;;  %v2765_v38 = vor.u32 %v2764_v52, %v2760_v16 }
 0x1bf   : > { %v2587_v31 = vrot.slane %v2585_v11, 7  ;;  %v2756_v11 = vrot.slane %v2755_v27, 4  ;;  %v3122_v20 = vshll.u32 %v7003_v23, 16  ;;  %v2788_v63 = vrot.slane %v2786_v42, 4  ;;  %v5683_v56 = vld [vmem:[%s7491_s3 + $0x90] sm:$0xff]  ;;  %v5700_v8 = vld [vmem:[%s7491_s3 + $0x118] sm:$0xff] }
 0x1c0   : > { %v2402_v32 = vmin.f32 %v2390_v13, 6.0  ;;  %v2492_v13 = vsel %vm6615_vm10, 0, %v2491_v57  ;;  %v2665_v49 = vld [vmem:[#allocation3 + $0x3c] sm:$0xf]  ;;  %v2766_v17 = vrot.slane %v2765_v38, 4  ;;  %4222 = vmatpush.bf16.msrb.mxu2 %v5700_v8  ;;  %v7051_v10 = vrot.slane %v3119_v33, 4  ;;  %4165 = vmatpush.bf16.msrb.mxu3 %v5683_v56 }
 0x1c1   : > { %v2590_v0 = vor.u32 %v2588_v37, %v2587_v31  ;;  %v2592_v47 = vrot.slane %v2587_v31, 4  ;;  %v2768_v37 = vshll.u32 %v2696_v24, 16  ;;  %v2761_v31 = vsel %vm6001_vm5, %v2756_v11, %v2760_v16  ;;  %2493 = vst [vmem:[#allocation3 + $0x44] sm:$0x1] %v2492_v13  ;;  %v2883_v35 = vld [vmem:[#allocation3 + $0x18] sm:$0xf] }
 0x1c2   : > { %v2451_v51 = vsel %vm6996_vm9, %v2402_v32, 0.0  ;;  %2808 = vst [vmem:[#allocation2 + $0x94] sm:$0xf] %v2761_v31  ;;  %v2884_v52 = vld [vmem:[#allocation3 + $0x1c] sm:$0xf]  ;;  %v7058_v24 = vrot.slane %v3122_v20, 5  ;;  %v2842_v38 = vsel %vm5961_vm4, %v6936_v50, %v2841_v54 }
 0x1c3   : > { %v2591_v59 = vsel %vm6744_vm6, %v2583_v2, %v2590_v0  ;;  %v2377_v45 = vpop.f32.mrf.mxu0  ;;  %v2663_v3 = vsel %vm6606_vm8, %v2592_v47, %v2662_v15  ;;  %v2504_v39 = vpack.c.bf16 %v2451_v51, %v2451_v51  ;;  %v2770_v12 = vrot.slane %v2768_v37, 5  ;;  %2687 = vst [vmem:[#allocation2 + $0xfc] sm:$0xf] %v2679_v22  ;;  %v7055_v47 = vld [vmem:[#allocation3 + $0x1c] sm:$0xf]  ;;  %v5699_v50 = vld [vmem:[%s7491_s3 + $0x110] sm:$0xff] }
 0x1c4   : > { %2661 = vst [vmem:[#allocation3 + $0x34] sm:$0xf] %v2591_v59  ;;  %v2378_v55 = vadd.f32 %v2377_v45, %v2339_v61  ;;  %v2782_v2 = vshll.u32 %v7005_v14, 16  ;;  %v5064_v0 = vrot.slane %v7028_v4, 9  ;;  %v2947_v61 = vshrl.u32 %v7030_v7, 16  ;;  %v5682_v14 = vld [vmem:[%s7491_s3 + $0x88] sm:$0xff]  ;;  %4223 = vmatpush.bf16.msrb.mxu2 %v5699_v50 }
 0x1c5   : > { %2664 = vst [vmem:[#allocation3 + $0x38] sm:$0x1] %v2663_v3  ;;  %v2594_v18 = vshrl.u32 %v2504_v39, 16  ;;  %v2597_v32 = vshll.u32 %v2504_v39, 16  ;;  %v2771_v6 = vsel %vm6001_vm5, %v2766_v17, %v2770_v12  ;;  %v3092_v27 = vld [vmem:[#allocation3 + $0x24] sm:$0xf]  ;;  %4166 = vmatpush.bf16.msrb.mxu3 %v5682_v14 }
 0x1c6   : > { %v2391_v40 = vmax.f32 %v2378_v55, 0.0  ;;  %2891 = vst [vmem:[#allocation2 + $0x54] sm:$0xf] %v2883_v35  ;;  %v7065_v42 = vrot.slane %v2782_v2, 5  ;;  %v3093_v45 = vld [vmem:[#allocation3 + $0x28] sm:$0xf] }
 0x1c7   : > { %v7046_v46 = vrot.slane %v2594_v18, 7  ;;  %2809 = vst [vmem:[#allocation2 + $0xb8] sm:$0xf] %v2771_v6  ;;  %v3128_v57 = vshll.u32 %v7055_v47, 16  ;;  %v3132_v33 = vshrl.u32 %v7055_v47, 16  ;;  %v7072_v39 = vrot.slane %v2947_v61, 4 }
 0x1c8   : > { %v2403_v23 = vmin.f32 %v2391_v40, 6.0  ;;  %2892 = vst [vmem:[#allocation2 + $0x78] sm:$0xf] %v2884_v52  ;;  %v5178_v41 = vld [vmem:[#allocation2 + $0xd8] sm:$0xf]  ;;  %v2789_v3 = vor.u32 %v2788_v63, %v7065_v42  ;;  %v7149_v47 = vld [vmem:[%s7491_s3 + $0x228] sm:$0xff] }
 0x1c9   : > { %v2599_v15 = vor.u32 %v2597_v32, %v7046_v46  ;;  %v2600_v11 = vrot.slane %v7046_v46, 4  ;;  %3100 = vst [vmem:[#allocation2 + $0x60] sm:$0xf] %v3092_v27  ;;  %v7083_v37 = vld [vmem:[#allocation3 + $0x20] sm:$0x1]  ;;  %4167 = vmatpush.bf16.msrb.mxu3 %v5681_v34  ;;  %v5728_v27 = vld [vmem:[%s7491_s3 + $0x1f8] sm:$0xff] }
 0x1ca   : > { %v2452_v16 = vsel %vm6996_vm9, %v2403_v23, 0.0  ;;  %v2669_v55 = vld [vmem:[#allocation3 + $0x44] sm:$0x1]  ;;  %v5660_v13 = vld [vmem:[#allocation2 + $0xf8] sm:$0xf0]  ;;  %v2790_v12 = vrot.slane %v2789_v3, 4  ;;  %4305 = vmatpush.bf16.msra.mxu1 %v5728_v27 }
 0x1cb   : > { %v2666_v59 = vsel %vm6702_vm15, %v2599_v15, %v2665_v49  ;;  %v2505_v51 = vpack.c.bf16 %v2452_v16, %v2452_v16  ;;  %3101 = vst [vmem:[#allocation2 + $0x84] sm:$0xf] %v3093_v45  ;;  %v2697_v21 = vld [vmem:[#allocation3 + $0x24] sm:$0xf]  ;;  %v5179_v31 = vor.u32 %v5660_v13, %v5178_v41  ;;  %v2699_v56 = vld [vmem:[#allocation3 + $0x2c] sm:$0x1]  ;;  %v2916_v45 = vor.u32 %v6942_v1, %v6940_v25 }
 0x1cc   : > { %2667 = vst [vmem:[#allocation3 + $0x3c] sm:$0xf] %v2666_v59  ;;  %v5647_v20 = vld [vmem:[#allocation2 + $0x94] sm:$0xf]  ;;  %v2773_v49 = vshrl.u32 %v2697_v21, 16  ;;  %v2776_v17 = vshll.u32 %v2697_v21, 16 }
 0x1cd   : > { %v2602_v22 = vshrl.u32 %v2505_v51, 16  ;;  %v2605_v18 = vshll.u32 %v2505_v51, 16  ;;  %v2792_v28 = vshll.u32 %v2699_v56, 16  ;;  %2873 = vst [vmem:[#allocation2 + $0x2c] sm:$0xf] %v2842_v38  ;;  %4125 = vmatmul.bf16.gmra.mxu3 %v5179_v31  ;;  %v3138_v61 = vshll.u32 %v7083_v37, 16 }
 0x1ce   : > { %v5144_v54 = vld [vmem:[#allocation2 + $0xb4] sm:$0xf0]  ;;  %v5639_v46 = vld [vmem:[#allocation2 + $0x54] sm:$0xf]  ;;  %v2775_v32 = vrot.slane %v2773_v49, 4  ;;  %v2778_v23 = vrot.slane %v2776_v17, 5  ;;  %v2932_v49 = vsel %vm6001_vm5, %v7014_v44, %v7018_v53 }
 0x1cf   : > { %v2604_v63 = vrot.slane %v2602_v22, 7  ;;  %v5147_v35 = vor.u32 %v5647_v20, %v5144_v54  ;;  %v5116_v6 = vld [vmem:[#allocation2 + $0x74] sm:$0xf0]  ;;  %v2794_v52 = vrot.slane %v2792_v28, 5  ;;  %v2885_v2 = vld [vmem:[#allocation3 + $0x24] sm:$0xf] }
 0x1d0   : > { %v7089_v15 = vld [vmem:[#allocation3 + $0x1c] sm:$0xf]  ;;  %v5119_v59 = vor.u32 %v5639_v46, %v5116_v6  ;;  %2893 = vst [vmem:[#allocation2 + $0x9c] sm:$0xf] %v2885_v2  ;;  %v5712_v51 = vld [vmem:[%s7491_s3 + $0x178] sm:$0xff]  ;;  %v2779_v41 = vor.u32 %v2778_v23, %v2775_v32  ;;  %v5727_v37 = vld [vmem:[%s7491_s3 + $0x1f0] sm:$0xff] }
 0x1d1   : > { %v2607_v40 = vor.u32 %v2605_v18, %v2604_v63  ;;  %v2609_v8 = vrot.slane %v2604_v63, 4  ;;  %4149 = vmatmul.bf16.gmra.mxu2 %v5147_v35  ;;  %v5130_v9 = vld [vmem:[#allocation2 + $0x60] sm:$0xf]  ;;  %v2795_v5 = vsel %vm6001_vm5, %v2790_v12, %v2794_v52  ;;  %v2886_v3 = vld [vmem:[#allocation3 + $0x28] sm:$0xf]  ;;  %4247 = vmatpush.bf16.msra.mxu3 %v5712_v51  ;;  %v5698_v1 = vld [vmem:[%s7491_s3 + $0x108] sm:$0xff] }
 0x1d2   : > { %4202 = vmatmul.bf16.gmra.mxu1 %v5119_v59  ;;  %v3094_v22 = vld [vmem:[#allocation3 + $0x30] sm:$0xf]  ;;  %v2780_v38 = vrot.slane %v2779_v41, 4  ;;  %2811 = vst [vmem:[#allocation2 + $0x100] sm:$0xf] %v2795_v5  ;;  %v5736_v25 = vld [vmem:[%s7491_s3 + $0x238] sm:$0xff]  ;;  %4224 = vmatpush.bf16.msrb.mxu2 %v5698_v1 }
 0x1d3   : > { %v2608_v16 = vsel %vm6744_vm6, %v2600_v11, %v2607_v40  ;;  %v2670_v14 = vsel %vm6606_vm8, %v2609_v8, %v2669_v55  ;;  %v5645_v11 = vld [vmem:[#allocation2 + $0x80] sm:$0xf0]  ;;  %v7114_v55 = vld [vmem:[#allocation3 + $0x20] sm:$0x1]  ;;  %2894 = vst [vmem:[#allocation2 + $0xc0] sm:$0xf] %v2886_v3  ;;  %4334 = vmatpush.bf16.msra.mxu0 %v5736_v25  ;;  %4306 = vmatpush.bf16.msra.mxu1 %v5727_v37 }
 0x1d4   : > { %2668 = vst [vmem:[#allocation3 + $0x40] sm:$0xf] %v2608_v16  ;;  %v5131_v34 = vor.u32 %v5645_v11, %v5130_v9  ;;  %v3095_v13 = vld [vmem:[#allocation3 + $0x34] sm:$0xf]  ;;  %v3256_v21 = vrot.slane %v7089_v15, 5  ;;  %v2785_v20 = vsel %vm6001_vm5, %v2780_v38, %v7065_v42  ;;  %v5711_v18 = vld [vmem:[%s7491_s3 + $0x170] sm:$0xff]  ;;  %v3125_v38 = vor.u32 %v7058_v24, %v7051_v10 }
 0x1d5   : > { %2671 = vst [vmem:[#allocation3 + $0x44] sm:$0x1] %v2670_v14  ;;  %v5697_v63 = vld [vmem:[%s7491_s3 + $0x100] sm:$0xff]  ;;  %v2917_v31 = vrot.slane %v2916_v45, 4  ;;  %v7128_v56 = vrot.slane %v3128_v57, 5  ;;  %v5735_v42 = vld [vmem:[%s7491_s3 + $0x230] sm:$0xff]  ;;  %4248 = vmatpush.bf16.msra.mxu3 %v5711_v18 }
 0x1d6   : > { %4289 = vmatmul.bf16.gmra.mxu0 %v5131_v34  ;;  %3102 = vst [vmem:[#allocation2 + $0xa8] sm:$0xf] %v3094_v22  ;;  %v2815_v17 = vld [vmem:[#allocation3 + $0xc] sm:$0xe]  ;;  %v3134_v12 = vrot.slane %v3132_v33, 4  ;;  %v5726_v28 = vld [vmem:[%s7491_s3 + $0x1e8] sm:$0xff]  ;;  %4225 = vmatpush.bf16.msrb.mxu2 %v5697_v63 }
 0x1d7   : > { %2810 = vst [vmem:[#allocation2 + $0xdc] sm:$0xf] %v2785_v20  ;;  %v2922_v57 = vsel %vm6001_vm5, %v2917_v31, %v6947_v29  ;;  %v2816_v50 = vld [vmem:[#allocation3 + $0x10] sm:$0xf]  ;;  %v5634_v54 = vld [vmem:[#allocation2 + $0x28] sm:$0xf0]  ;;  %4335 = vmatpush.bf16.msra.mxu0 %v5735_v42  ;;  %4307 = vmatpush.bf16.msra.mxu1 %v5726_v28 }
 0x1d8   : > { %3103 = vst [vmem:[#allocation2 + $0xcc] sm:$0xf] %v3095_v13  ;;  %v2817_v40 = vld [vmem:[#allocation3 + $0x14] sm:$0x1]  ;;  %v3259_v44 = vrot.slane %v7114_v55, 5  ;;  %v5057_v33 = vrot.slane %v2815_v17, 9  ;;  %v3135_v45 = vor.u32 %v3134_v12, %v7128_v56 }
 0x1d9   : > { %3013 = vst [vmem:[#allocation2 + $0x10] sm:$0xf] %v2922_v57  ;;  %v5078_v53 = vld [vmem:[#allocation2 + $0x8] sm:$0xf]  ;;  %v2845_v29 = vrot.slane %v2816_v50, 5  ;;  %v7151_v8 = vrot.slane %v3138_v61, 5 }
 0x1da   : > { %3014 = vst [vmem:[#allocation2 + $0x34] sm:$0xf] %v2932_v49  ;;  %v7153_v46 = vld [vmem:[#allocation3 + $0x28] sm:$0xf]  ;;  %v5725_v32 = vld [vmem:[%s7491_s3 + $0x1e0] sm:$0xff]  ;;  %5745 = vmatpush.bf16.msra.mxu2 %v5736_v25  ;;  %v2848_v61 = vrot.slane %v2817_v40, 5  ;;  %v5079_v14 = vor.u32 %v5634_v54, %v5078_v53 }
 0x1db   : > { %v2887_v35 = vld [vmem:[#allocation3 + $0x30] sm:$0xf]  ;;  %v2888_v6 = vld [vmem:[#allocation3 + $0x34] sm:$0xf]  ;;  %v7158_v23 = vld [vmem:[#allocation3 + $0x28] sm:$0xf]  ;;  %v2846_v2 = vsel %vm5961_vm4, %v5057_v33, %v2845_v29  ;;  %4336 = vmatpush.bf16.msra.mxu0 %v7149_v47  ;;  %4308 = vmatpush.bf16.msra.mxu1 %v5725_v32 }
 0x1dc   : > { %v5180_v52 = vld [vmem:[#allocation2 + $0xfc] sm:$0xf0]  ;;  %v2847_v16 = vrot.slane %v2845_v29, 4  ;;  %2895 = vst [vmem:[#allocation2 + $0xe4] sm:$0xf] %v2887_v35  ;;  %v5710_v27 = vld [vmem:[%s7491_s3 + $0x168] sm:$0xff] }
 0x1dd   : > { %v5152_v59 = vld [vmem:[#allocation2 + $0xbc] sm:$0xf0]  ;;  %2874 = vst [vmem:[#allocation2 + $0x50] sm:$0xf] %v2846_v2  ;;  %v3096_v5 = vld [vmem:[#allocation3 + $0x3c] sm:$0xf]  ;;  %4168 = vmatmul.bf16.vlgmr.msrb.gmra.mxu3 %v5079_v14 }
 0x1de   : > { %v7165_v51 = vld [vmem:[%s7491_s3 + $0x220] sm:$0xff]  ;;  %v5656_v9 = vld [vmem:[#allocation2 + $0xdc] sm:$0xf]  ;;  %v2849_v41 = vsel %vm5961_vm4, %v2847_v16, %v2848_v61  ;;  %2896 = vst [vmem:[#allocation2 + $0x108] sm:$0xf] %v2888_v6  ;;  %v2971_v25 = vshrl.u32 %v7153_v46, 16  ;;  %4249 = vmatpush.bf16.msra.mxu3 %v5710_v27  ;;  %5746 = vmatpush.bf16.msra.mxu2 %v5735_v42 }
 0x1df   : > { %v7173_v3 = vld [vmem:[#allocation3 + $0x28] sm:$0xf]  ;;  %v5183_v11 = vor.u32 %v5656_v9, %v5180_v52  ;;  %v5654_v22 = vld [vmem:[#allocation2 + $0xc8] sm:$0xf0]  ;;  %2875 = vst [vmem:[#allocation2 + $0x74] sm:$0xf] %v2849_v41  ;;  %4337 = vmatpush.bf16.msra.mxu0 %v7165_v51 }
 0x1e0   : > { %v3097_v34 = vld [vmem:[#allocation3 + $0x40] sm:$0xf]  ;;  %v5648_v1 = vld [vmem:[#allocation2 + $0x9c] sm:$0xf]  ;;  %3104 = vst [vmem:[#allocation2 + $0xf0] sm:$0xf] %v3096_v5 }
 0x1e1   : > { %v5724_v37 = vld [vmem:[%s7491_s3 + $0x1d8] sm:$0xff]  ;;  %v3156_v13 = vshrl.u32 %v7158_v23, 16  ;;  %v5155_v20 = vor.u32 %v5648_v1, %v5152_v59  ;;  %v5166_v63 = vld [vmem:[#allocation2 + $0xa8] sm:$0xf]  ;;  %3105 = vst [vmem:[#allocation2 + $0x114] sm:$0xf] %v3097_v34  ;;  %4154 = vmatmul.bf16.gmra.mxu2 %v5183_v11 }
 0x1e2   : > { %v5709_v18 = vld [vmem:[%s7491_s3 + $0x160] sm:$0xff]  ;;  %v3136_v10 = vrot.slane %v3135_v45, 4  ;;  %v5167_v24 = vor.u32 %v5654_v22, %v5166_v63  ;;  %v2900_v31 = vld [vmem:[#allocation3 + $0x18] sm:$0xf]  ;;  %v2902_v49 = vld [vmem:[#allocation3 + $0x20] sm:$0x1]  ;;  %4309 = vmatpush.bf16.msra.mxu1 %v5724_v37  ;;  %5747 = vmatpush.bf16.msra.mxu2 %v7149_v47 }
 0x1e3   : > { %v2943_v17 = vshll.u32 %v7030_v7, 16  ;;  %v7189_v12 = vrot.slane %v3256_v21, 4  ;;  %v7191_v57 = vld [vmem:[#allocation3 + $0x34] sm:$0xf]  ;;  %4207 = vmatmul.bf16.gmra.mxu1 %v5155_v20  ;;  %v7197_v42 = vld [vmem:[%s7491_s3 + $0x218] sm:$0xff]  ;;  %v2934_v28 = vshrl.u32 %v2900_v31, 16  ;;  %4250 = vmatpush.bf16.msra.mxu3 %v5709_v18  ;;  %v3257_v18 = vsel %vm5961_vm4, %v5064_v0, %v3256_v21 }
 0x1e4   : > { %v2937_v50 = vshll.u32 %v2900_v31, 16  ;;  %v3263_v54 = vrot.slane %v7173_v3, 5  ;;  %v5723_v7 = vld [vmem:[%s7491_s3 + $0x1d0] sm:$0xff]  ;;  %v2953_v53 = vshll.u32 %v2902_v49, 16  ;;  %v3126_v33 = vrot.slane %v3125_v38, 4  ;;  %v5708_v52 = vld [vmem:[%s7491_s3 + $0x158] sm:$0xff]  ;;  %4338 = vmatpush.bf16.msra.mxu0 %v7197_v42 }
 0x1e5   : > { %v2945_v40 = vrot.slane %v2943_v17, 5  ;;  %v7203_v29 = vrot.slane %v2971_v25, 4  ;;  %v7205_v32 = vrot.slane %v3156_v13, 4  ;;  %v2936_v35 = vrot.slane %v2934_v28, 4  ;;  %v2818_v61 = vld [vmem:[#allocation3 + $0x18] sm:$0xe] }
 0x1e6   : > { %v2939_v6 = vrot.slane %v2937_v50, 5  ;;  %v2995_v2 = vshrl.u32 %v7191_v57, 16  ;;  %4294 = vmatmul.bf16.gmra.mxu0 %v5167_v24  ;;  %v2819_v14 = vld [vmem:[#allocation3 + $0x1c] sm:$0xf]  ;;  %v3131_v59 = vsel %vm6001_vm5, %v3126_v33, %v7128_v56  ;;  %v3141_v27 = vsel %vm6001_vm5, %v3136_v10, %v7151_v8  ;;  %v7223_v47 = vld [vmem:[%s7491_s3 + $0x210] sm:$0xff]  ;;  %4310 = vmatpush.bf16.msra.mxu1 %v5723_v7  ;;  %v5721_v4 = vld [vmem:[%s7491_s3 + $0x1c0] sm:$0xff] }
 0x1e7   : > { %v2950_v16 = vor.u32 %v7072_v39, %v2945_v40  ;;  %v5722_v39 = vld [vmem:[%s7491_s3 + $0x1c8] sm:$0xff]  ;;  %v2820_v9 = vld [vmem:[#allocation3 + $0x20] sm:$0x1]  ;;  %v5058_v41 = vrot.slane %v2818_v61, 9  ;;  %v2852_v5 = vrot.slane %v2819_v14, 5  ;;  %v2955_v22 = vrot.slane %v2953_v53, 5  ;;  %4251 = vmatpush.bf16.msra.mxu3 %v5708_v52  ;;  %5748 = vmatpush.bf16.msra.mxu2 %v7165_v51 }
 0x1e8   : > { %v2940_v45 = vor.u32 %v2939_v6, %v2936_v35  ;;  %v5643_v56 = vld [vmem:[#allocation2 + $0x70] sm:$0xf0]  ;;  %3222 = vst [vmem:[#allocation2 + $0x1c] sm:$0xf] %v3131_v59  ;;  %v7231_v34 = vld [vmem:[%s7491_s3 + $0x208] sm:$0xff]  ;;  %v2855_v1 = vrot.slane %v2820_v9, 5  ;;  %4339 = vmatpush.bf16.msra.mxu0 %v7223_v47  ;;  %v3260_v0 = vsel %vm5961_vm4, %v7189_v12, %v3259_v44 }
 0x1e9   : > { %v2951_v11 = vrot.slane %v2950_v16, 4  ;;  %v2853_v38 = vsel %vm5961_vm4, %v5058_v41, %v2852_v5  ;;  %v2854_v25 = vrot.slane %v2852_v5, 4  ;;  %3223 = vst [vmem:[#allocation2 + $0x40] sm:$0xf] %v3141_v27  ;;  %v5707_v37 = vld [vmem:[%s7491_s3 + $0x150] sm:$0xff]  ;;  %v2967_v21 = vshll.u32 %v7153_v46, 16 }
 0x1ea   : > { %v2941_v8 = vrot.slane %v2940_v45, 4  ;;  %v5635_v13 = vld [vmem:[#allocation2 + $0x30] sm:$0xf0]  ;;  %v5114_v20 = vld [vmem:[#allocation2 + $0x50] sm:$0xf]  ;;  %4311 = vmatpush.bf16.msra.mxu1 %v5722_v39  ;;  %v7268_v46 = vld [vmem:[%s7491_s3 + $0x200] sm:$0xff] }
 0x1eb   : > { %v2956_v63 = vsel %vm6001_vm5, %v2951_v11, %v2955_v22  ;;  %2876 = vst [vmem:[#allocation2 + $0x98] sm:$0xf] %v2853_v38  ;;  %v2903_v10 = vld [vmem:[#allocation3 + $0x24] sm:$0xf]  ;;  %v2905_v24 = vld [vmem:[#allocation3 + $0x2c] sm:$0x1]  ;;  %v2856_v31 = vsel %vm5961_vm4, %v2854_v25, %v2855_v1  ;;  %4252 = vmatpush.bf16.msra.mxu3 %v5707_v37  ;;  %5749 = vmatpush.bf16.msra.mxu2 %v7197_v42 }
 0x1ec   : > { %v2946_v51 = vsel %vm6001_vm5, %v2941_v8, %v2945_v40  ;;  %3016 = vst [vmem:[#allocation2 + $0x7c] sm:$0xf] %v2956_v63  ;;  %v2958_v49 = vshrl.u32 %v2903_v10, 16  ;;  %v2961_v17 = vshll.u32 %v2903_v10, 16  ;;  %v2821_v28 = vld [vmem:[#allocation3 + $0x24] sm:$0xe]  ;;  %v5115_v40 = vor.u32 %v5643_v56, %v5114_v20  ;;  %4340 = vmatpush.bf16.msra.mxu0 %v7231_v34 }
 0x1ed   : > { %v5086_v15 = vld [vmem:[#allocation2 + $0x10] sm:$0xf]  ;;  %v5188_v50 = vld [vmem:[#allocation2 + $0x104] sm:$0xf0]  ;;  %3015 = vst [vmem:[#allocation2 + $0x58] sm:$0xf] %v2946_v51  ;;  %v3048_v51 = vsel %vm5961_vm4, %v5060_v60, %v3047_v30 }
 0x1ee   : > { %v2822_v7 = vld [vmem:[#allocation3 + $0x28] sm:$0xf]  ;;  %2877 = vst [vmem:[#allocation2 + $0xbc] sm:$0xf] %v2856_v31  ;;  %v2960_v53 = vrot.slane %v2958_v49, 4  ;;  %v2963_v33 = vrot.slane %v2961_v17, 5  ;;  %v5087_v14 = vor.u32 %v5635_v13, %v5086_v15  ;;  %4173 = vmatmul.bf16.gmra.mxu3 %v5115_v40  ;;  %4312 = vmatpush.bf16.msra.mxu1 %v5721_v4  ;;  %v3051_v15 = vsel %vm5961_vm4, %v7022_v58, %v3050_v62 }
 0x1ef   : > { %v2823_v35 = vld [vmem:[#allocation3 + $0x2c] sm:$0x1]  ;;  %v7262_v6 = vld [vmem:[#allocation3 + $0x24] sm:$0xe]  ;;  %3290 = vst [vmem:[#allocation2 + $0x20] sm:$0xf] %v3257_v18  ;;  %5750 = vmatpush.bf16.msra.mxu2 %v7223_v47 }
 0x1f0   : > { %v2969_v52 = vrot.slane %v2967_v21, 5  ;;  %v2977_v55 = vshll.u32 %v2905_v24, 16  ;;  %v5059_v16 = vrot.slane %v2821_v28, 9  ;;  %v2859_v61 = vrot.slane %v2822_v7, 5  ;;  %v5663_v44 = vld [vmem:[#allocation2 + $0x110] sm:$0xf0]  ;;  %4341 = vmatpush.bf16.msra.mxu0 %v7268_v46 }
 0x1f1   : > { %3291 = vst [vmem:[#allocation2 + $0x44] sm:$0xf] %v3260_v0  ;;  %v2964_v12 = vor.u32 %v2963_v33, %v2960_v53  ;;  %v2862_v42 = vrot.slane %v2823_v35, 5  ;;  %v7270_v59 = vld [vmem:[#allocation3 + $0x2c] sm:$0x1]  ;;  %v3152_v5 = vshll.u32 %v7158_v23, 16  ;;  %4226 = vmatmul.bf16.vlgmr.msrb.gmra.mxu2 %v5087_v14 }
 0x1f2   : > { %v5657_v27 = vld [vmem:[#allocation2 + $0xe4] sm:$0xf]  ;;  %v2974_v45 = vor.u32 %v7203_v29, %v2969_v52  ;;  %v2860_v39 = vsel %vm5961_vm4, %v5059_v16, %v2859_v61  ;;  %v2861_v9 = vrot.slane %v2859_v61, 4  ;;  %v3109_v41 = vld [vmem:[#allocation3 + $0x24] sm:$0xf]  ;;  %v2979_v1 = vrot.slane %v2977_v55, 5 }
 0x1f3   : > { %v5191_v56 = vor.u32 %v5657_v27, %v5188_v50  ;;  %v5202_v11 = vld [vmem:[#allocation2 + $0xf0] sm:$0xf]  ;;  %v2965_v22 = vrot.slane %v2964_v12, 4  ;;  %2878 = vst [vmem:[#allocation2 + $0xe0] sm:$0xf] %v2860_v39  ;;  %v3143_v8 = vshrl.u32 %v3109_v41, 16  ;;  %5751 = vmatpush.bf16.msra.mxu2 %v7231_v34 }
 0x1f4   : > { %v5203_v38 = vor.u32 %v5663_v44, %v5202_v11  ;;  %v2975_v25 = vrot.slane %v2974_v45, 4  ;;  %v2863_v29 = vsel %vm5961_vm4, %v2861_v9, %v2862_v42  ;;  %v5706_v37 = vld [vmem:[%s7491_s3 + $0x148] sm:$0xff]  ;;  %v3111_v13 = vld [vmem:[#allocation3 + $0x2c] sm:$0x1]  ;;  %v5065_v23 = vrot.slane %v7262_v6, 9  ;;  %v5705_v28 = vld [vmem:[%s7491_s3 + $0x140] sm:$0xff] }
 0x1f5   : > { %4212 = vmatmul.bf16.gmra.mxu1 %v5191_v56  ;;  %v2970_v47 = vsel %vm6001_vm5, %v2965_v22, %v2969_v52  ;;  %2879 = vst [vmem:[#allocation2 + $0x104] sm:$0xf] %v2863_v29  ;;  %v3145_v20 = vrot.slane %v3143_v8, 4  ;;  %v3146_v63 = vshll.u32 %v3109_v41, 16  ;;  %4253 = vmatpush.bf16.msra.mxu3 %v5706_v37  ;;  %v3154_v10 = vrot.slane %v3152_v5, 5 }
 0x1f6   : > { %v2980_v18 = vsel %vm6001_vm5, %v2975_v25, %v2979_v1  ;;  %3017 = vst [vmem:[#allocation2 + $0xa0] sm:$0xf] %v2970_v47  ;;  %v3162_v24 = vshll.u32 %v3111_v13, 16  ;;  %v3265_v31 = vrot.slane %v3263_v54, 4  ;;  %v3266_v49 = vrot.slane %v7270_v59, 5  ;;  %4299 = vmatmul.bf16.gmra.mxu0 %v5203_v38 }
 0x1f7   : > { %3018 = vst [vmem:[#allocation2 + $0xc4] sm:$0xf] %v2980_v18  ;;  %v3148_v17 = vrot.slane %v3146_v63, 5  ;;  %v2997_v36 = vrot.slane %v2995_v2, 4  ;;  %v3159_v26 = vor.u32 %v7205_v32, %v3154_v10  ;;  %v2906_v60 = vld [vmem:[#allocation3 + $0x30] sm:$0xf]  ;;  %v3264_v2 = vsel %vm5961_vm4, %v5065_v23, %v3263_v54  ;;  %5752 = vmatpush.bf16.msra.mxu2 %v7268_v46 }
 0x1f8   : > { %v2991_v30 = vshll.u32 %v7191_v57, 16  ;;  %v2908_v4 = vld [vmem:[#allocation3 + $0x38] sm:$0x1]  ;;  %v2982_v0 = vshrl.u32 %v2906_v60, 16  ;;  %v2985_v21 = vshll.u32 %v2906_v60, 16  ;;  %v3164_v57 = vrot.slane %v3162_v24, 5 }
 0x1f9   : > { %v3149_v50 = vor.u32 %v3148_v17, %v3145_v20  ;;  %3081 = vst [vmem:[#allocation2 + $0x14] sm:$0xf] %v3048_v51  ;;  %v7314_v32 = vld [vmem:[#allocation3 + $0x34] sm:$0xf]  ;;  %v3160_v34 = vrot.slane %v3159_v26, 4  ;;  %4254 = vmatpush.bf16.msra.mxu3 %v5705_v28  ;;  %v3001_v7 = vshll.u32 %v2908_v4, 16  ;;  %v3267_v54 = vsel %vm5961_vm4, %v3265_v31, %v3266_v49 }
 0x1fa   : > { %v2993_v43 = vrot.slane %v2991_v30, 5  ;;  %v2984_v53 = vrot.slane %v2982_v0, 4  ;;  %v2987_v58 = vrot.slane %v2985_v21, 5  ;;  %3082 = vst [vmem:[#allocation2 + $0x38] sm:$0xf] %v3051_v15  ;;  %v3180_v14 = vshrl.u32 %v7314_v32, 16 }
 0x1fb   : > { %v3150_v40 = vrot.slane %v3149_v50, 4  ;;  %v5150_v62 = vld [vmem:[#allocation2 + $0x98] sm:$0xf]  ;;  %v5652_v33 = vld [vmem:[#allocation2 + $0xb8] sm:$0xf0]  ;;  %v3165_v3 = vsel %vm6001_vm5, %v3160_v34, %v3164_v57  ;;  %v3003_v46 = vrot.slane %v3001_v7, 5 }
 0x1fc   : > { %v2998_v35 = vor.u32 %v2997_v36, %v2993_v43  ;;  %3292 = vst [vmem:[#allocation2 + $0x68] sm:$0xf] %v3264_v2  ;;  %v5644_v6 = vld [vmem:[#allocation2 + $0x78] sm:$0xf0]  ;;  %v5096_v52 = vld [vmem:[#allocation2 + $0x3c] sm:$0xf0]  ;;  %v2988_v16 = vor.u32 %v2987_v58, %v2984_v53  ;;  %v5151_v42 = vor.u32 %v5652_v33, %v5150_v62 }
 0x1fd   : > { %v3155_v55 = vsel %vm6001_vm5, %v3150_v40, %v3154_v10  ;;  %3225 = vst [vmem:[#allocation2 + $0x88] sm:$0xf] %v3165_v3  ;;  %v3112_v61 = vld [vmem:[#allocation3 + $0x30] sm:$0xf]  ;;  %v5632_v59 = vld [vmem:[#allocation2 + $0x1c] sm:$0xf] }
 0x1fe   : > { %3224 = vst [vmem:[#allocation2 + $0x64] sm:$0xf] %v3155_v55  ;;  %v2999_v44 = vrot.slane %v2998_v35, 4  ;;  %v3167_v12 = vshrl.u32 %v3112_v61, 16  ;;  %v2989_v27 = vrot.slane %v2988_v16, 4  ;;  %v3170_v45 = vshll.u32 %v3112_v61, 16  ;;  %4178 = vmatmul.bf16.gmra.mxu3 %v5151_v42 }
 0x1ff   : > { %3293 = vst [vmem:[#allocation2 + $0x8c] sm:$0xf] %v3267_v54  ;;  %v3024_v39 = vld [vmem:[#allocation3 + $0x18] sm:$0xe]  ;;  %v5122_v9 = vld [vmem:[#allocation2 + $0x58] sm:$0xf]  ;;  %v5099_v29 = vor.u32 %v5632_v59, %v5096_v52 }
 0x200   : > { %v3004_v41 = vsel %vm6001_vm5, %v2999_v44, %v3003_v46  ;;  %v3169_v5 = vrot.slane %v3167_v12, 4  ;;  %v3025_v56 = vld [vmem:[#allocation3 + $0x1c] sm:$0xf]  ;;  %v5061_v11 = vrot.slane %v3024_v39, 9  ;;  %v2994_v22 = vsel %vm6001_vm5, %v2989_v27, %v2993_v43  ;;  %v3026_v38 = vld [vmem:[#allocation3 + $0x20] sm:$0x1] }
 0x201   : > { %3020 = vst [vmem:[#allocation2 + $0x10c] sm:$0xf] %v3004_v41  ;;  %v3172_v8 = vrot.slane %v3170_v45, 5  ;;  %v3054_v25 = vrot.slane %v3025_v56, 5  ;;  %v5123_v1 = vor.u32 %v5644_v6, %v5122_v9  ;;  %v5637_v37 = vld [vmem:[#allocation2 + $0x40] sm:$0xf0] }
 0x202   : > { %3019 = vst [vmem:[#allocation2 + $0xe8] sm:$0xf] %v2994_v22  ;;  %v3057_v20 = vrot.slane %v3026_v38, 5  ;;  %v3182_v63 = vrot.slane %v3180_v14, 4  ;;  %v7330_v18 = vld [vmem:[#allocation3 + $0x40] sm:$0xf] }
 0x203   : > { %v3173_v13 = vor.u32 %v3172_v8, %v3169_v5  ;;  %v3055_v23 = vsel %vm5961_vm4, %v5061_v11, %v3054_v25  ;;  %v3056_v47 = vrot.slane %v3054_v25, 4  ;;  %4231 = vmatmul.bf16.gmra.mxu2 %v5123_v1  ;;  %v3114_v10 = vld [vmem:[#allocation3 + $0x38] sm:$0x1]  ;;  %v5102_v24 = vld [vmem:[#allocation2 + $0x20] sm:$0xf]  ;;  %v3176_v51 = vshll.u32 %v7314_v32, 16 }
 0x204   : > { %v3186_v31 = vshll.u32 %v3114_v10, 16  ;;  %v3236_v17 = vld [vmem:[#allocation3 + $0x30] sm:$0xe]  ;;  %v5103_v28 = vor.u32 %v5637_v37, %v5102_v24  ;;  %3083 = vst [vmem:[#allocation2 + $0x5c] sm:$0xf] %v3055_v23  ;;  %v3204_v30 = vshrl.u32 %v7330_v18, 16 }
 0x205   : > { %4313 = vmatmul.bf16.vlgmr.msra.gmra.mxu1 %v5099_v29  ;;  %v3058_v49 = vsel %vm5961_vm4, %v3056_v47, %v3057_v20  ;;  %v3174_v36 = vrot.slane %v3173_v13, 4  ;;  %v3178_v26 = vrot.slane %v3176_v51, 5  ;;  %v3237_v60 = vld [vmem:[#allocation3 + $0x34] sm:$0xf]  ;;  %v3238_v15 = vld [vmem:[#allocation3 + $0x38] sm:$0x1] }
 0x206   : > { %3084 = vst [vmem:[#allocation2 + $0x80] sm:$0xf] %v3058_v49  ;;  %4342 = vmatmul.bf16.vlgmr.msra.gmra.mxu0 %v5103_v28  ;;  %v5066_v50 = vrot.slane %v3236_v17, 9  ;;  %v3270_v4 = vrot.slane %v3237_v60, 5  ;;  %v3188_v2 = vrot.slane %v3186_v31, 5  ;;  %v3273_v32 = vrot.slane %v3238_v15, 5 }
 0x207   : > { %v3179_v0 = vsel %vm6001_vm5, %v3174_v36, %v3178_v26  ;;  %v3183_v21 = vor.u32 %v3182_v63, %v3178_v26  ;;  %v3027_v34 = vld [vmem:[#allocation3 + $0x24] sm:$0xe]  ;;  %v3028_v7 = vld [vmem:[#allocation3 + $0x28] sm:$0xf]  ;;  %v3029_v58 = vld [vmem:[#allocation3 + $0x2c] sm:$0x1] }
 0x208   : > { %3226 = vst [vmem:[#allocation2 + $0xac] sm:$0xf] %v3179_v0  ;;  %v3271_v57 = vsel %vm5961_vm4, %v5066_v50, %v3270_v4  ;;  %v3272_v43 = vrot.slane %v3270_v4, 4  ;;  %v5062_v40 = vrot.slane %v3027_v34, 9  ;;  %v3061_v62 = vrot.slane %v3028_v7, 5 }
 0x209   : > { %v3184_v53 = vrot.slane %v3183_v21, 4  ;;  %3294 = vst [vmem:[#allocation2 + $0xb0] sm:$0xf] %v3271_v57  ;;  %v5186_v33 = vld [vmem:[#allocation2 + $0xe0] sm:$0xf]  ;;  %v3064_v16 = vrot.slane %v3029_v58, 5 }
 0x20a   : > { %v5661_v3 = vld [vmem:[#allocation2 + $0x100] sm:$0xf0]  ;;  %v3274_v35 = vsel %vm5961_vm4, %v3272_v43, %v3273_v32  ;;  %v3030_v54 = vld [vmem:[#allocation3 + $0x30] sm:$0xe]  ;;  %v3062_v52 = vsel %vm5961_vm4, %v5062_v40, %v3061_v62  ;;  %v3063_v55 = vrot.slane %v3061_v62, 4  ;;  %v3206_v29 = vrot.slane %v3204_v30, 4 }
 0x20b   : > { %v3189_v6 = vsel %vm6001_vm5, %v3184_v53, %v3188_v2  ;;  %3295 = vst [vmem:[#allocation2 + $0xd4] sm:$0xf] %v3274_v35  ;;  %v3031_v61 = vld [vmem:[#allocation3 + $0x34] sm:$0xf]  ;;  %v5158_v14 = vld [vmem:[#allocation2 + $0xa0] sm:$0xf]  ;;  %v5187_v12 = vor.u32 %v5661_v3, %v5186_v33 }
 0x20c   : > { %v5653_v44 = vld [vmem:[#allocation2 + $0xc0] sm:$0xf0]  ;;  %3227 = vst [vmem:[#allocation2 + $0xd0] sm:$0xf] %v3189_v6  ;;  %v3032_v46 = vld [vmem:[#allocation3 + $0x38] sm:$0x1]  ;;  %v3065_v27 = vsel %vm5961_vm4, %v3063_v55, %v3064_v16 }
 0x20d   : > { %v5132_v42 = vld [vmem:[#allocation2 + $0x84] sm:$0xf0]  ;;  %v3115_v59 = vld [vmem:[#allocation3 + $0x3c] sm:$0xf]  ;;  %3085 = vst [vmem:[#allocation2 + $0xa4] sm:$0xf] %v3062_v52  ;;  %v5159_v5 = vor.u32 %v5653_v44, %v5158_v14 }
 0x20e   : > { %v3191_v45 = vshrl.u32 %v3115_v59, 16  ;;  %v3194_v39 = vshll.u32 %v3115_v59, 16  ;;  %3086 = vst [vmem:[#allocation2 + $0xc8] sm:$0xf] %v3065_v27  ;;  %v5063_v9 = vrot.slane %v3030_v54, 9  ;;  %v3068_v41 = vrot.slane %v3031_v61, 5  ;;  %4183 = vmatmul.bf16.gmra.mxu3 %v5187_v12 }
 0x20f   : > { %v3071_v56 = vrot.slane %v3032_v46, 5  ;;  %v5641_v11 = vld [vmem:[#allocation2 + $0x64] sm:$0xf]  ;;  %v3117_v37 = vld [vmem:[#allocation3 + $0x44] sm:$0x1]  ;;  %v3200_v23 = vshll.u32 %v7330_v18, 16 }
 0x210   : > { %v3193_v22 = vrot.slane %v3191_v45, 4  ;;  %v3196_v8 = vrot.slane %v3194_v39, 5  ;;  %v3069_v38 = vsel %vm5961_vm4, %v5063_v9, %v3068_v41  ;;  %v3070_v25 = vrot.slane %v3068_v41, 4  ;;  %v3239_v63 = vld [vmem:[#allocation3 + $0x3c] sm:$0xe] }
 0x211   : > { %v5135_v1 = vor.u32 %v5641_v11, %v5132_v42  ;;  %3087 = vst [vmem:[#allocation2 + $0xec] sm:$0xf] %v3069_v38  ;;  %v3210_v20 = vshll.u32 %v3117_v37, 16  ;;  %v3202_v24 = vrot.slane %v3200_v23, 5  ;;  %v3240_v51 = vld [vmem:[#allocation3 + $0x40] sm:$0xf] }
 0x212   : > { %v3197_v13 = vor.u32 %v3196_v8, %v3193_v22  ;;  %v3072_v47 = vsel %vm5961_vm4, %v3070_v25, %v3071_v56  ;;  %v3241_v17 = vld [vmem:[#allocation3 + $0x44] sm:$0x1]  ;;  %v5067_v28 = vrot.slane %v3239_v63, 9  ;;  %v3277_v36 = vrot.slane %v3240_v51, 5  ;;  %v5088_v50 = vld [vmem:[#allocation2 + $0x34] sm:$0xf0] }
 0x213   : > { %4236 = vmatmul.bf16.gmra.mxu2 %v5159_v5  ;;  %3088 = vst [vmem:[#allocation2 + $0x110] sm:$0xf] %v3072_v47  ;;  %v3207_v49 = vor.u32 %v3206_v29, %v3202_v24  ;;  %v3212_v26 = vrot.slane %v3210_v20, 5  ;;  %v3280_v15 = vrot.slane %v3241_v17, 5  ;;  %v4111_v21 = vpop.f32.mrf.mxu1  ;;  %v5631_v2 = vld [vmem:[#allocation2 + $0x14] sm:$0xf] }
 0x214   : > { %v3198_v10 = vrot.slane %v3197_v13, 4  ;;  %v3278_v60 = vsel %vm5961_vm4, %v5067_v28, %v3277_v36  ;;  %v3279_v30 = vrot.slane %v3277_v36, 4  ;;  %v5662_v32 = vld [vmem:[#allocation2 + $0x108] sm:$0xf0]  ;;  %v7364_v34 = vld [vmem:[%s7492_s4] ss:$0 sm:$0xff]  ;;  %v5091_v57 = vor.u32 %v5631_v2, %v5088_v50 }
 0x215   : > { %4318 = vmatmul.bf16.gmra.mxu1 %v5135_v1  ;;  %v3208_v18 = vrot.slane %v3207_v49, 4  ;;  %3296 = vst [vmem:[#allocation2 + $0xf8] sm:$0xf] %v3278_v60  ;;  %v5168_v43 = vld [vmem:[#allocation2 + $0xcc] sm:$0xf0]  ;;  %v4112_v53 = vadd.f32 %v7364_v34, %v4111_v21 }
 0x216   : > { %v3203_v31 = vsel %vm6001_vm5, %v3198_v10, %v3202_v24  ;;  %v3281_v0 = vsel %vm5961_vm4, %v3279_v30, %v3280_v15  ;;  %v5194_v7 = vld [vmem:[#allocation2 + $0xe8] sm:$0xf]  ;;  %v5650_v48 = vld [vmem:[#allocation2 + $0xac] sm:$0xf]  ;;  %v5124_v35 = vld [vmem:[#allocation2 + $0x7c] sm:$0xf0] }
 0x217   : > { %3228 = vst [vmem:[#allocation2 + $0xf4] sm:$0xf] %v3203_v31  ;;  %v3213_v4 = vsel %vm6001_vm5, %v3208_v18, %v3212_v26  ;;  %v5195_v40 = vor.u32 %v5662_v32, %v5194_v7  ;;  %v5171_v19 = vor.u32 %v5650_v48, %v5168_v43  ;;  %v5640_v52 = vld [vmem:[#allocation2 + $0x5c] sm:$0xf]  ;;  %v5646_v55 = vld [vmem:[#allocation2 + $0x88] sm:$0xf0] }
 0x218   : > { %3229 = vst [vmem:[#allocation2 + $0x118] sm:$0xf] %v3213_v4  ;;  %v5127_v16 = vor.u32 %v5640_v52, %v5124_v35  ;;  %v5138_v14 = vld [vmem:[#allocation2 + $0x68] sm:$0xf]  ;;  %v5649_v27 = vld [vmem:[#allocation2 + $0xa4] sm:$0xf] }
 0x219   : > { %3297 = vst [vmem:[#allocation2 + $0x11c] sm:$0xf] %v3281_v0  ;;  %v5139_v44 = vor.u32 %v5646_v55, %v5138_v14  ;;  %v5160_v59 = vld [vmem:[#allocation2 + $0xc4] sm:$0xf0]  ;;  %v5655_v9 = vld [vmem:[#allocation2 + $0xd0] sm:$0xf0] }
 0x21a   : > { %v5163_v41 = vor.u32 %v5649_v27, %v5160_v59  ;;  %v5174_v11 = vld [vmem:[#allocation2 + $0xb0] sm:$0xf]  ;;  %v5658_v23 = vld [vmem:[#allocation2 + $0xec] sm:$0xf] }
 0x21b   : > { %v4113_v33 = vpop.f32.mrf.mxu1  ;;  %v5175_v8 = vor.u32 %v5655_v9, %v5174_v11  ;;  %v5196_v13 = vld [vmem:[#allocation2 + $0x10c] sm:$0xf0] }
 0x21c   : > { %v4114_v3 = vadd.f32 %v7364_v34, %v4113_v33  ;;  %v5199_v20 = vor.u32 %v5658_v23, %v5196_v13  ;;  %v5210_v63 = vld [vmem:[#allocation2 + $0xf8] sm:$0xf] }
 0x21e   : > { %4255 = vmatmul.bf16.vlgmr.msra.gmra.mxu3 %v5091_v57  ;;  %v5659_v46 = vld [vmem:[#allocation2 + $0xf4] sm:$0xf] }
 0x21f   : > { %v5204_v61 = vld [vmem:[#allocation2 + $0x114] sm:$0xf0] }
 0x220   : > { %v5207_v12 = vor.u32 %v5659_v46, %v5204_v61  ;;  %v5664_v47 = vld [vmem:[#allocation2 + $0x118] sm:$0xf0] }
 0x221   : > { %v5211_v10 = vor.u32 %v5664_v47, %v5210_v63 }
 0x223   : > { %4241 = vmatmul.bf16.gmra.mxu2 %v5195_v40  ;;  %v4140_v58 = vpop.f32.mrf.mxu2 }
 0x224   : > { %v7367_v62 = vadd.f32 %v4140_v58, %v4112_v53 }
 0x225   : > { %4323 = vmatmul.bf16.gmra.mxu1 %v5171_v19  ;;  %v4116_v42 = vpop.f32.mrf.mxu1 }
 0x226   : > { %v4117_v45 = vadd.f32 %v7364_v34, %v4116_v42 }
 0x22b   : > { %v4142_v54 = vpop.f32.mrf.mxu2 }
 0x22c   : > { %v7370_v6 = vadd.f32 %v4142_v54, %v4114_v3 }
 0x22d   : > { %v4118_v39 = vpop.f32.mrf.mxu1 }
 0x22e   : > { %4260 = vmatmul.bf16.gmra.mxu3 %v5127_v16  ;;  %v4119_v38 = vadd.f32 %v7364_v34, %v4118_v39 }
 0x233   : > { %4347 = vmatmul.bf16.vlgmr.msra.gmra.mxu2 %v5139_v44 }
 0x235   : > { %4328 = vmatmul.bf16.gmra.mxu1 %v5207_v12 }
 0x237   : > { %v4198_v29 = vpop.f32.mrf.mxu1 }
 0x238   : > { %v4285_v17 = vpop.f32.mrf.mxu0 }
 0x23a   : > { %v4121_v56 = vpop.f32.mrf.mxu3 }
 0x23b   : > { %v4122_v31 = vadd.f32 %v7364_v34, %v4121_v56 }
 0x23c   : > { %v4145_v5 = vpop.f32.mrf.mxu2 }
 0x23d   : > { %v7373_v22 = vadd.f32 %v4145_v5, %v4117_v45 }
 0x23e   : > { %4265 = vmatmul.bf16.gmra.mxu3 %v5163_v41 }
 0x23f   : > { %v4200_v24 = vpop.f32.mrf.mxu1 }
 0x240   : > { %v4287_v15 = vpop.f32.mrf.mxu0 }
 0x242   : > { %v4123_v37 = vpop.f32.mrf.mxu3 }
 0x243   : > { %4352 = vmatmul.bf16.gmra.mxu2 %v5175_v8  ;;  %v4124_v26 = vadd.f32 %v7364_v34, %v4123_v37 }
 0x244   : > { %v4147_v25 = vpop.f32.mrf.mxu2 }
 0x245   : > { %v7376_v1 = vadd.f32 %v4147_v25, %v4119_v38 }
 0x24e   : > { %4270 = vmatmul.bf16.gmra.mxu3 %v5199_v20 }
 0x24f   : > { %v7382_v18 = vpop.f32.mrf.mxu1 }
 0x250   : > { %v4126_v51 = vpop.f32.mrf.mxu3 }
 0x251   : > { %v4127_v4 = vadd.f32 %v7364_v34, %v4126_v51 }
 0x253   : > { %4357 = vmatmul.bf16.gmra.mxu2 %v5211_v10  ;;  %v7391_v32 = vpop.f32.mrf.mxu0 }
 0x254   : > { %v4150_v49 = vpop.f32.mrf.mxu2 }
 0x255   : > { %v7379_v28 = vadd.f32 %v4150_v49, %v4122_v31 }
 0x257   : > { %v7387_v21 = vpop.f32.mrf.mxu1 }
 0x258   : > { %v4128_v36 = vpop.f32.mrf.mxu3 }
 0x259   : > { %v4129_v43 = vadd.f32 %v7364_v34, %v4128_v36 }
 0x25b   : > { %v7398_v19 = vpop.f32.mrf.mxu0 }
 0x25c   : > { %v4152_v60 = vpop.f32.mrf.mxu2 }
 0x25d   : > { %v7384_v30 = vadd.f32 %v4152_v60, %v4124_v26 }
 0x260   : > { %v4169_v50 = vpop.f32.mrf.mxu3  ;;  %v7396_v48 = vpop.f32.mrf.mxu1 }
 0x261   : > { %v4170_v45 = vadd.f32 %v4169_v50, %v7367_v62 }
 0x263   : > { %v7402_v54 = vpop.f32.mrf.mxu0  ;;  %v4199_v41 = vadd.f32 %v4198_v29, %v4170_v45 }
 0x264   : > { %v4155_v0 = vpop.f32.mrf.mxu2 }
 0x265   : > { %v7389_v2 = vadd.f32 %v4155_v0, %v4127_v4 }
 0x268   : > { %v4171_v57 = vpop.f32.mrf.mxu3  ;;  %v7400_v33 = vpop.f32.mrf.mxu1 }
 0x269   : > { %v4172_v8 = vadd.f32 %v4171_v57, %v7370_v6 }
 0x26b   : > { %v7408_v16 = vpop.f32.mrf.mxu0  ;;  %v4201_v62 = vadd.f32 %v4200_v24, %v4172_v8 }
 0x26c   : > { %v4157_v7 = vpop.f32.mrf.mxu2 }
 0x26d   : > { %v7394_v40 = vadd.f32 %v4157_v7, %v4129_v43 }
 0x271   : > { %v4174_v53 = vpop.f32.mrf.mxu3 }
 0x272   : > { %v7406_v55 = vpop.f32.mrf.mxu1  ;;  %v4175_v29 = vadd.f32 %v4174_v53, %v7373_v22 }
 0x273   : > { %v7414_v46 = vpop.f32.mrf.mxu0 }
 0x274   : > { %v4227_v58 = vpop.f32.mrf.mxu2 }
 0x275   : > { %v4228_v5 = vadd.f32 %v4227_v58, %v4199_v41 }
 0x279   : > { %v4176_v3 = vpop.f32.mrf.mxu3 }
 0x27a   : > { %v7412_v44 = vpop.f32.mrf.mxu1  ;;  %v4177_v4 = vadd.f32 %v4176_v3, %v7376_v1 }
 0x27b   : > { %v7424_v39 = vpop.f32.mrf.mxu0 }
 0x27c   : > { %v4229_v35 = vpop.f32.mrf.mxu2 }
 0x27d   : > { %v4230_v47 = vadd.f32 %v4229_v35, %v4201_v62 }
 0x281   : > { %v7404_v52 = vpop.f32.mrf.mxu3 }
 0x282   : > { %v4314_v59 = vpop.f32.mrf.mxu1 }
 0x283   : > { %v4343_v13 = vpop.f32.mrf.mxu0 }
 0x286   : > { %v4232_v34 = vpop.f32.mrf.mxu2 }
 0x289   : > { %v7410_v61 = vpop.f32.mrf.mxu3 }
 0x28a   : > { %v4316_v56 = vpop.f32.mrf.mxu1 }
 0x28b   : > { %v4345_v26 = vpop.f32.mrf.mxu0 }
 0x28e   : > { %v4234_v14 = vpop.f32.mrf.mxu2 }
 0x291   : > { %v7416_v12 = vpop.f32.mrf.mxu3 }
 0x292   : > { %v4319_v31 = vpop.f32.mrf.mxu1 }
 0x296   : > { %v7418_v42 = vpop.f32.mrf.mxu2 }
 0x299   : > { %v7420_v27 = vpop.f32.mrf.mxu3 }
 0x29a   : > { %v4321_v58 = vpop.f32.mrf.mxu1 }
 0x29e   : > { %v7426_v9 = vpop.f32.mrf.mxu2 }
 0x2a1   : > { %v4256_v11 = vpop.f32.mrf.mxu3 }
 0x2a2   : > { %v4257_v38 = vadd.f32 %v4256_v11, %v4228_v5 }
 0x2a4   : > { %v4286_v37 = vadd.f32 %v4285_v17, %v4257_v38  ;;  %v4204_v17 = vadd.f32 %v7382_v18, %v4175_v29  ;;  %v4185_v29 = vadd.f32 %v7416_v12, %v7389_v2 }
 0x2a6   : > { %v7430_v25 = vpop.f32.mrf.mxu2  ;;  %v4315_v23 = vadd.f32 %v4314_v59, %v4286_v37  ;;  %v4233_v22 = vadd.f32 %v4232_v34, %v4204_v17  ;;  %v4180_v34 = vadd.f32 %v7404_v52, %v7379_v28  ;;  %v4182_v37 = vadd.f32 %v7410_v61, %v7384_v30 }
 0x2a7   : > { %v4187_v17 = vadd.f32 %v7420_v27, %v7394_v40 }
 0x2a8   : > { %v4344_v20 = vadd.f32 %v4343_v13, %v4315_v23 }
 0x2a9   : > { %v4258_v63 = vpop.f32.mrf.mxu3 }
 0x2aa   : > { %v4363_v10 = vmax.f32 %v4344_v20, 0.0  ;;  %v4259_v51 = vadd.f32 %v4258_v63, %v4230_v47 }
 0x2ac   : > { %v4371_v6 = vmin.f32 %v4363_v10, 6.0  ;;  %v4288_v24 = vadd.f32 %v4287_v15, %v4259_v51  ;;  %v4206_v15 = vadd.f32 %v7387_v21, %v4177_v4  ;;  %v4324_v21 = vpop.f32.mrf.mxu1 }
 0x2ae   : > { %v7438_v49 = vpop.f32.mrf.mxu2  ;;  %4379 = vst [vmem:[%s7436_s19] sm:$0xff] %v4371_v6  ;;  %v4317_v36 = vadd.f32 %v4316_v56, %v4288_v24  ;;  %v4235_v35 = vadd.f32 %v4234_v14, %v4206_v15 }
 0x2b0   : > { %v4346_v60 = vadd.f32 %v4345_v26, %v4317_v36 }
 0x2b1   : > { %v4261_v50 = vpop.f32.mrf.mxu3 }
 0x2b2   : > { %v4364_v0 = vmax.f32 %v4346_v60, 0.0  ;;  %v4262_v57 = vadd.f32 %v4261_v50, %v4233_v22 }
 0x2b4   : > { %v4372_v43 = vmin.f32 %v4364_v0, 6.0  ;;  %v4291_v53 = vadd.f32 %v7391_v32, %v4262_v57  ;;  %v4209_v32 = vadd.f32 %v7396_v48, %v4180_v34 }
 0x2b6   : > { %v4348_v7 = vpop.f32.mrf.mxu2  ;;  %4380 = vst [vmem:[%s7436_s19 + $0x8] sm:$0xff] %v4372_v43  ;;  %v4320_v18 = vadd.f32 %v4319_v31, %v4291_v53  ;;  %v4238_v8 = vadd.f32 %v7418_v42, %v4209_v32  ;;  %v4326_v42 = vpop.f32.mrf.mxu1 }
 0x2b8   : > { %v4349_v59 = vadd.f32 %v4348_v7, %v4320_v18 }
 0x2b9   : > { %v4263_v45 = vpop.f32.mrf.mxu3 }
 0x2ba   : > { %v4365_v41 = vmax.f32 %v4349_v59, 0.0  ;;  %v4264_v1 = vadd.f32 %v4263_v45, %v4235_v35 }
 0x2bc   : > { %v4373_v3 = vmin.f32 %v4365_v41, 6.0  ;;  %v4293_v56 = vadd.f32 %v7398_v19, %v4264_v1  ;;  %v4211_v19 = vadd.f32 %v7400_v33, %v4182_v37 }
 0x2be   : > { %v4350_v5 = vpop.f32.mrf.mxu2  ;;  %4381 = vst [vmem:[%s7436_s19 + $0x10] sm:$0xff] %v4373_v3  ;;  %v4322_v11 = vadd.f32 %v4321_v58, %v4293_v56  ;;  %v4240_v47 = vadd.f32 %v7426_v9, %v4211_v19  ;;  %v4329_v12 = vpop.f32.mrf.mxu1 }
 0x2c0   : > { %v4351_v14 = vadd.f32 %v4350_v5, %v4322_v11 }
 0x2c1   : > { %v4266_v38 = vpop.f32.mrf.mxu3 }
 0x2c2   : > { %v4366_v28 = vmax.f32 %v4351_v14, 0.0  ;;  %v4267_v52 = vadd.f32 %v4266_v38, %v4238_v8 }
 0x2c4   : > { %v4374_v13 = vmin.f32 %v4366_v28, 6.0  ;;  %v4296_v23 = vadd.f32 %v7402_v54, %v4267_v52  ;;  %v4214_v54 = vadd.f32 %v7406_v55, %v4185_v29 }
 0x2c6   : > { %v4353_v62 = vpop.f32.mrf.mxu2  ;;  %4382 = vst [vmem:[%s7436_s19 + $0x18] sm:$0xff] %v4374_v13  ;;  %v4325_v48 = vadd.f32 %v4324_v21, %v4296_v23  ;;  %v4243_v6 = vadd.f32 %v7430_v25, %v4214_v54  ;;  %v4331_v43 = vpop.f32.mrf.mxu1 }
 0x2c8   : > { %v4354_v20 = vadd.f32 %v4353_v62, %v4325_v48 }
 0x2c9   : > { %v4268_v63 = vpop.f32.mrf.mxu3 }
 0x2ca   : > { %v4367_v30 = vmax.f32 %v4354_v20, 0.0  ;;  %v4269_v61 = vadd.f32 %v4268_v63, %v4240_v47 }
 0x2cc   : > { %v4375_v10 = vmin.f32 %v4367_v30, 6.0  ;;  %v4298_v31 = vadd.f32 %v7408_v16, %v4269_v61  ;;  %v4216_v16 = vadd.f32 %v7412_v44, %v4187_v17 }
 0x2ce   : > { %v4355_v51 = vpop.f32.mrf.mxu2  ;;  %4383 = vst [vmem:[%s7436_s19 + $0x20] sm:$0xff] %v4375_v10  ;;  %v4327_v33 = vadd.f32 %v4326_v42, %v4298_v31  ;;  %v4245_v25 = vadd.f32 %v7438_v49, %v4216_v16 }
 0x2d0   : > { %v4356_v9 = vadd.f32 %v4355_v51, %v4327_v33 }
 0x2d1   : > { %v4271_v24 = vpop.f32.mrf.mxu3 }
 0x2d2   : > { %v4368_v36 = vmax.f32 %v4356_v9, 0.0  ;;  %v4272_v2 = vadd.f32 %v4271_v24, %v4243_v6 }
 0x2d4   : > { %v4376_v26 = vmin.f32 %v4368_v36, 6.0  ;;  %v4301_v22 = vadd.f32 %v7414_v46, %v4272_v2 }
 0x2d6   : > { %v4358_v60 = vpop.f32.mrf.mxu2  ;;  %4384 = vst [vmem:[%s7436_s19 + $0x28] sm:$0xff] %v4376_v26  ;;  %v4330_v55 = vadd.f32 %v4329_v12, %v4301_v22 }
 0x2d8   : > { %v4359_v50 = vadd.f32 %v4358_v60, %v4330_v55 }
 0x2d9   : > { %v4273_v4 = vpop.f32.mrf.mxu3 }
 0x2da   : > { %v4369_v0 = vmax.f32 %v4359_v50, 0.0  ;;  %v4274_v57 = vadd.f32 %v4273_v4, %v4245_v25 }
 0x2dc   : > { %v4377_v40 = vmin.f32 %v4369_v0, 6.0  ;;  %v4303_v27 = vadd.f32 %v7424_v39, %v4274_v57 }
 0x2de   : > { %4385 = vst [vmem:[%s7436_s19 + $0x30] sm:$0xff] %v4377_v40  ;;  %v4332_v7 = vadd.f32 %v4331_v43, %v4303_v27  ;;  %v4360_v53 = vpop.f32.mrf.mxu2 }
 0x2e0   : > { %v4361_v46 = vadd.f32 %v4360_v53, %v4332_v7 }
 0x2e2   : > { %v4370_v58 = vmax.f32 %v4361_v46, 0.0 }
 0x2e4   : > { %v4378_v15 = vmin.f32 %v4370_v58, 6.0 }
 0x2e6   : > { %4386 = vst [vmem:[%s7436_s19 + $0x38] sm:$0xff] %v4378_v15 }
 0x2e7 PF: > { %s15_s22 = sadd.s32 1, %s5835_s22   ;;  %s7518_s18 = smov %s5827_s20 }
 0x2e8   : > { %p12_p7 = scmp.ge.s32.totalorder %s15_s22, 10   ;;  %s7519_s19 = smov %s5831_s21 }
 0x2e9   : > { %s7520_s20 = smov %s7523_s23  ;;  %s7521_s21 = smov %s7527_s24 }
 0x2ea   :  { %14 = sbr.rel (!%p12_p7) target bundleno = 3 (0x3), region = 75 }

</bundles_post_ra>
